<compile_context>
chip_gen: v6e
topology: v6e:2x2x1
jax: 0.10.0
libtpu: 0.0.40
codegen_flags: <defaults>
</compile_context>

<pallas_src>
import functools

import jax
import jax.numpy as jnp
import numpy as np
from jax.experimental import pallas as pl
from jax.experimental.pallas import tpu as pltpu

ROWS, COLS = 6, 7            # Connect4 board
IN_CH = 3
C1, C2 = 32, 64              # conv channel widths
HID = 128                    # fc1 width
HP, WP = ROWS + 2, COLS + 2  # SAME-padded board: 8 x 9
P = HP * WP                  # 72 padded grid positions per image
IN_CH_PAD = 8                # pad input channels 3 -> 8 lanes
OUT_PAD = 128                # lane-dense fc2 output (sliced to 7 outside)


# ----------------------------------------------------------------------------
# Fused kernel: conv1 -> relu -> conv2 -> relu -> (flatten) -> fc1 -> relu -> fc2
# ----------------------------------------------------------------------------
def _fused_kernel(x_ref, mask_ref, w1_ref, b1_ref, w2_ref, b2_ref,
                  wf1_ref, bf1_ref, wf2_ref, bf2_ref,
                  o_ref, a1_buf, a2_buf, *, batch, margin):
    B = batch
    N = P * B            # valid (padded-grid x batch) rows; multiple of 8
    M = margin           # zero margin rows on each side of the flat buffers

    # ---- conv1: 9 row-shifted matmuls over the padded flat input ------------
    acc1 = jnp.zeros((N, C1), jnp.float32)
    for kh in range(3):
        for kw in range(3):
            s = ((kh - 1) * WP + (kw - 1)) * B
            patch = x_ref[pl.ds(M + s, N), :]                           # (N, 8)
            wk = w1_ref[pl.ds((kh * 3 + kw) * IN_CH_PAD, IN_CH_PAD), :]  # (8, 32)
            acc1 = acc1 + jnp.dot(patch, wk,
                                  preferred_element_type=jnp.float32)
    # bias + relu; zero the border rows (they are conv2's SAME-padding zeros)
    a1 = jnp.maximum(acc1 + b1_ref[...], 0.0) * mask_ref[...]           # (N, 32)

    a1_buf[...] = jnp.zeros_like(a1_buf)       # zero margins once
    a1_buf[pl.ds(M, N), :] = a1

    # ---- conv2: same 9-shift trick on the VMEM-resident conv1 output --------
    acc2 = jnp.zeros((N, C2), jnp.float32)
    for kh in range(3):
        for kw in range(3):
            s = ((kh - 1) * WP + (kw - 1)) * B
            patch = a1_buf[pl.ds(M + s, N), :]                          # (N, 32)
            wk = w2_ref[pl.ds((kh * 3 + kw) * C1, C1), :]               # (32, 64)
            acc2 = acc2 + jnp.dot(patch, wk,
                                  preferred_element_type=jnp.float32)
    a2_buf[...] = jnp.maximum(acc2 + b2_ref[...], 0.0)                  # (N, 64)

    # ---- fc1: NCHW flatten folded into wf1 packing; contract position-wise --
    h = jnp.zeros((B, HID), jnp.float32)
    for hw in range(ROWS * COLS):
        r, c = hw // COLS + 1, hw % COLS + 1
        p = r * WP + c                                  # interior padded index
        lhs = a2_buf[pl.ds(p * B, B), :]                                # (B, 64)
        wk = wf1_ref[pl.ds(hw * C2, C2), :]                             # (64, 128)
        h = h + jnp.dot(lhs, wk, preferred_element_type=jnp.float32)
    h = jnp.maximum(h + bf1_ref[...], 0.0)                              # (B, 128)

    # ---- fc2 (lane-dense, padded 7 -> 128) -----------------------------------
    o_ref[...] = (jnp.dot(h, wf2_ref[...], preferred_element_type=jnp.float32)
                  + bf2_ref[...])


# ----------------------------------------------------------------------------
# One-time static weight repacking (outside the per-call path)
# ----------------------------------------------------------------------------
def prepare_params(params):
    w1, b1, w2, b2, wf1, bf1, wf2, bf2 = params
    # conv1: OIHW -> rows (kh, kw, ic_padded), cols oc; zero-pad ic 3 -> 8
    w1t = jnp.transpose(w1, (2, 3, 1, 0)).astype(jnp.float32)           # (3,3,3,32)
    w1p = jnp.zeros((3, 3, IN_CH_PAD, C1), jnp.float32).at[:, :, :IN_CH, :].set(w1t)
    w1p = w1p.reshape(9 * IN_CH_PAD, C1)
    # conv2: OIHW -> rows (kh, kw, ic), cols oc
    w2p = jnp.transpose(w2, (2, 3, 1, 0)).reshape(9 * C1, C2).astype(jnp.float32)
    # fc1: PyTorch flatten index is ch*42 + h*7 + w; repack to rows (hw, ch)
    wf1p = jnp.transpose(wf1.reshape(HID, C2, ROWS * COLS), (2, 1, 0))
    wf1p = wf1p.reshape(ROWS * COLS * C2, HID).astype(jnp.float32)
    # fc2: pre-transposed and lane-padded 7 -> 128 (kept lane-dense)
    wf2p = jnp.zeros((HID, OUT_PAD), jnp.float32).at[:, :COLS].set(wf2.T)
    bf2p = jnp.zeros((1, OUT_PAD), jnp.float32).at[0, :COLS].set(bf2)
    return (w1p, b1.reshape(1, C1).astype(jnp.float32),
            w2p, b2.reshape(1, C2).astype(jnp.float32),
            wf1p, bf1.reshape(1, HID).astype(jnp.float32),
            wf2p, bf2p)


# ----------------------------------------------------------------------------
# Forward pass wrapper (single pallas_call)
# ----------------------------------------------------------------------------
def convdqn_forward(x_nchw, prepped):
    w1p, b1p, w2p, b2p, wf1p, bf1p, wf2p, bf2p = prepped
    B = x_nchw.shape[0]
    N = P * B
    margin = (((WP + 1) * B + 7) // 8) * 8    # >= max row shift, 8-aligned

    # Batch-innermost flat padded-grid layout: row = (r*WP + c)*B + b.
    x = jnp.transpose(x_nchw, (2, 3, 0, 1)).astype(jnp.float32)         # (H,W,B,3)
    x = jnp.pad(x, ((1, 1), (1, 1), (0, 0), (0, IN_CH_PAD - IN_CH)))    # (8,9,B,8)
    x_flat = x.reshape(N, IN_CH_PAD)
    x_buf = jnp.pad(x_flat, ((margin, margin), (0, 0)))                 # (N+2M, 8)

    # Interior (non-border) mask over padded positions, batch-innermost rows.
    m = np.zeros((HP, WP), np.float32)
    m[1:1 + ROWS, 1:1 + COLS] = 1.0
    mask = jnp.asarray(np.repeat(m.reshape(-1), B).reshape(N, 1))

    kern = functools.partial(_fused_kernel, batch=B, margin=margin)

    def full(shape):
        return pl.BlockSpec(shape, lambda i, _s=shape: (0,) * len(_s))

    out = pl.pallas_call(
        kern,
        out_shape=jax.ShapeDtypeStruct((B, OUT_PAD), jnp.float32),
        grid=(1,),
        in_specs=[
            full(x_buf.shape), full(mask.shape),
            full(w1p.shape), full(b1p.shape),
            full(w2p.shape), full(b2p.shape),
            full(wf1p.shape), full(bf1p.shape),
            full(wf2p.shape), full(bf2p.shape),
        ],
        out_specs=full((B, OUT_PAD)),
        scratch_shapes=[
            pltpu.VMEM((N + 2 * margin, C1), jnp.float32),   # margined conv1 act
            pltpu.VMEM((N, C2), jnp.float32),                # conv2 act
        ],
        compiler_params=pltpu.CompilerParams(
            dimension_semantics=("arbitrary",)),
    )(x_buf, mask, w1p, b1p, w2p, b2p, wf1p, bf1p, wf2p, bf2p)

    return out[:, :COLS]


# ----------------------------------------------------------------------------
# Pure-JAX reference (correctness check only)
# ----------------------------------------------------------------------------
def convdqn_reference(x, params):
    w1, b1, w2, b2, wf1, bf1, wf2, bf2 = params
    dn = ("NCHW", "OIHW", "NCHW")
    y = jax.lax.conv_general_dilated(x, w1, (1, 1), "SAME", dimension_numbers=dn)
    y = jax.nn.relu(y + b1[None, :, None, None])
    y = jax.lax.conv_general_dilated(y, w2, (1, 1), "SAME", dimension_numbers=dn)
    y = jax.nn.relu(y + b2[None, :, None, None])
    y = y.reshape(y.shape[0], -1)
    y = jax.nn.relu(y @ wf1.T + bf1)
    return y @ wf2.T + bf2


# ----------------------------------------------------------------------------
def init_params(key):
    ks = jax.random.split(key, 8)
    feat = C2 * ROWS * COLS
    w1 = jax.random.normal(ks[0], (C1, IN_CH, 3, 3), jnp.float32) * 0.1
    b1 = jax.random.normal(ks[1], (C1,), jnp.float32) * 0.05
    w2 = jax.random.normal(ks[2], (C2, C1, 3, 3), jnp.float32) * 0.05
    b2 = jax.random.normal(ks[3], (C2,), jnp.float32) * 0.05
    wf1 = jax.random.normal(ks[4], (HID, feat), jnp.float32) * 0.02
    bf1 = jax.random.normal(ks[5], (HID,), jnp.float32) * 0.05
    wf2 = jax.random.normal(ks[6], (COLS, HID), jnp.float32) * 0.05
    bf2 = jax.random.normal(ks[7], (COLS,), jnp.float32) * 0.05
    return (w1, b1, w2, b2, wf1, bf1, wf2, bf2)


if __name__ == "__main__":
    key = jax.random.PRNGKey(0)
    k_in, k_p = jax.random.split(key)
    batch = 2
    x = jax.random.normal(k_in, (batch, IN_CH, ROWS, COLS), jnp.float32)
    params = init_params(k_p)

    prepped = prepare_params(params)          # static one-time repack
    fwd = jax.jit(convdqn_forward)
    out = jax.block_until_ready(fwd(x, prepped))

    ref = jax.block_until_ready(convdqn_reference(x, params))
    assert out.shape == (batch, COLS)
    np.testing.assert_allclose(np.asarray(out), np.asarray(ref),
                               rtol=1e-4, atol=1e-4)
    print("KERNEL_OK")
</pallas_src>

<mosaic_0001>
module attributes {stable_mosaic.version = 11 : i64} {
  func.func @_fused_kernel(%arg0: i32, %arg1: memref<192x8xf32, #tpu.memory_space<vmem>>, %arg2: memref<144x1xf32, #tpu.memory_space<vmem>>, %arg3: memref<72x32xf32, #tpu.memory_space<vmem>>, %arg4: memref<1x32xf32, #tpu.memory_space<vmem>>, %arg5: memref<288x64xf32, #tpu.memory_space<vmem>>, %arg6: memref<1x64xf32, #tpu.memory_space<vmem>>, %arg7: memref<2688x128xf32, #tpu.memory_space<vmem>>, %arg8: memref<1x128xf32, #tpu.memory_space<vmem>>, %arg9: memref<128x128xf32, #tpu.memory_space<vmem>>, %arg10: memref<1x128xf32, #tpu.memory_space<vmem>>, %arg11: memref<2x128xf32, #tpu.memory_space<vmem>>, %arg12: memref<192x32xf32, #tpu.memory_space<vmem>>, %arg13: memref<144x64xf32, #tpu.memory_space<vmem>>) attributes {dimension_semantics = [#tpu.dimension_semantics<arbitrary>], iteration_bounds = array<i64: 1>, scalar_prefetch = 0 : i64, scratch_operands = 2 : i64, tpu.core_type = #tpu.core_type<tc>, window_params = [{pipeline_mode = #tpu.pipeline_mode<synchronous>, transform_indices = @transform_0, window_bounds = array<i64: 192, 8>}, {pipeline_mode = #tpu.pipeline_mode<synchronous>, transform_indices = @transform_1, window_bounds = array<i64: 144, 1>}, {pipeline_mode = #tpu.pipeline_mode<synchronous>, transform_indices = @transform_2, window_bounds = array<i64: 72, 32>}, {pipeline_mode = #tpu.pipeline_mode<synchronous>, transform_indices = @transform_3, window_bounds = array<i64: 1, 32>}, {pipeline_mode = #tpu.pipeline_mode<synchronous>, transform_indices = @transform_4, window_bounds = array<i64: 288, 64>}, {pipeline_mode = #tpu.pipeline_mode<synchronous>, transform_indices = @transform_5, window_bounds = array<i64: 1, 64>}, {pipeline_mode = #tpu.pipeline_mode<synchronous>, transform_indices = @transform_6, window_bounds = array<i64: 2688, 128>}, {pipeline_mode = #tpu.pipeline_mode<synchronous>, transform_indices = @transform_7, window_bounds = array<i64: 1, 128>}, {pipeline_mode = #tpu.pipeline_mode<synchronous>, transform_indices = @transform_8, window_bounds = array<i64: 128, 128>}, {pipeline_mode = #tpu.pipeline_mode<synchronous>, transform_indices = @transform_9, window_bounds = array<i64: 1, 128>}, {pipeline_mode = #tpu.pipeline_mode<synchronous>, transform_indices = @transform_10, window_bounds = array<i64: 2, 128>}]} {
    %cst = arith.constant 0.000000e+00 : f32
    %0 = vector.broadcast %cst : f32 to vector<144x32xf32>
    %c4 = arith.constant 4 : index
    %c0 = arith.constant 0 : index
    %1 = vector.load %arg1[%c4, %c0] : memref<192x8xf32, #tpu.memory_space<vmem>>, vector<144x8xf32>
    %c0_0 = arith.constant 0 : index
    %c0_1 = arith.constant 0 : index
    %2 = vector.load %arg3[%c0_0, %c0_1] : memref<72x32xf32, #tpu.memory_space<vmem>>, vector<8x32xf32>
    %cst_2 = arith.constant dense<0.000000e+00> : vector<144x32xf32>
    %3 = tpu.matmul %1, %2, %cst_2 {dimension_numbers = #tpu.dot_dimension_numbers<[1], [0], [0], [1], [0, 0, 1, 1], [], []>} : vector<144x8xf32>, vector<8x32xf32>, vector<144x32xf32> -> vector<144x32xf32>
    %4 = arith.addf %0, %3 : vector<144x32xf32>
    %c6 = arith.constant 6 : index
    %c0_3 = arith.constant 0 : index
    %5 = vector.load %arg1[%c6, %c0_3] : memref<192x8xf32, #tpu.memory_space<vmem>>, vector<144x8xf32>
    %c8 = arith.constant 8 : index
    %c0_4 = arith.constant 0 : index
    %6 = vector.load %arg3[%c8, %c0_4] : memref<72x32xf32, #tpu.memory_space<vmem>>, vector<8x32xf32>
    %cst_5 = arith.constant dense<0.000000e+00> : vector<144x32xf32>
    %7 = tpu.matmul %5, %6, %cst_5 {dimension_numbers = #tpu.dot_dimension_numbers<[1], [0], [0], [1], [0, 0, 1, 1], [], []>} : vector<144x8xf32>, vector<8x32xf32>, vector<144x32xf32> -> vector<144x32xf32>
    %8 = arith.addf %4, %7 : vector<144x32xf32>
    %c8_6 = arith.constant 8 : index
    %c0_7 = arith.constant 0 : index
    %9 = vector.load %arg1[%c8_6, %c0_7] : memref<192x8xf32, #tpu.memory_space<vmem>>, vector<144x8xf32>
    %c16 = arith.constant 16 : index
    %c0_8 = arith.constant 0 : index
    %10 = vector.load %arg3[%c16, %c0_8] : memref<72x32xf32, #tpu.memory_space<vmem>>, vector<8x32xf32>
    %cst_9 = arith.constant dense<0.000000e+00> : vector<144x32xf32>
    %11 = tpu.matmul %9, %10, %cst_9 {dimension_numbers = #tpu.dot_dimension_numbers<[1], [0], [0], [1], [0, 0, 1, 1], [], []>} : vector<144x8xf32>, vector<8x32xf32>, vector<144x32xf32> -> vector<144x32xf32>
    %12 = arith.addf %8, %11 : vector<144x32xf32>
    %c22 = arith.constant 22 : index
    %c0_10 = arith.constant 0 : index
    %13 = vector.load %arg1[%c22, %c0_10] : memref<192x8xf32, #tpu.memory_space<vmem>>, vector<144x8xf32>
    %c24 = arith.constant 24 : index
    %c0_11 = arith.constant 0 : index
    %14 = vector.load %arg3[%c24, %c0_11] : memref<72x32xf32, #tpu.memory_space<vmem>>, vector<8x32xf32>
    %cst_12 = arith.constant dense<0.000000e+00> : vector<144x32xf32>
    %15 = tpu.matmul %13, %14, %cst_12 {dimension_numbers = #tpu.dot_dimension_numbers<[1], [0], [0], [1], [0, 0, 1, 1], [], []>} : vector<144x8xf32>, vector<8x32xf32>, vector<144x32xf32> -> vector<144x32xf32>
    %16 = arith.addf %12, %15 : vector<144x32xf32>
    %c24_13 = arith.constant 24 : index
    %c0_14 = arith.constant 0 : index
    %17 = vector.load %arg1[%c24_13, %c0_14] : memref<192x8xf32, #tpu.memory_space<vmem>>, vector<144x8xf32>
    %c32 = arith.constant 32 : index
    %c0_15 = arith.constant 0 : index
    %18 = vector.load %arg3[%c32, %c0_15] : memref<72x32xf32, #tpu.memory_space<vmem>>, vector<8x32xf32>
    %cst_16 = arith.constant dense<0.000000e+00> : vector<144x32xf32>
    %19 = tpu.matmul %17, %18, %cst_16 {dimension_numbers = #tpu.dot_dimension_numbers<[1], [0], [0], [1], [0, 0, 1, 1], [], []>} : vector<144x8xf32>, vector<8x32xf32>, vector<144x32xf32> -> vector<144x32xf32>
    %20 = arith.addf %16, %19 : vector<144x32xf32>
    %c26 = arith.constant 26 : index
    %c0_17 = arith.constant 0 : index
    %21 = vector.load %arg1[%c26, %c0_17] : memref<192x8xf32, #tpu.memory_space<vmem>>, vector<144x8xf32>
    %c40 = arith.constant 40 : index
    %c0_18 = arith.constant 0 : index
    %22 = vector.load %arg3[%c40, %c0_18] : memref<72x32xf32, #tpu.memory_space<vmem>>, vector<8x32xf32>
    %cst_19 = arith.constant dense<0.000000e+00> : vector<144x32xf32>
    %23 = tpu.matmul %21, %22, %cst_19 {dimension_numbers = #tpu.dot_dimension_numbers<[1], [0], [0], [1], [0, 0, 1, 1], [], []>} : vector<144x8xf32>, vector<8x32xf32>, vector<144x32xf32> -> vector<144x32xf32>
    %24 = arith.addf %20, %23 : vector<144x32xf32>
    %c40_20 = arith.constant 40 : index
    %c0_21 = arith.constant 0 : index
    %25 = vector.load %arg1[%c40_20, %c0_21] : memref<192x8xf32, #tpu.memory_space<vmem>>, vector<144x8xf32>
    %c48 = arith.constant 48 : index
    %c0_22 = arith.constant 0 : index
    %26 = vector.load %arg3[%c48, %c0_22] : memref<72x32xf32, #tpu.memory_space<vmem>>, vector<8x32xf32>
    %cst_23 = arith.constant dense<0.000000e+00> : vector<144x32xf32>
    %27 = tpu.matmul %25, %26, %cst_23 {dimension_numbers = #tpu.dot_dimension_numbers<[1], [0], [0], [1], [0, 0, 1, 1], [], []>} : vector<144x8xf32>, vector<8x32xf32>, vector<144x32xf32> -> vector<144x32xf32>
    %28 = arith.addf %24, %27 : vector<144x32xf32>
    %c42 = arith.constant 42 : index
    %c0_24 = arith.constant 0 : index
    %29 = vector.load %arg1[%c42, %c0_24] : memref<192x8xf32, #tpu.memory_space<vmem>>, vector<144x8xf32>
    %c56 = arith.constant 56 : index
    %c0_25 = arith.constant 0 : index
    %30 = vector.load %arg3[%c56, %c0_25] : memref<72x32xf32, #tpu.memory_space<vmem>>, vector<8x32xf32>
    %cst_26 = arith.constant dense<0.000000e+00> : vector<144x32xf32>
    %31 = tpu.matmul %29, %30, %cst_26 {dimension_numbers = #tpu.dot_dimension_numbers<[1], [0], [0], [1], [0, 0, 1, 1], [], []>} : vector<144x8xf32>, vector<8x32xf32>, vector<144x32xf32> -> vector<144x32xf32>
    %32 = arith.addf %28, %31 : vector<144x32xf32>
    %c44 = arith.constant 44 : index
    %c0_27 = arith.constant 0 : index
    %33 = vector.load %arg1[%c44, %c0_27] : memref<192x8xf32, #tpu.memory_space<vmem>>, vector<144x8xf32>
    %c64 = arith.constant 64 : index
    %c0_28 = arith.constant 0 : index
    %34 = vector.load %arg3[%c64, %c0_28] : memref<72x32xf32, #tpu.memory_space<vmem>>, vector<8x32xf32>
    %cst_29 = arith.constant dense<0.000000e+00> : vector<144x32xf32>
    %35 = tpu.matmul %33, %34, %cst_29 {dimension_numbers = #tpu.dot_dimension_numbers<[1], [0], [0], [1], [0, 0, 1, 1], [], []>} : vector<144x8xf32>, vector<8x32xf32>, vector<144x32xf32> -> vector<144x32xf32>
    %36 = arith.addf %32, %35 : vector<144x32xf32>
    %c0_30 = arith.constant 0 : index
    %c0_31 = arith.constant 0 : index
    %37 = vector.load %arg4[%c0_30, %c0_31] : memref<1x32xf32, #tpu.memory_space<vmem>>, vector<1x32xf32>
    %38 = vector.broadcast %37 : vector<1x32xf32> to vector<144x32xf32>
    %39 = arith.addf %36, %38 : vector<144x32xf32>
    %cst_32 = arith.constant 0.000000e+00 : f32
    %40 = vector.broadcast %cst_32 : f32 to vector<144x32xf32>
    %41 = arith.maximumf %39, %40 : vector<144x32xf32>
    %c0_33 = arith.constant 0 : index
    %c0_34 = arith.constant 0 : index
    %42 = vector.load %arg2[%c0_33, %c0_34] : memref<144x1xf32, #tpu.memory_space<vmem>>, vector<144x1xf32>
    %43 = vector.broadcast %42 : vector<144x1xf32> to vector<144x32xf32>
    %44 = arith.mulf %41, %43 : vector<144x32xf32>
    %cst_35 = arith.constant 0.000000e+00 : f32
    %45 = vector.broadcast %cst_35 : f32 to vector<192x32xf32>
    %c0_36 = arith.constant 0 : index
    %c0_37 = arith.constant 0 : index
    %46 = vector.load %arg12[%c0_36, %c0_37] : memref<192x32xf32, #tpu.memory_space<vmem>>, vector<192x32xf32>
    tpu.vector_store %arg12[%c0_36, %c0_37], %45 {strides = array<i32>} : memref<192x32xf32, #tpu.memory_space<vmem>>, vector<192x32xf32>,
    %c24_38 = arith.constant 24 : index
    %c0_39 = arith.constant 0 : index
    %47 = vector.load %arg12[%c24_38, %c0_39] : memref<192x32xf32, #tpu.memory_space<vmem>>, vector<144x32xf32>
    tpu.vector_store %arg12[%c24_38, %c0_39], %44 {strides = array<i32>} : memref<192x32xf32, #tpu.memory_space<vmem>>, vector<144x32xf32>,
    %cst_40 = arith.constant 0.000000e+00 : f32
    %48 = vector.broadcast %cst_40 : f32 to vector<144x64xf32>
    %c4_41 = arith.constant 4 : index
    %c0_42 = arith.constant 0 : index
    %49 = vector.load %arg12[%c4_41, %c0_42] : memref<192x32xf32, #tpu.memory_space<vmem>>, vector<144x32xf32>
    %c0_43 = arith.constant 0 : index
    %c0_44 = arith.constant 0 : index
    %50 = vector.load %arg5[%c0_43, %c0_44] : memref<288x64xf32, #tpu.memory_space<vmem>>, vector<32x64xf32>
    %cst_45 = arith.constant dense<0.000000e+00> : vector<144x64xf32>
    %51 = tpu.matmul %49, %50, %cst_45 {dimension_numbers = #tpu.dot_dimension_numbers<[1], [0], [0], [1], [0, 0, 1, 1], [], []>} : vector<144x32xf32>, vector<32x64xf32>, vector<144x64xf32> -> vector<144x64xf32>
    %52 = arith.addf %48, %51 : vector<144x64xf32>
    %c6_46 = arith.constant 6 : index
    %c0_47 = arith.constant 0 : index
    %53 = vector.load %arg12[%c6_46, %c0_47] : memref<192x32xf32, #tpu.memory_space<vmem>>, vector<144x32xf32>
    %c32_48 = arith.constant 32 : index
    %c0_49 = arith.constant 0 : index
    %54 = vector.load %arg5[%c32_48, %c0_49] : memref<288x64xf32, #tpu.memory_space<vmem>>, vector<32x64xf32>
    %cst_50 = arith.constant dense<0.000000e+00> : vector<144x64xf32>
    %55 = tpu.matmul %53, %54, %cst_50 {dimension_numbers = #tpu.dot_dimension_numbers<[1], [0], [0], [1], [0, 0, 1, 1], [], []>} : vector<144x32xf32>, vector<32x64xf32>, vector<144x64xf32> -> vector<144x64xf32>
    %56 = arith.addf %52, %55 : vector<144x64xf32>
    %c8_51 = arith.constant 8 : index
    %c0_52 = arith.constant 0 : index
    %57 = vector.load %arg12[%c8_51, %c0_52] : memref<192x32xf32, #tpu.memory_space<vmem>>, vector<144x32xf32>
    %c64_53 = arith.constant 64 : index
    %c0_54 = arith.constant 0 : index
    %58 = vector.load %arg5[%c64_53, %c0_54] : memref<288x64xf32, #tpu.memory_space<vmem>>, vector<32x64xf32>
    %cst_55 = arith.constant dense<0.000000e+00> : vector<144x64xf32>
    %59 = tpu.matmul %57, %58, %cst_55 {dimension_numbers = #tpu.dot_dimension_numbers<[1], [0], [0], [1], [0, 0, 1, 1], [], []>} : vector<144x32xf32>, vector<32x64xf32>, vector<144x64xf32> -> vector<144x64xf32>
    %60 = arith.addf %56, %59 : vector<144x64xf32>
    %c22_56 = arith.constant 22 : index
    %c0_57 = arith.constant 0 : index
    %61 = vector.load %arg12[%c22_56, %c0_57] : memref<192x32xf32, #tpu.memory_space<vmem>>, vector<144x32xf32>
    %c96 = arith.constant 96 : index
    %c0_58 = arith.constant 0 : index
    %62 = vector.load %arg5[%c96, %c0_58] : memref<288x64xf32, #tpu.memory_space<vmem>>, vector<32x64xf32>
    %cst_59 = arith.constant dense<0.000000e+00> : vector<144x64xf32>
    %63 = tpu.matmul %61, %62, %cst_59 {dimension_numbers = #tpu.dot_dimension_numbers<[1], [0], [0], [1], [0, 0, 1, 1], [], []>} : vector<144x32xf32>, vector<32x64xf32>, vector<144x64xf32> -> vector<144x64xf32>
    %64 = arith.addf %60, %63 : vector<144x64xf32>
    %c24_60 = arith.constant 24 : index
    %c0_61 = arith.constant 0 : index
    %65 = vector.load %arg12[%c24_60, %c0_61] : memref<192x32xf32, #tpu.memory_space<vmem>>, vector<144x32xf32>
    %c128 = arith.constant 128 : index
    %c0_62 = arith.constant 0 : index
    %66 = vector.load %arg5[%c128, %c0_62] : memref<288x64xf32, #tpu.memory_space<vmem>>, vector<32x64xf32>
    %cst_63 = arith.constant dense<0.000000e+00> : vector<144x64xf32>
    %67 = tpu.matmul %65, %66, %cst_63 {dimension_numbers = #tpu.dot_dimension_numbers<[1], [0], [0], [1], [0, 0, 1, 1], [], []>} : vector<144x32xf32>, vector<32x64xf32>, vector<144x64xf32> -> vector<144x64xf32>
    %68 = arith.addf %64, %67 : vector<144x64xf32>
    %c26_64 = arith.constant 26 : index
    %c0_65 = arith.constant 0 : index
    %69 = vector.load %arg12[%c26_64, %c0_65] : memref<192x32xf32, #tpu.memory_space<vmem>>, vector<144x32xf32>
    %c160 = arith.constant 160 : index
    %c0_66 = arith.constant 0 : index
    %70 = vector.load %arg5[%c160, %c0_66] : memref<288x64xf32, #tpu.memory_space<vmem>>, vector<32x64xf32>
    %cst_67 = arith.constant dense<0.000000e+00> : vector<144x64xf32>
    %71 = tpu.matmul %69, %70, %cst_67 {dimension_numbers = #tpu.dot_dimension_numbers<[1], [0], [0], [1], [0, 0, 1, 1], [], []>} : vector<144x32xf32>, vector<32x64xf32>, vector<144x64xf32> -> vector<144x64xf32>
    %72 = arith.addf %68, %71 : vector<144x64xf32>
    %c40_68 = arith.constant 40 : index
    %c0_69 = arith.constant 0 : index
    %73 = vector.load %arg12[%c40_68, %c0_69] : memref<192x32xf32, #tpu.memory_space<vmem>>, vector<144x32xf32>
    %c192 = arith.constant 192 : index
    %c0_70 = arith.constant 0 : index
    %74 = vector.load %arg5[%c192, %c0_70] : memref<288x64xf32, #tpu.memory_space<vmem>>, vector<32x64xf32>
    %cst_71 = arith.constant dense<0.000000e+00> : vector<144x64xf32>
    %75 = tpu.matmul %73, %74, %cst_71 {dimension_numbers = #tpu.dot_dimension_numbers<[1], [0], [0], [1], [0, 0, 1, 1], [], []>} : vector<144x32xf32>, vector<32x64xf32>, vector<144x64xf32> -> vector<144x64xf32>
    %76 = arith.addf %72, %75 : vector<144x64xf32>
    %c42_72 = arith.constant 42 : index
    %c0_73 = arith.constant 0 : index
    %77 = vector.load %arg12[%c42_72, %c0_73] : memref<192x32xf32, #tpu.memory_space<vmem>>, vector<144x32xf32>
    %c224 = arith.constant 224 : index
    %c0_74 = arith.constant 0 : index
    %78 = vector.load %arg5[%c224, %c0_74] : memref<288x64xf32, #tpu.memory_space<vmem>>, vector<32x64xf32>
    %cst_75 = arith.constant dense<0.000000e+00> : vector<144x64xf32>
    %79 = tpu.matmul %77, %78, %cst_75 {dimension_numbers = #tpu.dot_dimension_numbers<[1], [0], [0], [1], [0, 0, 1, 1], [], []>} : vector<144x32xf32>, vector<32x64xf32>, vector<144x64xf32> -> vector<144x64xf32>
    %80 = arith.addf %76, %79 : vector<144x64xf32>
    %c44_76 = arith.constant 44 : index
    %c0_77 = arith.constant 0 : index
    %81 = vector.load %arg12[%c44_76, %c0_77] : memref<192x32xf32, #tpu.memory_space<vmem>>, vector<144x32xf32>
    %c256 = arith.constant 256 : index
    %c0_78 = arith.constant 0 : index
    %82 = vector.load %arg5[%c256, %c0_78] : memref<288x64xf32, #tpu.memory_space<vmem>>, vector<32x64xf32>
    %cst_79 = arith.constant dense<0.000000e+00> : vector<144x64xf32>
    %83 = tpu.matmul %81, %82, %cst_79 {dimension_numbers = #tpu.dot_dimension_numbers<[1], [0], [0], [1], [0, 0, 1, 1], [], []>} : vector<144x32xf32>, vector<32x64xf32>, vector<144x64xf32> -> vector<144x64xf32>
    %84 = arith.addf %80, %83 : vector<144x64xf32>
    %c0_80 = arith.constant 0 : index
    %c0_81 = arith.constant 0 : index
    %85 = vector.load %arg6[%c0_80, %c0_81] : memref<1x64xf32, #tpu.memory_space<vmem>>, vector<1x64xf32>
    %86 = vector.broadcast %85 : vector<1x64xf32> to vector<144x64xf32>
    %87 = arith.addf %84, %86 : vector<144x64xf32>
    %cst_82 = arith.constant 0.000000e+00 : f32
    %88 = vector.broadcast %cst_82 : f32 to vector<144x64xf32>
    %89 = arith.maximumf %87, %88 : vector<144x64xf32>
    %c0_83 = arith.constant 0 : index
    %c0_84 = arith.constant 0 : index
    %90 = vector.load %arg13[%c0_83, %c0_84] : memref<144x64xf32, #tpu.memory_space<vmem>>, vector<144x64xf32>
    tpu.vector_store %arg13[%c0_83, %c0_84], %89 {strides = array<i32>} : memref<144x64xf32, #tpu.memory_space<vmem>>, vector<144x64xf32>,
    %cst_85 = arith.constant 0.000000e+00 : f32
    %91 = vector.broadcast %cst_85 : f32 to vector<2x128xf32>
    %c20 = arith.constant 20 : index
    %c0_86 = arith.constant 0 : index
    %92 = vector.load %arg13[%c20, %c0_86] : memref<144x64xf32, #tpu.memory_space<vmem>>, vector<2x64xf32>
    %c0_87 = arith.constant 0 : index
    %c0_88 = arith.constant 0 : index
    %93 = vector.load %arg7[%c0_87, %c0_88] : memref<2688x128xf32, #tpu.memory_space<vmem>>, vector<64x128xf32>
    %cst_89 = arith.constant dense<0.000000e+00> : vector<2x128xf32>
    %94 = tpu.matmul %92, %93, %cst_89 {dimension_numbers = #tpu.dot_dimension_numbers<[1], [0], [0], [1], [0, 0, 1, 1], [], []>} : vector<2x64xf32>, vector<64x128xf32>, vector<2x128xf32> -> vector<2x128xf32>
    %95 = arith.addf %91, %94 : vector<2x128xf32>
    %c22_90 = arith.constant 22 : index
    %c0_91 = arith.constant 0 : index
    %96 = vector.load %arg13[%c22_90, %c0_91] : memref<144x64xf32, #tpu.memory_space<vmem>>, vector<2x64xf32>
    %c64_92 = arith.constant 64 : index
    %c0_93 = arith.constant 0 : index
    %97 = vector.load %arg7[%c64_92, %c0_93] : memref<2688x128xf32, #tpu.memory_space<vmem>>, vector<64x128xf32>
    %cst_94 = arith.constant dense<0.000000e+00> : vector<2x128xf32>
    %98 = tpu.matmul %96, %97, %cst_94 {dimension_numbers = #tpu.dot_dimension_numbers<[1], [0], [0], [1], [0, 0, 1, 1], [], []>} : vector<2x64xf32>, vector<64x128xf32>, vector<2x128xf32> -> vector<2x128xf32>
    %99 = arith.addf %95, %98 : vector<2x128xf32>
    %c24_95 = arith.constant 24 : index
    %c0_96 = arith.constant 0 : index
    %100 = vector.load %arg13[%c24_95, %c0_96] : memref<144x64xf32, #tpu.memory_space<vmem>>, vector<2x64xf32>
    %c128_97 = arith.constant 128 : index
    %c0_98 = arith.constant 0 : index
    %101 = vector.load %arg7[%c128_97, %c0_98] : memref<2688x128xf32, #tpu.memory_space<vmem>>, vector<64x128xf32>
    %cst_99 = arith.constant dense<0.000000e+00> : vector<2x128xf32>
    %102 = tpu.matmul %100, %101, %cst_99 {dimension_numbers = #tpu.dot_dimension_numbers<[1], [0], [0], [1], [0, 0, 1, 1], [], []>} : vector<2x64xf32>, vector<64x128xf32>, vector<2x128xf32> -> vector<2x128xf32>
    %103 = arith.addf %99, %102 : vector<2x128xf32>
    %c26_100 = arith.constant 26 : index
    %c0_101 = arith.constant 0 : index
    %104 = vector.load %arg13[%c26_100, %c0_101] : memref<144x64xf32, #tpu.memory_space<vmem>>, vector<2x64xf32>
    %c192_102 = arith.constant 192 : index
    %c0_103 = arith.constant 0 : index
    %105 = vector.load %arg7[%c192_102, %c0_103] : memref<2688x128xf32, #tpu.memory_space<vmem>>, vector<64x128xf32>
    %cst_104 = arith.constant dense<0.000000e+00> : vector<2x128xf32>
    %106 = tpu.matmul %104, %105, %cst_104 {dimension_numbers = #tpu.dot_dimension_numbers<[1], [0], [0], [1], [0, 0, 1, 1], [], []>} : vector<2x64xf32>, vector<64x128xf32>, vector<2x128xf32> -> vector<2x128xf32>
    %107 = arith.addf %103, %106 : vector<2x128xf32>
    %c28 = arith.constant 28 : index
    %c0_105 = arith.constant 0 : index
    %108 = vector.load %arg13[%c28, %c0_105] : memref<144x64xf32, #tpu.memory_space<vmem>>, vector<2x64xf32>
    %c256_106 = arith.constant 256 : index
    %c0_107 = arith.constant 0 : index
    %109 = vector.load %arg7[%c256_106, %c0_107] : memref<2688x128xf32, #tpu.memory_space<vmem>>, vector<64x128xf32>
    %cst_108 = arith.constant dense<0.000000e+00> : vector<2x128xf32>
    %110 = tpu.matmul %108, %109, %cst_108 {dimension_numbers = #tpu.dot_dimension_numbers<[1], [0], [0], [1], [0, 0, 1, 1], [], []>} : vector<2x64xf32>, vector<64x128xf32>, vector<2x128xf32> -> vector<2x128xf32>
    %111 = arith.addf %107, %110 : vector<2x128xf32>
    %c30 = arith.constant 30 : index
    %c0_109 = arith.constant 0 : index
    %112 = vector.load %arg13[%c30, %c0_109] : memref<144x64xf32, #tpu.memory_space<vmem>>, vector<2x64xf32>
    %c320 = arith.constant 320 : index
    %c0_110 = arith.constant 0 : index
    %113 = vector.load %arg7[%c320, %c0_110] : memref<2688x128xf32, #tpu.memory_space<vmem>>, vector<64x128xf32>
    %cst_111 = arith.constant dense<0.000000e+00> : vector<2x128xf32>
    %114 = tpu.matmul %112, %113, %cst_111 {dimension_numbers = #tpu.dot_dimension_numbers<[1], [0], [0], [1], [0, 0, 1, 1], [], []>} : vector<2x64xf32>, vector<64x128xf32>, vector<2x128xf32> -> vector<2x128xf32>
    %115 = arith.addf %111, %114 : vector<2x128xf32>
    %c32_112 = arith.constant 32 : index
    %c0_113 = arith.constant 0 : index
    %116 = vector.load %arg13[%c32_112, %c0_113] : memref<144x64xf32, #tpu.memory_space<vmem>>, vector<2x64xf32>
    %c384 = arith.constant 384 : index
    %c0_114 = arith.constant 0 : index
    %117 = vector.load %arg7[%c384, %c0_114] : memref<2688x128xf32, #tpu.memory_space<vmem>>, vector<64x128xf32>
    %cst_115 = arith.constant dense<0.000000e+00> : vector<2x128xf32>
    %118 = tpu.matmul %116, %117, %cst_115 {dimension_numbers = #tpu.dot_dimension_numbers<[1], [0], [0], [1], [0, 0, 1, 1], [], []>} : vector<2x64xf32>, vector<64x128xf32>, vector<2x128xf32> -> vector<2x128xf32>
    %119 = arith.addf %115, %118 : vector<2x128xf32>
    %c38 = arith.constant 38 : index
    %c0_116 = arith.constant 0 : index
    %120 = vector.load %arg13[%c38, %c0_116] : memref<144x64xf32, #tpu.memory_space<vmem>>, vector<2x64xf32>
    %c448 = arith.constant 448 : index
    %c0_117 = arith.constant 0 : index
    %121 = vector.load %arg7[%c448, %c0_117] : memref<2688x128xf32, #tpu.memory_space<vmem>>, vector<64x128xf32>
    %cst_118 = arith.constant dense<0.000000e+00> : vector<2x128xf32>
    %122 = tpu.matmul %120, %121, %cst_118 {dimension_numbers = #tpu.dot_dimension_numbers<[1], [0], [0], [1], [0, 0, 1, 1], [], []>} : vector<2x64xf32>, vector<64x128xf32>, vector<2x128xf32> -> vector<2x128xf32>
    %123 = arith.addf %119, %122 : vector<2x128xf32>
    %c40_119 = arith.constant 40 : index
    %c0_120 = arith.constant 0 : index
    %124 = vector.load %arg13[%c40_119, %c0_120] : memref<144x64xf32, #tpu.memory_space<vmem>>, vector<2x64xf32>
    %c512 = arith.constant 512 : index
    %c0_121 = arith.constant 0 : index
    %125 = vector.load %arg7[%c512, %c0_121] : memref<2688x128xf32, #tpu.memory_space<vmem>>, vector<64x128xf32>
    %cst_122 = arith.constant dense<0.000000e+00> : vector<2x128xf32>
    %126 = tpu.matmul %124, %125, %cst_122 {dimension_numbers = #tpu.dot_dimension_numbers<[1], [0], [0], [1], [0, 0, 1, 1], [], []>} : vector<2x64xf32>, vector<64x128xf32>, vector<2x128xf32> -> vector<2x128xf32>
    %127 = arith.addf %123, %126 : vector<2x128xf32>
    %c42_123 = arith.constant 42 : index
    %c0_124 = arith.constant 0 : index
    %128 = vector.load %arg13[%c42_123, %c0_124] : memref<144x64xf32, #tpu.memory_space<vmem>>, vector<2x64xf32>
    %c576 = arith.constant 576 : index
    %c0_125 = arith.constant 0 : index
    %129 = vector.load %arg7[%c576, %c0_125] : memref<2688x128xf32, #tpu.memory_space<vmem>>, vector<64x128xf32>
    %cst_126 = arith.constant dense<0.000000e+00> : vector<2x128xf32>
    %130 = tpu.matmul %128, %129, %cst_126 {dimension_numbers = #tpu.dot_dimension_numbers<[1], [0], [0], [1], [0, 0, 1, 1], [], []>} : vector<2x64xf32>, vector<64x128xf32>, vector<2x128xf32> -> vector<2x128xf32>
    %131 = arith.addf %127, %130 : vector<2x128xf32>
    %c44_127 = arith.constant 44 : index
    %c0_128 = arith.constant 0 : index
    %132 = vector.load %arg13[%c44_127, %c0_128] : memref<144x64xf32, #tpu.memory_space<vmem>>, vector<2x64xf32>
    %c640 = arith.constant 640 : index
    %c0_129 = arith.constant 0 : index
    %133 = vector.load %arg7[%c640, %c0_129] : memref<2688x128xf32, #tpu.memory_space<vmem>>, vector<64x128xf32>
    %cst_130 = arith.constant dense<0.000000e+00> : vector<2x128xf32>
    %134 = tpu.matmul %132, %133, %cst_130 {dimension_numbers = #tpu.dot_dimension_numbers<[1], [0], [0], [1], [0, 0, 1, 1], [], []>} : vector<2x64xf32>, vector<64x128xf32>, vector<2x128xf32> -> vector<2x128xf32>
    %135 = arith.addf %131, %134 : vector<2x128xf32>
    %c46 = arith.constant 46 : index
    %c0_131 = arith.constant 0 : index
    %136 = vector.load %arg13[%c46, %c0_131] : memref<144x64xf32, #tpu.memory_space<vmem>>, vector<2x64xf32>
    %c704 = arith.constant 704 : index
    %c0_132 = arith.constant 0 : index
    %137 = vector.load %arg7[%c704, %c0_132] : memref<2688x128xf32, #tpu.memory_space<vmem>>, vector<64x128xf32>
    %cst_133 = arith.constant dense<0.000000e+00> : vector<2x128xf32>
    %138 = tpu.matmul %136, %137, %cst_133 {dimension_numbers = #tpu.dot_dimension_numbers<[1], [0], [0], [1], [0, 0, 1, 1], [], []>} : vector<2x64xf32>, vector<64x128xf32>, vector<2x128xf32> -> vector<2x128xf32>
    %139 = arith.addf %135, %138 : vector<2x128xf32>
    %c48_134 = arith.constant 48 : index
    %c0_135 = arith.constant 0 : index
    %140 = vector.load %arg13[%c48_134, %c0_135] : memref<144x64xf32, #tpu.memory_space<vmem>>, vector<2x64xf32>
    %c768 = arith.constant 768 : index
    %c0_136 = arith.constant 0 : index
    %141 = vector.load %arg7[%c768, %c0_136] : memref<2688x128xf32, #tpu.memory_space<vmem>>, vector<64x128xf32>
    %cst_137 = arith.constant dense<0.000000e+00> : vector<2x128xf32>
    %142 = tpu.matmul %140, %141, %cst_137 {dimension_numbers = #tpu.dot_dimension_numbers<[1], [0], [0], [1], [0, 0, 1, 1], [], []>} : vector<2x64xf32>, vector<64x128xf32>, vector<2x128xf32> -> vector<2x128xf32>
    %143 = arith.addf %139, %142 : vector<2x128xf32>
    %c50 = arith.constant 50 : index
    %c0_138 = arith.constant 0 : index
    %144 = vector.load %arg13[%c50, %c0_138] : memref<144x64xf32, #tpu.memory_space<vmem>>, vector<2x64xf32>
    %c832 = arith.constant 832 : index
    %c0_139 = arith.constant 0 : index
    %145 = vector.load %arg7[%c832, %c0_139] : memref<2688x128xf32, #tpu.memory_space<vmem>>, vector<64x128xf32>
    %cst_140 = arith.constant dense<0.000000e+00> : vector<2x128xf32>
    %146 = tpu.matmul %144, %145, %cst_140 {dimension_numbers = #tpu.dot_dimension_numbers<[1], [0], [0], [1], [0, 0, 1, 1], [], []>} : vector<2x64xf32>, vector<64x128xf32>, vector<2x128xf32> -> vector<2x128xf32>
    %147 = arith.addf %143, %146 : vector<2x128xf32>
    %c56_141 = arith.constant 56 : index
    %c0_142 = arith.constant 0 : index
    %148 = vector.load %arg13[%c56_141, %c0_142] : memref<144x64xf32, #tpu.memory_space<vmem>>, vector<2x64xf32>
    %c896 = arith.constant 896 : index
    %c0_143 = arith.constant 0 : index
    %149 = vector.load %arg7[%c896, %c0_143] : memref<2688x128xf32, #tpu.memory_space<vmem>>, vector<64x128xf32>
    %cst_144 = arith.constant dense<0.000000e+00> : vector<2x128xf32>
    %150 = tpu.matmul %148, %149, %cst_144 {dimension_numbers = #tpu.dot_dimension_numbers<[1], [0], [0], [1], [0, 0, 1, 1], [], []>} : vector<2x64xf32>, vector<64x128xf32>, vector<2x128xf32> -> vector<2x128xf32>
    %151 = arith.addf %147, %150 : vector<2x128xf32>
    %c58 = arith.constant 58 : index
    %c0_145 = arith.constant 0 : index
    %152 = vector.load %arg13[%c58, %c0_145] : memref<144x64xf32, #tpu.memory_space<vmem>>, vector<2x64xf32>
    %c960 = arith.constant 960 : index
    %c0_146 = arith.constant 0 : index
    %153 = vector.load %arg7[%c960, %c0_146] : memref<2688x128xf32, #tpu.memory_space<vmem>>, vector<64x128xf32>
    %cst_147 = arith.constant dense<0.000000e+00> : vector<2x128xf32>
    %154 = tpu.matmul %152, %153, %cst_147 {dimension_numbers = #tpu.dot_dimension_numbers<[1], [0], [0], [1], [0, 0, 1, 1], [], []>} : vector<2x64xf32>, vector<64x128xf32>, vector<2x128xf32> -> vector<2x128xf32>
    %155 = arith.addf %151, %154 : vector<2x128xf32>
    %c60 = arith.constant 60 : index
    %c0_148 = arith.constant 0 : index
    %156 = vector.load %arg13[%c60, %c0_148] : memref<144x64xf32, #tpu.memory_space<vmem>>, vector<2x64xf32>
    %c1024 = arith.constant 1024 : index
    %c0_149 = arith.constant 0 : index
    %157 = vector.load %arg7[%c1024, %c0_149] : memref<2688x128xf32, #tpu.memory_space<vmem>>, vector<64x128xf32>
    %cst_150 = arith.constant dense<0.000000e+00> : vector<2x128xf32>
    %158 = tpu.matmul %156, %157, %cst_150 {dimension_numbers = #tpu.dot_dimension_numbers<[1], [0], [0], [1], [0, 0, 1, 1], [], []>} : vector<2x64xf32>, vector<64x128xf32>, vector<2x128xf32> -> vector<2x128xf32>
    %159 = arith.addf %155, %158 : vector<2x128xf32>
    %c62 = arith.constant 62 : index
    %c0_151 = arith.constant 0 : index
    %160 = vector.load %arg13[%c62, %c0_151] : memref<144x64xf32, #tpu.memory_space<vmem>>, vector<2x64xf32>
    %c1088 = arith.constant 1088 : index
    %c0_152 = arith.constant 0 : index
    %161 = vector.load %arg7[%c1088, %c0_152] : memref<2688x128xf32, #tpu.memory_space<vmem>>, vector<64x128xf32>
    %cst_153 = arith.constant dense<0.000000e+00> : vector<2x128xf32>
    %162 = tpu.matmul %160, %161, %cst_153 {dimension_numbers = #tpu.dot_dimension_numbers<[1], [0], [0], [1], [0, 0, 1, 1], [], []>} : vector<2x64xf32>, vector<64x128xf32>, vector<2x128xf32> -> vector<2x128xf32>
    %163 = arith.addf %159, %162 : vector<2x128xf32>
    %c64_154 = arith.constant 64 : index
    %c0_155 = arith.constant 0 : index
    %164 = vector.load %arg13[%c64_154, %c0_155] : memref<144x64xf32, #tpu.memory_space<vmem>>, vector<2x64xf32>
    %c1152 = arith.constant 1152 : index
    %c0_156 = arith.constant 0 : index
    %165 = vector.load %arg7[%c1152, %c0_156] : memref<2688x128xf32, #tpu.memory_space<vmem>>, vector<64x128xf32>
    %cst_157 = arith.constant dense<0.000000e+00> : vector<2x128xf32>
    %166 = tpu.matmul %164, %165, %cst_157 {dimension_numbers = #tpu.dot_dimension_numbers<[1], [0], [0], [1], [0, 0, 1, 1], [], []>} : vector<2x64xf32>, vector<64x128xf32>, vector<2x128xf32> -> vector<2x128xf32>
    %167 = arith.addf %163, %166 : vector<2x128xf32>
    %c66 = arith.constant 66 : index
    %c0_158 = arith.constant 0 : index
    %168 = vector.load %arg13[%c66, %c0_158] : memref<144x64xf32, #tpu.memory_space<vmem>>, vector<2x64xf32>
    %c1216 = arith.constant 1216 : index
    %c0_159 = arith.constant 0 : index
    %169 = vector.load %arg7[%c1216, %c0_159] : memref<2688x128xf32, #tpu.memory_space<vmem>>, vector<64x128xf32>
    %cst_160 = arith.constant dense<0.000000e+00> : vector<2x128xf32>
    %170 = tpu.matmul %168, %169, %cst_160 {dimension_numbers = #tpu.dot_dimension_numbers<[1], [0], [0], [1], [0, 0, 1, 1], [], []>} : vector<2x64xf32>, vector<64x128xf32>, vector<2x128xf32> -> vector<2x128xf32>
    %171 = arith.addf %167, %170 : vector<2x128xf32>
    %c68 = arith.constant 68 : index
    %c0_161 = arith.constant 0 : index
    %172 = vector.load %arg13[%c68, %c0_161] : memref<144x64xf32, #tpu.memory_space<vmem>>, vector<2x64xf32>
    %c1280 = arith.constant 1280 : index
    %c0_162 = arith.constant 0 : index
    %173 = vector.load %arg7[%c1280, %c0_162] : memref<2688x128xf32, #tpu.memory_space<vmem>>, vector<64x128xf32>
    %cst_163 = arith.constant dense<0.000000e+00> : vector<2x128xf32>
    %174 = tpu.matmul %172, %173, %cst_163 {dimension_numbers = #tpu.dot_dimension_numbers<[1], [0], [0], [1], [0, 0, 1, 1], [], []>} : vector<2x64xf32>, vector<64x128xf32>, vector<2x128xf32> -> vector<2x128xf32>
    %175 = arith.addf %171, %174 : vector<2x128xf32>
    %c74 = arith.constant 74 : index
    %c0_164 = arith.constant 0 : index
    %176 = vector.load %arg13[%c74, %c0_164] : memref<144x64xf32, #tpu.memory_space<vmem>>, vector<2x64xf32>
    %c1344 = arith.constant 1344 : index
    %c0_165 = arith.constant 0 : index
    %177 = vector.load %arg7[%c1344, %c0_165] : memref<2688x128xf32, #tpu.memory_space<vmem>>, vector<64x128xf32>
    %cst_166 = arith.constant dense<0.000000e+00> : vector<2x128xf32>
    %178 = tpu.matmul %176, %177, %cst_166 {dimension_numbers = #tpu.dot_dimension_numbers<[1], [0], [0], [1], [0, 0, 1, 1], [], []>} : vector<2x64xf32>, vector<64x128xf32>, vector<2x128xf32> -> vector<2x128xf32>
    %179 = arith.addf %175, %178 : vector<2x128xf32>
    %c76 = arith.constant 76 : index
    %c0_167 = arith.constant 0 : index
    %180 = vector.load %arg13[%c76, %c0_167] : memref<144x64xf32, #tpu.memory_space<vmem>>, vector<2x64xf32>
    %c1408 = arith.constant 1408 : index
    %c0_168 = arith.constant 0 : index
    %181 = vector.load %arg7[%c1408, %c0_168] : memref<2688x128xf32, #tpu.memory_space<vmem>>, vector<64x128xf32>
    %cst_169 = arith.constant dense<0.000000e+00> : vector<2x128xf32>
    %182 = tpu.matmul %180, %181, %cst_169 {dimension_numbers = #tpu.dot_dimension_numbers<[1], [0], [0], [1], [0, 0, 1, 1], [], []>} : vector<2x64xf32>, vector<64x128xf32>, vector<2x128xf32> -> vector<2x128xf32>
    %183 = arith.addf %179, %182 : vector<2x128xf32>
    %c78 = arith.constant 78 : index
    %c0_170 = arith.constant 0 : index
    %184 = vector.load %arg13[%c78, %c0_170] : memref<144x64xf32, #tpu.memory_space<vmem>>, vector<2x64xf32>
    %c1472 = arith.constant 1472 : index
    %c0_171 = arith.constant 0 : index
    %185 = vector.load %arg7[%c1472, %c0_171] : memref<2688x128xf32, #tpu.memory_space<vmem>>, vector<64x128xf32>
    %cst_172 = arith.constant dense<0.000000e+00> : vector<2x128xf32>
    %186 = tpu.matmul %184, %185, %cst_172 {dimension_numbers = #tpu.dot_dimension_numbers<[1], [0], [0], [1], [0, 0, 1, 1], [], []>} : vector<2x64xf32>, vector<64x128xf32>, vector<2x128xf32> -> vector<2x128xf32>
    %187 = arith.addf %183, %186 : vector<2x128xf32>
    %c80 = arith.constant 80 : index
    %c0_173 = arith.constant 0 : index
    %188 = vector.load %arg13[%c80, %c0_173] : memref<144x64xf32, #tpu.memory_space<vmem>>, vector<2x64xf32>
    %c1536 = arith.constant 1536 : index
    %c0_174 = arith.constant 0 : index
    %189 = vector.load %arg7[%c1536, %c0_174] : memref<2688x128xf32, #tpu.memory_space<vmem>>, vector<64x128xf32>
    %cst_175 = arith.constant dense<0.000000e+00> : vector<2x128xf32>
    %190 = tpu.matmul %188, %189, %cst_175 {dimension_numbers = #tpu.dot_dimension_numbers<[1], [0], [0], [1], [0, 0, 1, 1], [], []>} : vector<2x64xf32>, vector<64x128xf32>, vector<2x128xf32> -> vector<2x128xf32>
    %191 = arith.addf %187, %190 : vector<2x128xf32>
    %c82 = arith.constant 82 : index
    %c0_176 = arith.constant 0 : index
    %192 = vector.load %arg13[%c82, %c0_176] : memref<144x64xf32, #tpu.memory_space<vmem>>, vector<2x64xf32>
    %c1600 = arith.constant 1600 : index
    %c0_177 = arith.constant 0 : index
    %193 = vector.load %arg7[%c1600, %c0_177] : memref<2688x128xf32, #tpu.memory_space<vmem>>, vector<64x128xf32>
    %cst_178 = arith.constant dense<0.000000e+00> : vector<2x128xf32>
    %194 = tpu.matmul %192, %193, %cst_178 {dimension_numbers = #tpu.dot_dimension_numbers<[1], [0], [0], [1], [0, 0, 1, 1], [], []>} : vector<2x64xf32>, vector<64x128xf32>, vector<2x128xf32> -> vector<2x128xf32>
    %195 = arith.addf %191, %194 : vector<2x128xf32>
    %c84 = arith.constant 84 : index
    %c0_179 = arith.constant 0 : index
    %196 = vector.load %arg13[%c84, %c0_179] : memref<144x64xf32, #tpu.memory_space<vmem>>, vector<2x64xf32>
    %c1664 = arith.constant 1664 : index
    %c0_180 = arith.constant 0 : index
    %197 = vector.load %arg7[%c1664, %c0_180] : memref<2688x128xf32, #tpu.memory_space<vmem>>, vector<64x128xf32>
    %cst_181 = arith.constant dense<0.000000e+00> : vector<2x128xf32>
    %198 = tpu.matmul %196, %197, %cst_181 {dimension_numbers = #tpu.dot_dimension_numbers<[1], [0], [0], [1], [0, 0, 1, 1], [], []>} : vector<2x64xf32>, vector<64x128xf32>, vector<2x128xf32> -> vector<2x128xf32>
    %199 = arith.addf %195, %198 : vector<2x128xf32>
    %c86 = arith.constant 86 : index
    %c0_182 = arith.constant 0 : index
    %200 = vector.load %arg13[%c86, %c0_182] : memref<144x64xf32, #tpu.memory_space<vmem>>, vector<2x64xf32>
    %c1728 = arith.constant 1728 : index
    %c0_183 = arith.constant 0 : index
    %201 = vector.load %arg7[%c1728, %c0_183] : memref<2688x128xf32, #tpu.memory_space<vmem>>, vector<64x128xf32>
    %cst_184 = arith.constant dense<0.000000e+00> : vector<2x128xf32>
    %202 = tpu.matmul %200, %201, %cst_184 {dimension_numbers = #tpu.dot_dimension_numbers<[1], [0], [0], [1], [0, 0, 1, 1], [], []>} : vector<2x64xf32>, vector<64x128xf32>, vector<2x128xf32> -> vector<2x128xf32>
    %203 = arith.addf %199, %202 : vector<2x128xf32>
    %c92 = arith.constant 92 : index
    %c0_185 = arith.constant 0 : index
    %204 = vector.load %arg13[%c92, %c0_185] : memref<144x64xf32, #tpu.memory_space<vmem>>, vector<2x64xf32>
    %c1792 = arith.constant 1792 : index
    %c0_186 = arith.constant 0 : index
    %205 = vector.load %arg7[%c1792, %c0_186] : memref<2688x128xf32, #tpu.memory_space<vmem>>, vector<64x128xf32>
    %cst_187 = arith.constant dense<0.000000e+00> : vector<2x128xf32>
    %206 = tpu.matmul %204, %205, %cst_187 {dimension_numbers = #tpu.dot_dimension_numbers<[1], [0], [0], [1], [0, 0, 1, 1], [], []>} : vector<2x64xf32>, vector<64x128xf32>, vector<2x128xf32> -> vector<2x128xf32>
    %207 = arith.addf %203, %206 : vector<2x128xf32>
    %c94 = arith.constant 94 : index
    %c0_188 = arith.constant 0 : index
    %208 = vector.load %arg13[%c94, %c0_188] : memref<144x64xf32, #tpu.memory_space<vmem>>, vector<2x64xf32>
    %c1856 = arith.constant 1856 : index
    %c0_189 = arith.constant 0 : index
    %209 = vector.load %arg7[%c1856, %c0_189] : memref<2688x128xf32, #tpu.memory_space<vmem>>, vector<64x128xf32>
    %cst_190 = arith.constant dense<0.000000e+00> : vector<2x128xf32>
    %210 = tpu.matmul %208, %209, %cst_190 {dimension_numbers = #tpu.dot_dimension_numbers<[1], [0], [0], [1], [0, 0, 1, 1], [], []>} : vector<2x64xf32>, vector<64x128xf32>, vector<2x128xf32> -> vector<2x128xf32>
    %211 = arith.addf %207, %210 : vector<2x128xf32>
    %c96_191 = arith.constant 96 : index
    %c0_192 = arith.constant 0 : index
    %212 = vector.load %arg13[%c96_191, %c0_192] : memref<144x64xf32, #tpu.memory_space<vmem>>, vector<2x64xf32>
    %c1920 = arith.constant 1920 : index
    %c0_193 = arith.constant 0 : index
    %213 = vector.load %arg7[%c1920, %c0_193] : memref<2688x128xf32, #tpu.memory_space<vmem>>, vector<64x128xf32>
    %cst_194 = arith.constant dense<0.000000e+00> : vector<2x128xf32>
    %214 = tpu.matmul %212, %213, %cst_194 {dimension_numbers = #tpu.dot_dimension_numbers<[1], [0], [0], [1], [0, 0, 1, 1], [], []>} : vector<2x64xf32>, vector<64x128xf32>, vector<2x128xf32> -> vector<2x128xf32>
    %215 = arith.addf %211, %214 : vector<2x128xf32>
    %c98 = arith.constant 98 : index
    %c0_195 = arith.constant 0 : index
    %216 = vector.load %arg13[%c98, %c0_195] : memref<144x64xf32, #tpu.memory_space<vmem>>, vector<2x64xf32>
    %c1984 = arith.constant 1984 : index
    %c0_196 = arith.constant 0 : index
    %217 = vector.load %arg7[%c1984, %c0_196] : memref<2688x128xf32, #tpu.memory_space<vmem>>, vector<64x128xf32>
    %cst_197 = arith.constant dense<0.000000e+00> : vector<2x128xf32>
    %218 = tpu.matmul %216, %217, %cst_197 {dimension_numbers = #tpu.dot_dimension_numbers<[1], [0], [0], [1], [0, 0, 1, 1], [], []>} : vector<2x64xf32>, vector<64x128xf32>, vector<2x128xf32> -> vector<2x128xf32>
    %219 = arith.addf %215, %218 : vector<2x128xf32>
    %c100 = arith.constant 100 : index
    %c0_198 = arith.constant 0 : index
    %220 = vector.load %arg13[%c100, %c0_198] : memref<144x64xf32, #tpu.memory_space<vmem>>, vector<2x64xf32>
    %c2048 = arith.constant 2048 : index
    %c0_199 = arith.constant 0 : index
    %221 = vector.load %arg7[%c2048, %c0_199] : memref<2688x128xf32, #tpu.memory_space<vmem>>, vector<64x128xf32>
    %cst_200 = arith.constant dense<0.000000e+00> : vector<2x128xf32>
    %222 = tpu.matmul %220, %221, %cst_200 {dimension_numbers = #tpu.dot_dimension_numbers<[1], [0], [0], [1], [0, 0, 1, 1], [], []>} : vector<2x64xf32>, vector<64x128xf32>, vector<2x128xf32> -> vector<2x128xf32>
    %223 = arith.addf %219, %222 : vector<2x128xf32>
    %c102 = arith.constant 102 : index
    %c0_201 = arith.constant 0 : index
    %224 = vector.load %arg13[%c102, %c0_201] : memref<144x64xf32, #tpu.memory_space<vmem>>, vector<2x64xf32>
    %c2112 = arith.constant 2112 : index
    %c0_202 = arith.constant 0 : index
    %225 = vector.load %arg7[%c2112, %c0_202] : memref<2688x128xf32, #tpu.memory_space<vmem>>, vector<64x128xf32>
    %cst_203 = arith.constant dense<0.000000e+00> : vector<2x128xf32>
    %226 = tpu.matmul %224, %225, %cst_203 {dimension_numbers = #tpu.dot_dimension_numbers<[1], [0], [0], [1], [0, 0, 1, 1], [], []>} : vector<2x64xf32>, vector<64x128xf32>, vector<2x128xf32> -> vector<2x128xf32>
    %227 = arith.addf %223, %226 : vector<2x128xf32>
    %c104 = arith.constant 104 : index
    %c0_204 = arith.constant 0 : index
    %228 = vector.load %arg13[%c104, %c0_204] : memref<144x64xf32, #tpu.memory_space<vmem>>, vector<2x64xf32>
    %c2176 = arith.constant 2176 : index
    %c0_205 = arith.constant 0 : index
    %229 = vector.load %arg7[%c2176, %c0_205] : memref<2688x128xf32, #tpu.memory_space<vmem>>, vector<64x128xf32>
    %cst_206 = arith.constant dense<0.000000e+00> : vector<2x128xf32>
    %230 = tpu.matmul %228, %229, %cst_206 {dimension_numbers = #tpu.dot_dimension_numbers<[1], [0], [0], [1], [0, 0, 1, 1], [], []>} : vector<2x64xf32>, vector<64x128xf32>, vector<2x128xf32> -> vector<2x128xf32>
    %231 = arith.addf %227, %230 : vector<2x128xf32>
    %c110 = arith.constant 110 : index
    %c0_207 = arith.constant 0 : index
    %232 = vector.load %arg13[%c110, %c0_207] : memref<144x64xf32, #tpu.memory_space<vmem>>, vector<2x64xf32>
    %c2240 = arith.constant 2240 : index
    %c0_208 = arith.constant 0 : index
    %233 = vector.load %arg7[%c2240, %c0_208] : memref<2688x128xf32, #tpu.memory_space<vmem>>, vector<64x128xf32>
    %cst_209 = arith.constant dense<0.000000e+00> : vector<2x128xf32>
    %234 = tpu.matmul %232, %233, %cst_209 {dimension_numbers = #tpu.dot_dimension_numbers<[1], [0], [0], [1], [0, 0, 1, 1], [], []>} : vector<2x64xf32>, vector<64x128xf32>, vector<2x128xf32> -> vector<2x128xf32>
    %235 = arith.addf %231, %234 : vector<2x128xf32>
    %c112 = arith.constant 112 : index
    %c0_210 = arith.constant 0 : index
    %236 = vector.load %arg13[%c112, %c0_210] : memref<144x64xf32, #tpu.memory_space<vmem>>, vector<2x64xf32>
    %c2304 = arith.constant 2304 : index
    %c0_211 = arith.constant 0 : index
    %237 = vector.load %arg7[%c2304, %c0_211] : memref<2688x128xf32, #tpu.memory_space<vmem>>, vector<64x128xf32>
    %cst_212 = arith.constant dense<0.000000e+00> : vector<2x128xf32>
    %238 = tpu.matmul %236, %237, %cst_212 {dimension_numbers = #tpu.dot_dimension_numbers<[1], [0], [0], [1], [0, 0, 1, 1], [], []>} : vector<2x64xf32>, vector<64x128xf32>, vector<2x128xf32> -> vector<2x128xf32>
    %239 = arith.addf %235, %238 : vector<2x128xf32>
    %c114 = arith.constant 114 : index
    %c0_213 = arith.constant 0 : index
    %240 = vector.load %arg13[%c114, %c0_213] : memref<144x64xf32, #tpu.memory_space<vmem>>, vector<2x64xf32>
    %c2368 = arith.constant 2368 : index
    %c0_214 = arith.constant 0 : index
    %241 = vector.load %arg7[%c2368, %c0_214] : memref<2688x128xf32, #tpu.memory_space<vmem>>, vector<64x128xf32>
    %cst_215 = arith.constant dense<0.000000e+00> : vector<2x128xf32>
    %242 = tpu.matmul %240, %241, %cst_215 {dimension_numbers = #tpu.dot_dimension_numbers<[1], [0], [0], [1], [0, 0, 1, 1], [], []>} : vector<2x64xf32>, vector<64x128xf32>, vector<2x128xf32> -> vector<2x128xf32>
    %243 = arith.addf %239, %242 : vector<2x128xf32>
    %c116 = arith.constant 116 : index
    %c0_216 = arith.constant 0 : index
    %244 = vector.load %arg13[%c116, %c0_216] : memref<144x64xf32, #tpu.memory_space<vmem>>, vector<2x64xf32>
    %c2432 = arith.constant 2432 : index
    %c0_217 = arith.constant 0 : index
    %245 = vector.load %arg7[%c2432, %c0_217] : memref<2688x128xf32, #tpu.memory_space<vmem>>, vector<64x128xf32>
    %cst_218 = arith.constant dense<0.000000e+00> : vector<2x128xf32>
    %246 = tpu.matmul %244, %245, %cst_218 {dimension_numbers = #tpu.dot_dimension_numbers<[1], [0], [0], [1], [0, 0, 1, 1], [], []>} : vector<2x64xf32>, vector<64x128xf32>, vector<2x128xf32> -> vector<2x128xf32>
    %247 = arith.addf %243, %246 : vector<2x128xf32>
    %c118 = arith.constant 118 : index
    %c0_219 = arith.constant 0 : index
    %248 = vector.load %arg13[%c118, %c0_219] : memref<144x64xf32, #tpu.memory_space<vmem>>, vector<2x64xf32>
    %c2496 = arith.constant 2496 : index
    %c0_220 = arith.constant 0 : index
    %249 = vector.load %arg7[%c2496, %c0_220] : memref<2688x128xf32, #tpu.memory_space<vmem>>, vector<64x128xf32>
    %cst_221 = arith.constant dense<0.000000e+00> : vector<2x128xf32>
    %250 = tpu.matmul %248, %249, %cst_221 {dimension_numbers = #tpu.dot_dimension_numbers<[1], [0], [0], [1], [0, 0, 1, 1], [], []>} : vector<2x64xf32>, vector<64x128xf32>, vector<2x128xf32> -> vector<2x128xf32>
    %251 = arith.addf %247, %250 : vector<2x128xf32>
    %c120 = arith.constant 120 : index
    %c0_222 = arith.constant 0 : index
    %252 = vector.load %arg13[%c120, %c0_222] : memref<144x64xf32, #tpu.memory_space<vmem>>, vector<2x64xf32>
    %c2560 = arith.constant 2560 : index
    %c0_223 = arith.constant 0 : index
    %253 = vector.load %arg7[%c2560, %c0_223] : memref<2688x128xf32, #tpu.memory_space<vmem>>, vector<64x128xf32>
    %cst_224 = arith.constant dense<0.000000e+00> : vector<2x128xf32>
    %254 = tpu.matmul %252, %253, %cst_224 {dimension_numbers = #tpu.dot_dimension_numbers<[1], [0], [0], [1], [0, 0, 1, 1], [], []>} : vector<2x64xf32>, vector<64x128xf32>, vector<2x128xf32> -> vector<2x128xf32>
    %255 = arith.addf %251, %254 : vector<2x128xf32>
    %c122 = arith.constant 122 : index
    %c0_225 = arith.constant 0 : index
    %256 = vector.load %arg13[%c122, %c0_225] : memref<144x64xf32, #tpu.memory_space<vmem>>, vector<2x64xf32>
    %c2624 = arith.constant 2624 : index
    %c0_226 = arith.constant 0 : index
    %257 = vector.load %arg7[%c2624, %c0_226] : memref<2688x128xf32, #tpu.memory_space<vmem>>, vector<64x128xf32>
    %cst_227 = arith.constant dense<0.000000e+00> : vector<2x128xf32>
    %258 = tpu.matmul %256, %257, %cst_227 {dimension_numbers = #tpu.dot_dimension_numbers<[1], [0], [0], [1], [0, 0, 1, 1], [], []>} : vector<2x64xf32>, vector<64x128xf32>, vector<2x128xf32> -> vector<2x128xf32>
    %259 = arith.addf %255, %258 : vector<2x128xf32>
    %c0_228 = arith.constant 0 : index
    %c0_229 = arith.constant 0 : index
    %260 = vector.load %arg8[%c0_228, %c0_229] : memref<1x128xf32, #tpu.memory_space<vmem>>, vector<1x128xf32>
    %261 = vector.broadcast %260 : vector<1x128xf32> to vector<2x128xf32>
    %262 = arith.addf %259, %261 : vector<2x128xf32>
    %cst_230 = arith.constant 0.000000e+00 : f32
    %263 = vector.broadcast %cst_230 : f32 to vector<2x128xf32>
    %264 = arith.maximumf %262, %263 : vector<2x128xf32>
    %c0_231 = arith.constant 0 : index
    %c0_232 = arith.constant 0 : index
    %265 = vector.load %arg9[%c0_231, %c0_232] : memref<128x128xf32, #tpu.memory_space<vmem>>, vector<128x128xf32>
    %cst_233 = arith.constant dense<0.000000e+00> : vector<2x128xf32>
    %266 = tpu.matmul %264, %265, %cst_233 {dimension_numbers = #tpu.dot_dimension_numbers<[1], [0], [0], [1], [0, 0, 1, 1], [], []>} : vector<2x128xf32>, vector<128x128xf32>, vector<2x128xf32> -> vector<2x128xf32>
    %c0_234 = arith.constant 0 : index
    %c0_235 = arith.constant 0 : index
    %267 = vector.load %arg10[%c0_234, %c0_235] : memref<1x128xf32, #tpu.memory_space<vmem>>, vector<1x128xf32>
    %268 = vector.broadcast %267 : vector<1x128xf32> to vector<2x128xf32>
    %269 = arith.addf %266, %268 : vector<2x128xf32>
    %c0_236 = arith.constant 0 : index
    %c0_237 = arith.constant 0 : index
    %270 = vector.load %arg11[%c0_236, %c0_237] : memref<2x128xf32, #tpu.memory_space<vmem>>, vector<2x128xf32>
    tpu.vector_store %arg11[%c0_236, %c0_237], %269 {strides = array<i32>} : memref<2x128xf32, #tpu.memory_space<vmem>>, vector<2x128xf32>,
    return
  }
  func.func @transform_0(%arg0: i32) -> (i32, i32) {
    %c0_i32 = arith.constant 0 : i32
    %c0_i32_0 = arith.constant 0 : i32
    %c0_i32_1 = arith.constant 0 : i32
    return %c0_i32, %c0_i32_0 : i32, i32
  }
  func.func @transform_1(%arg0: i32) -> (i32, i32) {
    %c0_i32 = arith.constant 0 : i32
    %c0_i32_0 = arith.constant 0 : i32
    %c0_i32_1 = arith.constant 0 : i32
    return %c0_i32, %c0_i32_0 : i32, i32
  }
  func.func @transform_2(%arg0: i32) -> (i32, i32) {
    %c0_i32 = arith.constant 0 : i32
    %c0_i32_0 = arith.constant 0 : i32
    %c0_i32_1 = arith.constant 0 : i32
    return %c0_i32, %c0_i32_0 : i32, i32
  }
  func.func @transform_3(%arg0: i32) -> (i32, i32) {
    %c0_i32 = arith.constant 0 : i32
    %c0_i32_0 = arith.constant 0 : i32
    %c0_i32_1 = arith.constant 0 : i32
    return %c0_i32, %c0_i32_0 : i32, i32
  }
  func.func @transform_4(%arg0: i32) -> (i32, i32) {
    %c0_i32 = arith.constant 0 : i32
    %c0_i32_0 = arith.constant 0 : i32
    %c0_i32_1 = arith.constant 0 : i32
    return %c0_i32, %c0_i32_0 : i32, i32
  }
  func.func @transform_5(%arg0: i32) -> (i32, i32) {
    %c0_i32 = arith.constant 0 : i32
    %c0_i32_0 = arith.constant 0 : i32
    %c0_i32_1 = arith.constant 0 : i32
    return %c0_i32, %c0_i32_0 : i32, i32
  }
  func.func @transform_6(%arg0: i32) -> (i32, i32) {
    %c0_i32 = arith.constant 0 : i32
    %c0_i32_0 = arith.constant 0 : i32
    %c0_i32_1 = arith.constant 0 : i32
    return %c0_i32, %c0_i32_0 : i32, i32
  }
  func.func @transform_7(%arg0: i32) -> (i32, i32) {
    %c0_i32 = arith.constant 0 : i32
    %c0_i32_0 = arith.constant 0 : i32
    %c0_i32_1 = arith.constant 0 : i32
    return %c0_i32, %c0_i32_0 : i32, i32
  }
  func.func @transform_8(%arg0: i32) -> (i32, i32) {
    %c0_i32 = arith.constant 0 : i32
    %c0_i32_0 = arith.constant 0 : i32
    %c0_i32_1 = arith.constant 0 : i32
    return %c0_i32, %c0_i32_0 : i32, i32
  }
  func.func @transform_9(%arg0: i32) -> (i32, i32) {
    %c0_i32 = arith.constant 0 : i32
    %c0_i32_0 = arith.constant 0 : i32
    %c0_i32_1 = arith.constant 0 : i32
    return %c0_i32, %c0_i32_0 : i32, i32
  }
  func.func @transform_10(%arg0: i32) -> (i32, i32) {
    %c0_i32 = arith.constant 0 : i32
    %c0_i32_0 = arith.constant 0 : i32
    %c0_i32_1 = arith.constant 0 : i32
    return %c0_i32, %c0_i32_0 : i32, i32
  }
}

</mosaic_0001>

<bundles_post_ra>
// kernel: convdqn_forward.1
= control target key start
LH: loop header
LB: loop body
LE: loop exit
PB: predicated region body
PF: predicated region fallthrough
CT: control target
= control target key end

     0   :  { %15 = vsyncpa [#allocation5], 0  ;;  %s13450_s0 = inlined_call_operand.vmem [shape: f32[192,8], index: 0, kind: input, shape index: {}]   ;;  %s13451_s1 = inlined_call_operand.hbm [shape: f32[144,1], index: 1, kind: input, shape index: {}]   ;;  %s13452_s2 = inlined_call_operand.vmem [shape: f32[72,32], index: 2, kind: input, shape index: {}]   ;;  %s13453_s3 = inlined_call_operand.hbm [shape: f32[1,32], index: 3, kind: input, shape index: {}]   ;;  %s13454_s4 = inlined_call_operand.vmem [shape: f32[288,64], index: 4, kind: input, shape index: {}]   ;;  %s13455_s5 = inlined_call_operand.hbm [shape: f32[1,64], index: 5, kind: input, shape index: {}]   ;;  %s13456_s6 = inlined_call_operand.hbm [shape: f32[2688,128], index: 6, kind: input, shape index: {}]   ;;  %s13457_s7 = inlined_call_operand.hbm [shape: f32[1,128], index: 7, kind: input, shape index: {}]   ;;  %s13458_s8 = inlined_call_operand.hbm [shape: f32[128,128], index: 8, kind: input, shape index: {}]   ;;  %s13459_s9 = inlined_call_operand.hbm [shape: f32[1,128], index: 9, kind: input, shape index: {}]   ;;  %s13460_s10 = inlined_call_operand.hbm [shape: f32[2,128], index: 10, kind: output, shape index: {}]  }
   0x1   :  { %16 = vsyncpa [#allocation8], 0 }
   0x2   :  { %17 = vsyncpa [#allocation11], 0 }
   0x3   :  { %18 = vsyncpa [#allocation14], 0 }
   0x4   :  { %19 = vsyncpa [#allocation6], 0  ;;  %s11116_s13 = smov [#allocation7]  }
   0x5   :  { %s42_s14 = sshll.u32 %s11116_s13, 4  ;;  %s43_s14 = int_to_ptr.vmem [resolvable:$true] %s42_s14 }
   0x6   :  { %s10954_s15 = scalar_lea.vmem %s43_s14, 16  ;;  %s10958_s16 = scalar_lea.vmem %s43_s14, 32 }
   0x7   :  { %p10955_p0 = scmp.ne.s32.totalorder %s43_s14, %s10954_s15  ;;  %p10959_p1 = scmp.lt.s32.totalorder %s43_s14, %s43_s14 }
   0x8   :  { %p10960_p2 = scmp.lt.s32.totalorder %s10958_s16, %s10954_s15 }
   0xa   :  { %p10961_p3 = por %p10960_p2, %p10959_p1 }
   0xc   :  { %p10962_p4 = pnand %p10961_p3, %p10955_p0 }
   0xe   :  { %10965 = shalt.err (!%p10962_p4)
}
   0xf   :  { %45 = dma.hbm_to_vmem [thread:$0]  %s13453_s3, 16, %s43_s14, [#allocation8]  }
  0x10   :  { %s11117_s19 = smov [#allocation10]   ;;  %s11118_s21 = smov [#allocation13]  }
  0x11   :  { %s63_s20 = sshll.u32 %s11117_s19, 4  ;;  %s85_s22 = sshll.u32 %s11118_s21, 4  ;;  %s64_s20 = int_to_ptr.vmem [resolvable:$true] %s63_s20  ;;  %s86_s22 = int_to_ptr.vmem [resolvable:$true] %s85_s22 }
  0x12   :  { %s10974_s23 = scalar_lea.vmem %s64_s20, 43008  ;;  %p10979_p6 = scmp.lt.s32.totalorder %s64_s20, %s64_s20 }
  0x13   :  { %p10975_p5 = scmp.ne.s32.totalorder %s64_s20, %s10974_s23  ;;  %p10980_p7 = scmp.lt.s32.totalorder %s10974_s23, %s10974_s23 }
  0x15   :  { %p10981_p8 = por %p10980_p7, %p10979_p6 }
  0x17   :  { %p10982_p9 = pnand %p10981_p8, %p10975_p5 }
  0x19   :  { %10985 = shalt.err (!%p10982_p9)
}
  0x1a   :  { %s11119_s24 = smov 128   ;;  %s11120_s25 = smov 8  }
  0x1b   :  { %69 = dma.hbm_to_vmem [thread:$0]  %s13456_s6, 43008, %s64_s20, [#allocation11], %s11119_s24, %s11119_s24, %s11120_s25  }
  0x1c   :  { %s10994_s3 = scalar_lea.vmem %s86_s22, 2048  ;;  %p10999_p11 = scmp.lt.s32.totalorder %s86_s22, %s86_s22 }
  0x1d   :  { %p10995_p10 = scmp.ne.s32.totalorder %s86_s22, %s10994_s3  ;;  %p11000_p12 = scmp.lt.s32.totalorder %s10994_s3, %s10994_s3 }
  0x1f   :  { %p11001_p13 = por %p11000_p12, %p10999_p11 }
  0x21   :  { %p11002_p0 = pnand %p11001_p13, %p10995_p10 }
  0x23   :  { %11005 = shalt.err (!%p11002_p0)
}
  0x24   :  { %91 = dma.hbm_to_vmem [thread:$0]  %s13458_s8, 2048, %s86_s22, [#allocation14], %s11119_s24, %s11119_s24, %s11120_s25  }
  0x25   :  { %s11121_s30 = smov [#allocation4]   ;;  %s11122_s12 = smov [#allocation9]  }
  0x26   :  { %s27_s11 = sshll.u32 %s11121_s30, 4  ;;  %s54_s13 = sshll.u32 %s11122_s12, 4  ;;  %s28_s11 = int_to_ptr.vmem [resolvable:$true] %s27_s11  ;;  %s55_s13 = int_to_ptr.vmem [resolvable:$true] %s54_s13 }
  0x27   :  { %s11014_s14 = scalar_lea.vmem %s28_s11, 2304  ;;  %p11019_p2 = scmp.lt.s32.totalorder %s28_s11, %s28_s11 }
  0x28   :  { %p11015_p1 = scmp.ne.s32.totalorder %s28_s11, %s11014_s14  ;;  %p11020_p3 = scmp.lt.s32.totalorder %s11014_s14, %s11014_s14 }
  0x2a   :  { %p11021_p4 = por %p11020_p3, %p11019_p2 }
  0x2c   :  { %p11022_p5 = pnand %p11021_p4, %p11015_p1 }
  0x2e   :  { %11025 = shalt.err (!%p11022_p5)
}
  0x2f   :  { %33 = dma.hbm_to_vmem [thread:$0]  %s13451_s1, 2304, %s28_s11, [#allocation5], %s11119_s24, %s11119_s24, %s11120_s25  }
  0x30   :  { %s11034_s16 = scalar_lea.vmem %s55_s13, 16  ;;  %s11038_s8 = scalar_lea.vmem %s55_s13, 32 }
  0x31   :  { %p11035_p6 = scmp.ne.s32.totalorder %s55_s13, %s11034_s16  ;;  %p11039_p7 = scmp.lt.s32.totalorder %s55_s13, %s55_s13 }
  0x32   :  { %p11040_p8 = scmp.lt.s32.totalorder %s11038_s8, %s11034_s16 }
  0x34   :  { %p11041_p9 = por %p11040_p8, %p11039_p7 }
  0x36   :  { %p11042_p10 = pnand %p11041_p9, %p11035_p6 }
  0x38   :  { %11045 = shalt.err (!%p11042_p10)
}
  0x39   :  { %57 = dma.hbm_to_vmem [thread:$0]  %s13455_s5, 16, %s55_s13, [#allocation8]  }
  0x3a   :  { %s11123_s19 = smov [#allocation12]   ;;  %s11124_s21 = smov [#allocation15]  }
  0x3b   :  { %s76_s20 = sshll.u32 %s11123_s19, 4  ;;  %s98_s22 = sshll.u32 %s11124_s21, 4  ;;  %s77_s20 = int_to_ptr.vmem [resolvable:$true] %s76_s20  ;;  %s99_s22 = int_to_ptr.vmem [resolvable:$true] %s98_s22 }
  0x3c   :  { %s11054_s23 = scalar_lea.vmem %s77_s20, 16  ;;  %s11058_s1 = scalar_lea.vmem %s77_s20, 32 }
  0x3d   :  { %p11055_p11 = scmp.ne.s32.totalorder %s77_s20, %s11054_s23  ;;  %p11059_p12 = scmp.lt.s32.totalorder %s77_s20, %s77_s20 }
  0x3e   :  { %p11060_p13 = scmp.lt.s32.totalorder %s11058_s1, %s11054_s23 }
  0x40   :  { %p11061_p0 = por %p11060_p13, %p11059_p12 }
  0x42   :  { %p11062_p1 = pnand %p11061_p0, %p11055_p11 }
  0x44   :  { %11065 = shalt.err (!%p11062_p1)
}
  0x45   :  { %79 = dma.hbm_to_vmem [thread:$0]  %s13457_s7, 16, %s77_s20, [#allocation11]  }
  0x46   :  { %s11074_s26 = scalar_lea.vmem %s99_s22, 16  ;;  %s11078_s5 = scalar_lea.vmem %s99_s22, 32 }
  0x47   :  { %p11075_p2 = scmp.ne.s32.totalorder %s99_s22, %s11074_s26  ;;  %p11079_p3 = scmp.lt.s32.totalorder %s99_s22, %s99_s22 }
  0x48   :  { %p11080_p4 = scmp.lt.s32.totalorder %s11078_s5, %s11074_s26 }
  0x4a   :  { %p11081_p5 = por %p11080_p4, %p11079_p3 }
  0x4c   :  { %p11082_p6 = pnand %p11081_p5, %p11075_p2 }
  0x4e   :  { %11085 = shalt.err (!%p11082_p6)
}
  0x4f   :  { %101 = dma.hbm_to_vmem [thread:$0]  %s13459_s9, 16, %s99_s22, [#allocation14]  }
  0x50   :  { %11106 = dma.done.wait [#allocation5], 2304  }
  0x51   :  { %11107 = vsyncadd [#allocation5], 4294964992 }
  0x52   :  { %11108 = dma.done.wait [#allocation8], 32  }
  0x53   :  { %11109 = vsyncadd [#allocation8], 4294967264 }
  0x54   :  { %11110 = dma.done.wait [#allocation11], 43024  }
  0x55   :  { %11111 = vsyncadd [#allocation11], 4294924272 }
  0x56   :  { %11112 = dma.done.wait [#allocation14], 2064  }
  0x57   :  { %11113 = vsyncadd [#allocation14], 4294965232  ;;  %v160_v0 = vld [vmem:[%s13452_s2 + $0x8] sm:$0xff]  ;;  %vm161_vm0 = vcmask 64512   ;;  %v11214_v2 = vld [vmem:[%s13450_s0 + $0x56] sm:$0xff]  ;;  %v11125_v51 = vmov 0  }
  0x58   :  { %v142_v1 = vld [vmem:[%s13450_s0 + $0x6] sm:$0xff]  ;;  %9520 = vmatprep.subr.mxu0 %v160_v0  ;;  %10929 = vmatprep.subr.mxu1 %v160_v0  ;;  %v143_v3 = vld [vmem:[%s13450_s0 + $0xe] sm:$0xff]  ;;  %v11222_v4 = vld [vmem:[%s13450_s0 + $0x5e] sm:$0xff]  ;;  %vm2471_vm1 = vcmask 261120   ;;  %vm11127_vm2 = vmmov 0   ;;  %vm4762_vm3 = vcmask 523264  }
  0x59   :  { %9521 = vmatpush3.msra.mxu0 %v160_v0  ;;  %10930 = vmatpush3.msra.mxu1 %v160_v0  ;;  %v598_v5 = vld [vmem:[%s13452_s2 + $0x10] sm:$0xff]  ;;  %v141_v6 = vld [vmem:[%s13452_s2] sm:$0xff]  ;;  %v844_v13 = vld [vmem:[%s13452_s2 + $0x18] sm:$0xff] }
  0x5a   :  { %9522 = vmatprep.mubr.msk.f32.mxu0 %vm161_vm0, %v142_v1  ;;  %9537 = vmatprep.mubr.msk.f32.mxu1 %vm161_vm0, %v11214_v2  ;;  %v11236_v7 = vld [vmem:[%s13450_s0 + $0x16] sm:$0xff]  ;;  %v11244_v8 = vld [vmem:[%s13450_s0 + $0x66] sm:$0xff]  ;;  %v11249_v9 = vld [vmem:[%s13450_s0 + $0x1e] sm:$0xff] }
  0x5b   :  { %9523 = vmatmul.mubr.msk.f32.vlgmr.msra.gmra.mxu0 %vm161_vm0, %v143_v3  ;;  %9538 = vmatmul.mubr.msk.f32.vlgmr.msra.gmra.mxu1 %vm161_vm0, %v11222_v4  ;;  %v11254_v10 = vld [vmem:[%s13450_s0 + $0x6e] sm:$0xff]  ;;  %v11261_v11 = vld [vmem:[%s13450_s0 + $0x26] sm:$0xff]  ;;  %v11266_v12 = vld [vmem:[%s13450_s0 + $0x76] sm:$0xff] }
  0x5c   :  { %9578 = vmatprep.subr.mxu0 %v598_v5  ;;  %9549 = vmatprep.subr.mxu1 %v141_v6  ;;  %v11284_v14 = vld [vmem:[%s13450_s0 + $0x2e] sm:$0xff]  ;;  %v11289_v15 = vld [vmem:[%s13450_s0 + $0x7e] sm:$0xff]  ;;  %v11297_v17 = vld [vmem:[%s13450_s0 + $0x36] sm:$0xff] }
  0x5d   :  { %9579 = vmatpush3.msra.mxu0 %v598_v5  ;;  %9525 = vmatprep.mubr.msk.f32.mxu0 %vm161_vm0, %v11236_v7  ;;  %v1090_v16 = vld [vmem:[%s13452_s2 + $0x20] sm:$0xff]  ;;  %v11320_v20 = vld [vmem:[%s13450_s0 + $0x8e] sm:$0xff]  ;;  %v11373_v31 = vld [vmem:[%s13450_s0 + $0x18] sm:$0xff] }
  0x5e   :  { %9540 = vmatprep.mubr.msk.f32.mxu1 %vm161_vm0, %v11244_v8  ;;  %9550 = vmatpush3.msra.mxu1 %v141_v6  ;;  %v11302_v18 = vld [vmem:[%s13450_s0 + $0x86] sm:$0xff]  ;;  %v11315_v19 = vld [vmem:[%s13450_s0 + $0x3e] sm:$0xff]  ;;  %v11340_v23 = vld [vmem:[%s13450_s0 + $0x4e] sm:$0xff] }
  0x5f   :  { %9526 = vmatmul.mubr.msk.f32.gmra.mxu0 %vm161_vm0, %v11249_v9  ;;  %9541 = vmatmul.mubr.msk.f32.gmra.mxu1 %vm161_vm0, %v11254_v10  ;;  %v11325_v21 = vld [vmem:[%s13450_s0 + $0x46] sm:$0xff]  ;;  %v125_v25 = vld [vmem:[%s13450_s0 + $0x14] sm:$0xff]  ;;  %v126_v28 = vld [vmem:[%s13450_s0 + $0x1c] sm:$0xff] }
  0x60   :  { %9528 = vmatprep.mubr.msk.f32.mxu0 %vm161_vm0, %v11261_v11  ;;  %9543 = vmatprep.mubr.msk.f32.mxu1 %vm161_vm0, %v11266_v12  ;;  %v123_v22 = vld [vmem:[%s13450_s0 + $0x4] sm:$0xff]  ;;  %v124_v24 = vld [vmem:[%s13450_s0 + $0xc] sm:$0xff]  ;;  %v11399_v35 = vld [vmem:[%s13450_s0 + $0x34] sm:$0xff] }
  0x61   :  { %9607 = vmatprep.subr.mxu1 %v844_v13  ;;  %9636 = vmatprep.subr.mxu0 %v1090_v16  ;;  %v580_v26 = vld [vmem:[%s13450_s0 + $0x8] sm:$0xff]  ;;  %v581_v29 = vld [vmem:[%s13450_s0 + $0x10] sm:$0xff]  ;;  %v11392_v34 = vld [vmem:[%s13450_s0 + $0x20] sm:$0xff] }
  0x62   :  { %v11357_v27 = vld [vmem:[%s13452_s2 + $0x28] sm:$0xff]  ;;  %v11379_v32 = vld [vmem:[%s13452_s2 + $0x30] sm:$0xff]  ;;  %v11418_v37 = vld [vmem:[%s13450_s0 + $0x3c] sm:$0xff]  ;;  %10944 = vset.pattern.permute.xlu0 %v11125_v51  ;;  %10945 = vset.pattern.permute.xlu1 %v11125_v51 }
  0x63   :  { %9529 = vmatmul.mubr.msk.f32.gmra.mxu0 %vm161_vm0, %v11284_v14  ;;  %9544 = vmatmul.mubr.msk.f32.gmra.mxu1 %vm161_vm0, %v11289_v15  ;;  %v127_v30 = vld [vmem:[%s13450_s0 + $0x24] sm:$0xff]  ;;  %v11387_v33 = vld [vmem:[%s13450_s0 + $0x2c] sm:$0xff]  ;;  %v11433_v40 = vld [vmem:[%s13450_s0 + $0x38] sm:$0xff] }
  0x64   :  { %9531 = vmatprep.mubr.msk.f32.mxu0 %vm161_vm0, %v11297_v17  ;;  %9546 = vmatprep.mubr.msk.f32.mxu1 %vm161_vm0, %v11302_v18  ;;  %v11404_v36 = vld [vmem:[%s13450_s0 + $0x28] sm:$0xff]  ;;  %v11423_v38 = vld [vmem:[%s13450_s0 + $0x30] sm:$0xff]  ;;  %v11451_v42 = vld [vmem:[%s13450_s0 + $0x40] sm:$0xff] }
  0x65   :  { %v11428_v39 = vld [vmem:[%s13450_s0 + $0x44] sm:$0xff]  ;;  %v11446_v41 = vld [vmem:[%s13450_s0 + $0x4c] sm:$0xff]  ;;  %v11456_v43 = vld [vmem:[%s13450_s0 + $0x54] sm:$0xff] }
  0x66   :  { %v11461_v44 = vld [vmem:[%s13450_s0 + $0x48] sm:$0xff]  ;;  %v2345_v45 = vld [vmem:[#allocation4] sm:$0xff]  ;;  %v2347_v46 = vld [vmem:[#allocation4 + $0x10] sm:$0xff] }
  0x67   :  { %9532 = vmatmul.mubr.msk.f32.gmra.mxu0 %vm161_vm0, %v11315_v19  ;;  %9547 = vmatmul.mubr.msk.f32.gmra.mxu1 %vm161_vm0, %v11320_v20  ;;  %v11474_v47 = vld [vmem:[%s13450_s0 + $0x5c] sm:$0xff]  ;;  %v11479_v48 = vld [vmem:[%s13450_s0 + $0x50] sm:$0xff]  ;;  %v11484_v49 = vld [vmem:[%s13450_s0 + $0x64] sm:$0xff] }
  0x68   :  { %9534 = vmatprep.mubr.msk.f32.mxu0 %vm161_vm0, %v11325_v21  ;;  %9551 = vmatprep.mubr.msk.f32.mxu1 %vm161_vm0, %v123_v22  ;;  %v11489_v50 = vld [vmem:[%s13450_s0 + $0x58] sm:$0xff]  ;;  %v2348_v53 = vld [vmem:[#allocation4 + $0x18] sm:$0xff]  ;;  %v11507_v55 = vld [vmem:[%s13450_s0 + $0x60] sm:$0xff] }
  0x69   :  { %2365 = vperm.xlu0 %10944, %v2345_v45   ;;  %2375 = vperm.xlu1 %10945, %v2347_v46   ;;  %v2346_v52 = vld [vmem:[#allocation4 + $0x8] sm:$0xff]  ;;  %v11502_v54 = vld [vmem:[%s13450_s0 + $0x6c] sm:$0xff]  ;;  %v11540_v62 = vld [vmem:[%s13450_s0 + $0x84] sm:$0xff] }
  0x6a   :  { %v11512_v56 = vld [vmem:[%s13450_s0 + $0x74] sm:$0xff]  ;;  %v11517_v57 = vld [vmem:[%s13450_s0 + $0x68] sm:$0xff]  ;;  %v11530_v60 = vld [vmem:[%s13450_s0 + $0x7c] sm:$0xff] }
  0x6b   :  { %9535 = vmatmul.mubr.msk.f32.gmra.mxu0 %vm161_vm0, %v11340_v23  ;;  %9552 = vmatmul.mubr.msk.f32.vlgmr.msra.gmra.mxu1 %vm161_vm0, %v124_v24  ;;  %v2349_v58 = vld [vmem:[#allocation4 + $0x20] sm:$0xff]  ;;  %v2350_v59 = vld [vmem:[#allocation4 + $0x28] sm:$0xff]  ;;  %v2351_v0 = vld [vmem:[#allocation4 + $0x30] sm:$0xff] }
  0x6c   :  { %9554 = vmatprep.mubr.msk.f32.mxu1 %vm161_vm0, %v125_v25  ;;  %9580 = vmatprep.mubr.msk.f32.mxu0 %vm161_vm0, %v580_v26  ;;  %v11535_v61 = vld [vmem:[%s13450_s0 + $0x70] sm:$0xff]  ;;  %v11545_v63 = vld [vmem:[%s13450_s0 + $0x78] sm:$0xff]  ;;  %v2352_v1 = vld [vmem:[#allocation4 + $0x38] sm:$0xff] }
  0x6d   :  { %9608 = vmatpush3.msra.mxu1 %v844_v13  ;;  %2370 = vperm.xlu0 %10944, %v2346_v52   ;;  %v11558_v3 = vld [vmem:[%s13450_s0 + $0x8c] sm:$0xff]  ;;  %v11563_v5 = vld [vmem:[%s13450_s0 + $0x80] sm:$0xff]  ;;  %v11590_v24 = vld [vmem:[%s13452_s2 + $0x38] sm:$0xff] }
  0x6e   :  { %9665 = vmatprep.subr.mxu1 %v11357_v27  ;;  %2380 = vperm.xlu1 %10945, %v2348_v53   ;;  %v11568_v6 = vld [vmem:[%s13450_s0 + $0x88] sm:$0xff]  ;;  %v2353_v13 = vld [vmem:[#allocation4 + $0x40] sm:$0xff]  ;;  %v2355_v25 = vld [vmem:[#allocation4 + $0x50] sm:$0xff] }
  0x6f   :  { %9555 = vmatmul.mubr.msk.f32.gmra.mxu1 %vm161_vm0, %v126_v28  ;;  %9581 = vmatmul.mubr.msk.f32.vlgmr.msra.gmra.mxu0 %vm161_vm0, %v581_v29  ;;  %v11581_v22 = vld [vmem:[%s13450_s0 + $0x90] sm:$0xff]  ;;  %v1322_v26 = vld [vmem:[%s13450_s0 + $0x3a] sm:$0xff]  ;;  %v1335_v45 = vld [vmem:[%s13450_s0 + $0xa2] sm:$0xff] }
  0x70   :  { %9637 = vmatpush3.msra.mxu0 %v1090_v16  ;;  %9557 = vmatprep.mubr.msk.f32.mxu1 %vm161_vm0, %v127_v30  ;;  %v2354_v16 = vld [vmem:[#allocation4 + $0x48] sm:$0xff]  ;;  %v1324_v28 = vld [vmem:[%s13450_s0 + $0x4a] sm:$0xff] }
  0x71   :  { %9583 = vmatprep.mubr.msk.f32.mxu0 %vm161_vm0, %v11373_v31  ;;  %9694 = vmatprep.subr.mxu0 %v11379_v32  ;;  %v1325_v29 = vld [vmem:[%s13450_s0 + $0x52] sm:$0xff]  ;;  %v1326_v30 = vld [vmem:[%s13450_s0 + $0x5a] sm:$0xff]  ;;  %v1580_v46 = vld [vmem:[%s13450_s0 + $0xa8] sm:$0xff] }
  0x72   :  { %2385 = vperm.xlu0 %10944, %v2349_v58   ;;  %2390 = vperm.xlu1 %10945, %v2350_v59   ;;  %v2555_v51 = vld [vmem:[%s13454_s4 + $0x28] sm:$0xff]  ;;  %v13461_v58 = vmov 0.0  }
  0x73   :  { %9558 = vmatmul.mubr.msk.f32.gmra.mxu1 %vm161_vm0, %v11387_v33  ;;  %9584 = vmatmul.mubr.msk.f32.gmra.mxu0 %vm161_vm0, %v11392_v34  ;;  %2476 = vst.msk [vmem:[#allocation2 + $0x20] sm:$0xff] %vm2471_vm1, %v13461_v58  ;;  %2472 = vst.msk [vmem:[#allocation2] sm:$0xff] %vm2471_vm1, %v13461_v58 }
  0x74   :  { %9560 = vmatprep.mubr.msk.f32.mxu1 %vm161_vm0, %v11399_v35  ;;  %9586 = vmatprep.mubr.msk.f32.mxu0 %vm161_vm0, %v11404_v36  ;;  %2473 = vst.msk [vmem:[#allocation2 + $0x8] sm:$0xff] %vm2471_vm1, %v13461_v58  ;;  %2474 = vst.msk [vmem:[#allocation2 + $0x10] sm:$0xff] %vm2471_vm1, %v13461_v58 }
  0x75   :  { %2475 = vst.msk [vmem:[#allocation2 + $0x18] sm:$0xff] %vm2471_vm1, %v13461_v58  ;;  %2477 = vst.msk [vmem:[#allocation2 + $0x28] sm:$0xff] %vm2471_vm1, %v13461_v58 }
  0x76   :  { %2395 = vperm.xlu0 %10944, %v2351_v0   ;;  %2400 = vperm.xlu1 %10945, %v2352_v1   ;;  %2478 = vst.msk [vmem:[#allocation2 + $0x30] sm:$0xff] %vm2471_vm1, %v13461_v58  ;;  %2479 = vst.msk [vmem:[#allocation2 + $0x38] sm:$0xff] %vm2471_vm1, %v13461_v58  ;;  %v2534_v0 = vld [vmem:[%s13454_s4 + $0x10] sm:$0xff] }
  0x77   :  { %9561 = vmatmul.mubr.msk.f32.gmra.mxu1 %vm161_vm0, %v11418_v37  ;;  %9587 = vmatmul.mubr.msk.f32.gmra.mxu0 %vm161_vm0, %v11423_v38  ;;  %2480 = vst.msk [vmem:[#allocation2 + $0x40] sm:$0xff] %vm2471_vm1, %v13461_v58  ;;  %2481 = vst.msk [vmem:[#allocation2 + $0x48] sm:$0xff] %vm2471_vm1, %v13461_v58 }
  0x78   :  { %9563 = vmatprep.mubr.msk.f32.mxu1 %vm161_vm0, %v11428_v39  ;;  %9589 = vmatprep.mubr.msk.f32.mxu0 %vm161_vm0, %v11433_v40  ;;  %2482 = vst.msk [vmem:[#allocation2 + $0x50] sm:$0xff] %vm2471_vm1, %v13461_v58  ;;  %2483 = vst.msk [vmem:[#allocation2 + $0x58] sm:$0xff] %vm2471_vm1, %v13461_v58 }
  0x79   :  { %2484 = vst.msk [vmem:[#allocation2 + $0x60] sm:$0xff] %vm2471_vm1, %v13461_v58  ;;  %2485 = vst.msk [vmem:[#allocation2 + $0x68] sm:$0xff] %vm2471_vm1, %v13461_v58 }
  0x7a   :  { %2405 = vperm.xlu0 %10944, %v2353_v13   ;;  %2410 = vperm.xlu1 %10945, %v2354_v16   ;;  %2486 = vst.msk [vmem:[#allocation2 + $0x70] sm:$0xff] %vm2471_vm1, %v13461_v58  ;;  %2487 = vst.msk [vmem:[#allocation2 + $0x78] sm:$0xff] %vm2471_vm1, %v13461_v58  ;;  %v2554_v16 = vld [vmem:[%s13454_s4 + $0x20] sm:$0xff] }
  0x7b   :  { %9564 = vmatmul.mubr.msk.f32.gmra.mxu1 %vm161_vm0, %v11446_v41  ;;  %9590 = vmatmul.mubr.msk.f32.gmra.mxu0 %vm161_vm0, %v11451_v42  ;;  %2488 = vst.msk [vmem:[#allocation2 + $0x80] sm:$0xff] %vm2471_vm1, %v13461_v58  ;;  %2489 = vst.msk [vmem:[#allocation2 + $0x88] sm:$0xff] %vm2471_vm1, %v13461_v58 }
  0x7c   :  { %9566 = vmatprep.mubr.msk.f32.mxu1 %vm161_vm0, %v11456_v43  ;;  %9592 = vmatprep.mubr.msk.f32.mxu0 %vm161_vm0, %v11461_v44  ;;  %2490 = vst.msk [vmem:[#allocation2 + $0x90] sm:$0xff] %vm2471_vm1, %v13461_v58  ;;  %2491 = vst.msk [vmem:[#allocation2 + $0x98] sm:$0xff] %vm2471_vm1, %v13461_v58 }
  0x7d   :  { %2492 = vst.msk [vmem:[#allocation2 + $0xa0] sm:$0xff] %vm2471_vm1, %v13461_v58  ;;  %2493 = vst.msk [vmem:[#allocation2 + $0xa8] sm:$0xff] %vm2471_vm1, %v13461_v58 }
  0x7e   :  { %2415 = vperm.xlu0 %10944, %v2355_v25   ;;  %2494 = vst.msk [vmem:[#allocation2 + $0xb0] sm:$0xff] %vm2471_vm1, %v13461_v58  ;;  %2495 = vst.msk [vmem:[#allocation2 + $0xb8] sm:$0xff] %vm2471_vm1, %v13461_v58  ;;  %v2514_v25 = vld [vmem:[#allocation2 + $0x4] sm:$0xff] }
  0x7f   :  { %9567 = vmatmul.mubr.msk.f32.gmra.mxu1 %vm161_vm0, %v11474_v47  ;;  %9593 = vmatmul.mubr.msk.f32.gmra.mxu0 %vm161_vm0, %v11479_v48 }
  0x80   :  { %9569 = vmatprep.mubr.msk.f32.mxu1 %vm161_vm0, %v11484_v49  ;;  %9595 = vmatprep.mubr.msk.f32.mxu0 %vm161_vm0, %v11489_v50 }
  0x83   :  { %9570 = vmatmul.mubr.msk.f32.gmra.mxu1 %vm161_vm0, %v11502_v54  ;;  %9596 = vmatmul.mubr.msk.f32.gmra.mxu0 %vm161_vm0, %v11507_v55 }
  0x84   :  { %9572 = vmatprep.mubr.msk.f32.mxu1 %vm161_vm0, %v11512_v56  ;;  %9598 = vmatprep.mubr.msk.f32.mxu0 %vm161_vm0, %v11517_v57 }
  0x87   :  { %9573 = vmatmul.mubr.msk.f32.gmra.mxu1 %vm161_vm0, %v11530_v60  ;;  %9599 = vmatmul.mubr.msk.f32.gmra.mxu0 %vm161_vm0, %v11535_v61 }
  0x88   :  { %9575 = vmatprep.mubr.msk.f32.mxu1 %vm161_vm0, %v11540_v62  ;;  %9601 = vmatprep.mubr.msk.f32.mxu0 %vm161_vm0, %v11545_v63 }
  0x8b   :  { %9576 = vmatmul.mubr.msk.f32.gmra.mxu1 %vm161_vm0, %v11558_v3  ;;  %9602 = vmatmul.mubr.msk.f32.gmra.mxu0 %vm161_vm0, %v11563_v5 }
  0x8c   :  { %9604 = vmatprep.mubr.msk.f32.mxu0 %vm161_vm0, %v11568_v6  ;;  %9609 = vmatprep.mubr.msk.f32.mxu1 %vm161_vm0, %v11236_v7  ;;  %v11601_v7 = vld [vmem:[%s13452_s2 + $0x40] sm:$0xff] }
  0x8f   :  { %9605 = vmatmul.mubr.msk.f32.gmra.mxu0 %vm161_vm0, %v11581_v22  ;;  %9610 = vmatmul.mubr.msk.f32.vlgmr.msra.gmra.mxu1 %vm161_vm0, %v11249_v9  ;;  %v2356_v9 = vld [vmem:[#allocation4 + $0x58] sm:$0xff] }
  0x90   :  { %9612 = vmatprep.mubr.msk.f32.mxu1 %vm161_vm0, %v11261_v11  ;;  %9638 = vmatprep.mubr.msk.f32.mxu0 %vm161_vm0, %v11373_v31  ;;  %v2357_v11 = vld [vmem:[#allocation4 + $0x60] sm:$0xff]  ;;  %v1327_v31 = vld [vmem:[%s13450_s0 + $0x62] sm:$0xff] }
  0x91   :  { %9666 = vmatpush3.msra.mxu1 %v11357_v27  ;;  %2420 = vperm.xlu1 %10945, %v2356_v9   ;;  %v1323_v27 = vld [vmem:[%s13450_s0 + $0x42] sm:$0xff] }
  0x92   :  { %9723 = vmatprep.subr.mxu1 %v11590_v24  ;;  %2425 = vperm.xlu0 %10944, %v2357_v11   ;;  %v2537_v11 = vld [vmem:[#allocation2 + $0xe] sm:$0xff] }
  0x93   :  { %9613 = vmatmul.mubr.msk.f32.gmra.mxu1 %vm161_vm0, %v11284_v14  ;;  %9639 = vmatmul.mubr.msk.f32.vlgmr.msra.gmra.mxu0 %vm161_vm0, %v11392_v34  ;;  %v2359_v14 = vld [vmem:[#allocation4 + $0x70] sm:$0xff]  ;;  %v1329_v34 = vld [vmem:[%s13450_s0 + $0x72] sm:$0xff] }
  0x94   :  { %9695 = vmatpush3.msra.mxu0 %v11379_v32  ;;  %9615 = vmatprep.mubr.msk.f32.mxu1 %vm161_vm0, %v11297_v17  ;;  %v1088_v17 = vld [vmem:[%s13450_s0 + $0x98] sm:$0xff]  ;;  %v1328_v32 = vld [vmem:[%s13450_s0 + $0x6a] sm:$0xff] }
  0x95   :  { %9641 = vmatprep.mubr.msk.f32.mxu0 %vm161_vm0, %v11404_v36  ;;  %9752 = vmatprep.subr.mxu0 %v11601_v7 }
  0x96   :  { %2435 = vperm.xlu0 %10944, %v2359_v14  }
  0x97   :  { %9616 = vmatmul.mubr.msk.f32.gmra.mxu1 %vm161_vm0, %v11315_v19  ;;  %9642 = vmatmul.mubr.msk.f32.gmra.mxu0 %vm161_vm0, %v11423_v38  ;;  %v1089_v19 = vld [vmem:[%s13450_s0 + $0xa0] sm:$0xff] }
  0x98   :  { %9618 = vmatprep.mubr.msk.f32.mxu1 %vm161_vm0, %v11325_v21  ;;  %9644 = vmatprep.mubr.msk.f32.mxu0 %vm161_vm0, %v11433_v40  ;;  %v1320_v21 = vld [vmem:[%s13450_s0 + $0x2a] sm:$0xff] }
  0x9b   :  { %9619 = vmatmul.mubr.msk.f32.gmra.mxu1 %vm161_vm0, %v11340_v23  ;;  %9645 = vmatmul.mubr.msk.f32.gmra.mxu0 %vm161_vm0, %v11451_v42  ;;  %v1321_v23 = vld [vmem:[%s13450_s0 + $0x32] sm:$0xff] }
  0x9c   :  { %9621 = vmatprep.mubr.msk.f32.mxu1 %vm161_vm0, %v11214_v2  ;;  %9647 = vmatprep.mubr.msk.f32.mxu0 %vm161_vm0, %v11461_v44  ;;  %v2358_v2 = vld [vmem:[#allocation4 + $0x68] sm:$0xff] }
  0x9d   :  { %2430 = vperm.xlu1 %10945, %v2358_v2   ;;  %v2515_v2 = vld [vmem:[#allocation2 + $0xc] sm:$0xff] }
  0x9f   :  { %9622 = vmatmul.mubr.msk.f32.gmra.mxu1 %vm161_vm0, %v11222_v4  ;;  %9648 = vmatmul.mubr.msk.f32.gmra.mxu0 %vm161_vm0, %v11479_v48  ;;  %v2360_v4 = vld [vmem:[#allocation4 + $0x78] sm:$0xff] }
  0xa0   :  { %9624 = vmatprep.mubr.msk.f32.mxu1 %vm161_vm0, %v11244_v8  ;;  %9650 = vmatprep.mubr.msk.f32.mxu0 %vm161_vm0, %v11489_v50  ;;  %v2361_v8 = vld [vmem:[#allocation4 + $0x80] sm:$0xff] }
  0xa1   :  { %2440 = vperm.xlu1 %10945, %v2360_v4   ;;  %2445 = vperm.xlu0 %10944, %v2361_v8  }
  0xa3   :  { %9625 = vmatmul.mubr.msk.f32.gmra.mxu1 %vm161_vm0, %v11254_v10  ;;  %9651 = vmatmul.mubr.msk.f32.gmra.mxu0 %vm161_vm0, %v11507_v55  ;;  %v2362_v10 = vld [vmem:[#allocation4 + $0x88] sm:$0xff] }
  0xa4   :  { %9627 = vmatprep.mubr.msk.f32.mxu1 %vm161_vm0, %v11266_v12  ;;  %9653 = vmatprep.mubr.msk.f32.mxu0 %vm161_vm0, %v11517_v57  ;;  %v842_v12 = vld [vmem:[%s13450_s0 + $0x96] sm:$0xff] }
  0xa5   :  { %2450 = vperm.xlu1 %10945, %v2362_v10  }
  0xa7   :  { %9628 = vmatmul.mubr.msk.f32.gmra.mxu1 %vm161_vm0, %v11289_v15  ;;  %9654 = vmatmul.mubr.msk.f32.gmra.mxu0 %vm161_vm0, %v11535_v61  ;;  %v843_v15 = vld [vmem:[%s13450_s0 + $0x9e] sm:$0xff] }
  0xa8   :  { %9630 = vmatprep.mubr.msk.f32.mxu1 %vm161_vm0, %v11302_v18  ;;  %9656 = vmatprep.mubr.msk.f32.mxu0 %vm161_vm0, %v11545_v63  ;;  %v1318_v18 = vld [vmem:[%s13450_s0 + $0x1a] sm:$0xff] }
  0xab   :  { %9631 = vmatmul.mubr.msk.f32.gmra.mxu1 %vm161_vm0, %v11320_v20  ;;  %9657 = vmatmul.mubr.msk.f32.gmra.mxu0 %vm161_vm0, %v11563_v5  ;;  %v1319_v20 = vld [vmem:[%s13450_s0 + $0x22] sm:$0xff] }
  0xac   :  { %9633 = vmatprep.mubr.msk.f32.mxu1 %vm161_vm0, %v842_v12  ;;  %9659 = vmatprep.mubr.msk.f32.mxu0 %vm161_vm0, %v11568_v6 }
  0xaf   :  { %9634 = vmatmul.mubr.msk.f32.gmra.mxu1 %vm161_vm0, %v843_v15  ;;  %9660 = vmatmul.mubr.msk.f32.gmra.mxu0 %vm161_vm0, %v11581_v22 }
  0xb0   :  { %9662 = vmatprep.mubr.msk.f32.mxu0 %vm161_vm0, %v1088_v17  ;;  %9667 = vmatprep.mubr.msk.f32.mxu1 %vm161_vm0, %v1318_v18 }
  0xb3   :  { %9663 = vmatmul.mubr.msk.f32.gmra.mxu0 %vm161_vm0, %v1089_v19  ;;  %9668 = vmatmul.mubr.msk.f32.vlgmr.msra.gmra.mxu1 %vm161_vm0, %v1319_v20 }
  0xb4   :  { %9670 = vmatprep.mubr.msk.f32.mxu1 %vm161_vm0, %v1320_v21  ;;  %9696 = vmatprep.mubr.msk.f32.mxu0 %vm161_vm0, %v11404_v36  ;;  %v1330_v36 = vld [vmem:[%s13450_s0 + $0x7a] sm:$0xff] }
  0xb5   :  { %9724 = vmatpush3.msra.mxu1 %v11590_v24  ;;  %v2536_v24 = vld [vmem:[#allocation2 + $0x6] sm:$0xff] }
  0xb7   :  { %9671 = vmatmul.mubr.msk.f32.gmra.mxu1 %vm161_vm0, %v1321_v23  ;;  %9697 = vmatmul.mubr.msk.f32.vlgmr.msra.gmra.mxu0 %vm161_vm0, %v11423_v38  ;;  %v1331_v38 = vld [vmem:[%s13450_s0 + $0x82] sm:$0xff] }
  0xb8   :  { %9753 = vmatpush3.msra.mxu0 %v11601_v7  ;;  %9673 = vmatprep.mubr.msk.f32.mxu1 %vm161_vm0, %v1322_v26 }
  0xb9   :  { %9699 = vmatprep.mubr.msk.f32.mxu0 %vm161_vm0, %v11433_v40  ;;  %v1332_v40 = vld [vmem:[%s13450_s0 + $0x8a] sm:$0xff] }
  0xbb   :  { %9674 = vmatmul.mubr.msk.f32.gmra.mxu1 %vm161_vm0, %v1323_v27  ;;  %9700 = vmatmul.mubr.msk.f32.gmra.mxu0 %vm161_vm0, %v11451_v42  ;;  %v1333_v42 = vld [vmem:[%s13450_s0 + $0x92] sm:$0xff] }
  0xbc   :  { %9676 = vmatprep.mubr.msk.f32.mxu1 %vm161_vm0, %v1324_v28  ;;  %9702 = vmatprep.mubr.msk.f32.mxu0 %vm161_vm0, %v11461_v44  ;;  %v1334_v44 = vld [vmem:[%s13450_s0 + $0x9a] sm:$0xff] }
  0xbf   :  { %9677 = vmatmul.mubr.msk.f32.gmra.mxu1 %vm161_vm0, %v1325_v29  ;;  %9703 = vmatmul.mubr.msk.f32.gmra.mxu0 %vm161_vm0, %v11479_v48  ;;  %v1581_v48 = vld [vmem:[%s13450_s0 + $0xb0] sm:$0xff] }
  0xc0   :  { %9679 = vmatprep.mubr.msk.f32.mxu1 %vm161_vm0, %v1326_v30  ;;  %9705 = vmatprep.mubr.msk.f32.mxu0 %vm161_vm0, %v11489_v50  ;;  %v2556_v50 = vld [vmem:[%s13454_s4 + $0x30] sm:$0xff] }
  0xc3   :  { %9680 = vmatmul.mubr.msk.f32.gmra.mxu1 %vm161_vm0, %v1327_v31  ;;  %9706 = vmatmul.mubr.msk.f32.gmra.mxu0 %vm161_vm0, %v11507_v55 }
  0xc4   :  { %9682 = vmatprep.mubr.msk.f32.mxu1 %vm161_vm0, %v1328_v32  ;;  %9708 = vmatprep.mubr.msk.f32.mxu0 %vm161_vm0, %v11517_v57 }
  0xc7   :  { %9683 = vmatmul.mubr.msk.f32.gmra.mxu1 %vm161_vm0, %v1329_v34  ;;  %9709 = vmatmul.mubr.msk.f32.gmra.mxu0 %vm161_vm0, %v11535_v61  ;;  %v2535_v61 = vld [vmem:[%s13454_s4 + $0x18] sm:$0xff] }
  0xc8   :  { %9685 = vmatprep.mubr.msk.f32.mxu1 %vm161_vm0, %v1330_v36  ;;  %9711 = vmatprep.mubr.msk.f32.mxu0 %vm161_vm0, %v11545_v63 }
  0xc9   :  { %9816 = vmatprep.subr.mxu0 %v2535_v61 }
  0xcb   :  { %9686 = vmatmul.mubr.msk.f32.gmra.mxu1 %vm161_vm0, %v1331_v38  ;;  %9712 = vmatmul.mubr.msk.f32.gmra.mxu0 %vm161_vm0, %v11563_v5  ;;  %v2533_v5 = vld [vmem:[%s13454_s4 + $0x8] sm:$0xff] }
  0xcc   :  { %9688 = vmatprep.mubr.msk.f32.mxu1 %vm161_vm0, %v1332_v40  ;;  %9714 = vmatprep.mubr.msk.f32.mxu0 %vm161_vm0, %v11568_v6 }
  0xcf   :  { %9689 = vmatmul.mubr.msk.f32.gmra.mxu1 %vm161_vm0, %v1333_v42  ;;  %9715 = vmatmul.mubr.msk.f32.gmra.mxu0 %vm161_vm0, %v11581_v22  ;;  %v2532_v22 = vld [vmem:[%s13454_s4] sm:$0xff] }
  0xd0   :  { %9691 = vmatprep.mubr.msk.f32.mxu1 %vm161_vm0, %v1334_v44  ;;  %9717 = vmatprep.mubr.msk.f32.mxu0 %vm161_vm0, %v1088_v17 }
  0xd3   :  { %9692 = vmatmul.mubr.msk.f32.gmra.mxu1 %vm161_vm0, %v1335_v45  ;;  %9718 = vmatmul.mubr.msk.f32.gmra.mxu0 %vm161_vm0, %v1089_v19 }
  0xd4   :  { %9720 = vmatprep.mubr.msk.f32.mxu0 %vm161_vm0, %v1580_v46  ;;  %9725 = vmatprep.mubr.msk.f32.mxu1 %vm161_vm0, %v1320_v21 }
  0xd7   :  { %9721 = vmatmul.mubr.msk.f32.gmra.mxu0 %vm161_vm0, %v1581_v48  ;;  %9726 = vmatmul.mubr.msk.f32.vlgmr.msra.gmra.mxu1 %vm161_vm0, %v1321_v23 }
  0xd8   :  { %9728 = vmatprep.mubr.msk.f32.mxu1 %vm161_vm0, %v1322_v26  ;;  %9754 = vmatprep.mubr.msk.f32.mxu0 %vm161_vm0, %v11387_v33  ;;  %v2069_v33 = vld [vmem:[%s13450_s0 + $0x94] sm:$0xff] }
  0xdb   :  { %9729 = vmatmul.mubr.msk.f32.gmra.mxu1 %vm161_vm0, %v1323_v27  ;;  %9755 = vmatmul.mubr.msk.f32.vlgmr.msra.gmra.mxu0 %vm161_vm0, %v11399_v35  ;;  %v1826_v35 = vld [vmem:[%s13450_s0 + $0xaa] sm:$0xff] }
  0xdc   :  { %9731 = vmatprep.mubr.msk.f32.mxu1 %vm161_vm0, %v1324_v28  ;;  %9757 = vmatprep.mubr.msk.f32.mxu0 %vm161_vm0, %v11418_v37  ;;  %v2070_v37 = vld [vmem:[%s13450_s0 + $0x9c] sm:$0xff] }
  0xdd   :  { %9817 = vmatpush3.msra.mxu0 %v2535_v61 }
  0xde   :  { %9818 = vmatprep.subr.mxu0 %v2534_v0 }
  0xdf   :  { %9732 = vmatmul.mubr.msk.f32.gmra.mxu1 %vm161_vm0, %v1325_v29  ;;  %9758 = vmatmul.mubr.msk.f32.gmra.mxu0 %vm161_vm0, %v11428_v39  ;;  %v1827_v39 = vld [vmem:[%s13450_s0 + $0xb2] sm:$0xff] }
  0xe0   :  { %9734 = vmatprep.mubr.msk.f32.mxu1 %vm161_vm0, %v1326_v30  ;;  %9760 = vmatprep.mubr.msk.f32.mxu0 %vm161_vm0, %v11446_v41  ;;  %v2071_v41 = vld [vmem:[%s13450_s0 + $0xa4] sm:$0xff]  ;;  %v2997_v29 = vld [vmem:[%s13454_s4 + $0x58] sm:$0xff] }
  0xe1   :  { %9819 = vmatpush3.msra.mxu0 %v2534_v0 }
  0xe2   :  { %9820 = vmatprep.subr.mxu0 %v2533_v5 }
  0xe3   :  { %9735 = vmatmul.mubr.msk.f32.gmra.mxu1 %vm161_vm0, %v1327_v31  ;;  %9761 = vmatmul.mubr.msk.f32.gmra.mxu0 %vm161_vm0, %v11456_v43  ;;  %v2072_v43 = vld [vmem:[%s13450_s0 + $0xac] sm:$0xff] }
  0xe4   :  { %9737 = vmatprep.mubr.msk.f32.mxu1 %vm161_vm0, %v1328_v32  ;;  %9763 = vmatprep.mubr.msk.f32.mxu0 %vm161_vm0, %v11474_v47  ;;  %v2073_v47 = vld [vmem:[%s13450_s0 + $0xb4] sm:$0xff] }
  0xe5   :  { %9821 = vmatpush3.msra.mxu0 %v2533_v5  ;;  %v2994_v5 = vld [vmem:[%s13454_s4 + $0x40] sm:$0xff] }
  0xe6   :  { %9822 = vmatprep.subr.mxu0 %v2532_v22 }
  0xe7   :  { %9738 = vmatmul.mubr.msk.f32.gmra.mxu1 %vm161_vm0, %v1329_v34  ;;  %9764 = vmatmul.mubr.msk.f32.gmra.mxu0 %vm161_vm0, %v11484_v49  ;;  %v2557_v49 = vld [vmem:[%s13454_s4 + $0x38] sm:$0xff] }
  0xe8   :  { %9740 = vmatprep.mubr.msk.f32.mxu1 %vm161_vm0, %v1330_v36  ;;  %9766 = vmatprep.mubr.msk.f32.mxu0 %vm161_vm0, %v11502_v54 }
  0xe9   :  { %9781 = vmatprep.subr.mxu1 %v2557_v49  ;;  %9823 = vmatpush3.msra.mxu0 %v2532_v22 }
  0xea   :  { %9782 = vmatpush3.msra.mxu1 %v2557_v49 }
  0xeb   :  { %9741 = vmatmul.mubr.msk.f32.gmra.mxu1 %vm161_vm0, %v1331_v38  ;;  %9767 = vmatmul.mubr.msk.f32.gmra.mxu0 %vm161_vm0, %v11512_v56 }
  0xec   :  { %9743 = vmatprep.mubr.msk.f32.mxu1 %vm161_vm0, %v1332_v40  ;;  %9769 = vmatprep.mubr.msk.f32.mxu0 %vm161_vm0, %v11530_v60 }
  0xed   :  { %9783 = vmatprep.subr.mxu1 %v2556_v50 }
  0xee   :  { %9784 = vmatpush3.msra.mxu1 %v2556_v50 }
  0xef   :  { %9744 = vmatmul.mubr.msk.f32.gmra.mxu1 %vm161_vm0, %v1333_v42  ;;  %9770 = vmatmul.mubr.msk.f32.gmra.mxu0 %vm161_vm0, %v11540_v62 }
  0xf0   :  { %9746 = vmatprep.mubr.msk.f32.mxu1 %vm161_vm0, %v1334_v44  ;;  %9772 = vmatprep.mubr.msk.f32.mxu0 %vm161_vm0, %v11558_v3 }
  0xf1   :  { %9785 = vmatprep.subr.mxu1 %v2555_v51 }
  0xf2   :  { %9786 = vmatpush3.msra.mxu1 %v2555_v51 }
  0xf3   :  { %9747 = vmatmul.mubr.msk.f32.gmra.mxu1 %vm161_vm0, %v1335_v45  ;;  %9773 = vmatmul.mubr.msk.f32.gmra.mxu0 %vm161_vm0, %v2069_v33  ;;  %v2996_v33 = vld [vmem:[%s13454_s4 + $0x50] sm:$0xff] }
  0xf4   :  { %9749 = vmatprep.mubr.msk.f32.mxu1 %vm161_vm0, %v1826_v35  ;;  %9775 = vmatprep.mubr.msk.f32.mxu0 %vm161_vm0, %v2070_v37 }
  0xf5   :  { %9787 = vmatprep.subr.mxu1 %v2554_v16 }
  0xf6   :  { %9788 = vmatpush3.msra.mxu1 %v2554_v16 }
  0xf7   :  { %9750 = vmatmul.mubr.msk.f32.gmra.mxu1 %vm161_vm0, %v1827_v39  ;;  %9776 = vmatmul.mubr.msk.f32.gmra.mxu0 %vm161_vm0, %v2071_v41 }
  0xf8   :  { %9778 = vmatprep.mubr.msk.f32.mxu0 %vm161_vm0, %v2072_v43  ;;  %9789 = vmatprep.mubr.msk.f32.mxu1 %vm2471_vm1, %v2536_v24  ;;  %v3246_v24 = vld [vmem:[%s13454_s4 + $0x78] sm:$0xff] }
  0xf9   :  { %9851 = vmatprep.subr.mxu1 %v2997_v29  ;;  %9886 = vmatprep.subr.mxu0 %v3246_v24 }
  0xfb   :  { %9779 = vmatmul.mubr.msk.f32.gmra.mxu0 %vm161_vm0, %v2073_v47  ;;  %9790 = vmatmul.mubr.msk.f32.vlgmr.msra.gmra.mxu1 %vm2471_vm1, %v2537_v11 }
  0xfc   :  { %9824 = vmatprep.mubr.msk.f32.mxu0 %vm2471_vm1, %v2514_v25  ;;  %9852 = vmatpush3.msra.mxu1 %v2997_v29  ;;  %v3245_v25 = vld [vmem:[%s13454_s4 + $0x70] sm:$0xff] }
  0xfd   :  { %9853 = vmatprep.subr.mxu1 %v2996_v33 }
  0xfe   :  { %9854 = vmatpush3.msra.mxu1 %v2996_v33 }
  0xff   :  { %9825 = vmatmul.mubr.msk.f32.vlgmr.msra.gmra.mxu0 %vm2471_vm1, %v2515_v2 }
 0x100   :  { %9887 = vmatpush3.msra.mxu0 %v3246_v24 }
 0x101   :  { %9888 = vmatprep.subr.mxu0 %v3245_v25 }
 0x102   :  { %9889 = vmatpush3.msra.mxu0 %v3245_v25 }
 0x11b   :  { %v11868_v52 = vpop.f32.mrf.mxu0  ;;  %v11870_v53 = vpop.f32.mrf.mxu1 }
 0x11d   :  { %v11872_v54 = vpop.f32.mrf.mxu0  ;;  %v11874_v55 = vpop.f32.mrf.mxu1 }
 0x11f   :  { %v11876_v56 = vpop.f32.mrf.mxu0  ;;  %v11878_v57 = vpop.f32.mrf.mxu1 }
 0x121   :  { %v11928_v59 = vpop.f32.mrf.mxu0  ;;  %v11930_v60 = vpop.f32.mrf.mxu1 }
 0x123   :  { %v9530_v62 = vpop.f32.mrf.mxu0  ;;  %v11935_v63 = vpop.f32.mrf.mxu1 }
 0x125   :  { %v11940_v1 = vpop.f32.mrf.mxu0  ;;  %v11942_v3 = vpop.f32.mrf.mxu1 }
 0x127   :  { %v9533_v6 = vpop.f32.mrf.mxu0  ;;  %v11947_v13 = vpop.f32.mrf.mxu1 }
 0x129   :  { %v11955_v7 = vpop.f32.mrf.mxu0  ;;  %v11957_v9 = vpop.f32.mrf.mxu1 }
 0x12b   :  { %v9536_v14 = vpop.f32.mrf.mxu0  ;;  %v9553_v4 = vpop.f32.mrf.mxu1 }
 0x12c   :  { %v497_v8 = vadd.f32 %v9553_v4, %v11868_v52 }
 0x12d   :  { %v11964_v10 = vpop.f32.mrf.mxu0  ;;  %v11966_v12 = vpop.f32.mrf.mxu1 }
 0x12f   :  { %v9556_v15 = vpop.f32.mrf.mxu1  ;;  %v9582_v17 = vpop.f32.mrf.mxu0 }
 0x130   :  { %v507_v18 = vadd.f32 %v9556_v15, %v11876_v56  ;;  %v11969_v19 = vadd.f32 %v9582_v17, %v497_v8  ;;  %v3244_v15 = vld [vmem:[%s13454_s4 + $0x68] sm:$0xff] }
 0x131   :  { %v11971_v20 = vpop.f32.mrf.mxu1  ;;  %v11973_v21 = vpop.f32.mrf.mxu0  ;;  %9890 = vmatprep.subr.mxu0 %v3244_v15 }
 0x132   :  { %9891 = vmatpush3.msra.mxu0 %v3244_v15 }
 0x133   :  { %v9559_v23 = vpop.f32.mrf.mxu1  ;;  %v9585_v26 = vpop.f32.mrf.mxu0 }
 0x134   :  { %v517_v27 = vadd.f32 %v9559_v23, %v9530_v62  ;;  %v11975_v28 = vadd.f32 %v9585_v26, %v507_v18  ;;  %v3243_v23 = vld [vmem:[%s13454_s4 + $0x60] sm:$0xff] }
 0x135   :  { %v11980_v30 = vpop.f32.mrf.mxu1  ;;  %v11982_v31 = vpop.f32.mrf.mxu0  ;;  %9892 = vmatprep.subr.mxu0 %v3243_v23 }
 0x136   :  { %9893 = vmatpush3.msra.mxu0 %v3243_v23 }
 0x137   :  { %v9562_v32 = vpop.f32.mrf.mxu1  ;;  %v9588_v34 = vpop.f32.mrf.mxu0 }
 0x138   :  { %v527_v36 = vadd.f32 %v9562_v32, %v9533_v6  ;;  %v11984_v38 = vadd.f32 %v9588_v34, %v517_v27  ;;  %v12047_v32 = vld [vmem:[%s13454_s4 + $0x98] sm:$0xff] }
 0x139   :  { %v11986_v40 = vpop.f32.mrf.mxu1  ;;  %v11988_v42 = vpop.f32.mrf.mxu0  ;;  %13465 = vst [vmem:[#allocation22_spill] sm:$0xff] %v12047_v32 }
 0x13b   :  { %v9565_v44 = vpop.f32.mrf.mxu1  ;;  %v9591_v45 = vpop.f32.mrf.mxu0 }
 0x13c   :  { %v537_v46 = vadd.f32 %v9565_v44, %v9536_v14  ;;  %v11990_v48 = vadd.f32 %v9591_v45, %v527_v36 }
 0x13d   :  { %v11995_v35 = vpop.f32.mrf.mxu1  ;;  %v11997_v37 = vpop.f32.mrf.mxu0 }
 0x13f   :  { %v9568_v39 = vpop.f32.mrf.mxu1  ;;  %v9594_v41 = vpop.f32.mrf.mxu0 }
 0x140   :  { %v547_v43 = vadd.f32 %v9568_v39, %v11870_v53  ;;  %v12000_v47 = vadd.f32 %v9594_v41, %v537_v46  ;;  %v2995_v53 = vld [vmem:[%s13454_s4 + $0x48] sm:$0xff] }
 0x141   :  { %v12002_v49 = vpop.f32.mrf.mxu1  ;;  %v12004_v50 = vpop.f32.mrf.mxu0  ;;  %9855 = vmatprep.subr.mxu1 %v2995_v53 }
 0x142   :  { %9856 = vmatpush3.msra.mxu1 %v2995_v53 }
 0x143   :  { %v9571_v51 = vpop.f32.mrf.mxu1  ;;  %v9597_v52 = vpop.f32.mrf.mxu0  ;;  %9857 = vmatprep.subr.mxu1 %v2994_v5 }
 0x144   :  { %v557_v56 = vadd.f32 %v9571_v51, %v11878_v57  ;;  %v12007_v61 = vadd.f32 %v9597_v52, %v547_v43  ;;  %9858 = vmatpush3.msra.mxu1 %v2994_v5 }
 0x145   :  { %v12009_v62 = vpop.f32.mrf.mxu1  ;;  %v12011_v0 = vpop.f32.mrf.mxu0  ;;  %9921 = vmatprep.subr.mxu1 %v12047_v32 }
 0x147   :  { %v9574_v6 = vpop.f32.mrf.mxu1  ;;  %v9600_v16 = vpop.f32.mrf.mxu0 }
 0x148   :  { %v567_v22 = vadd.f32 %v9574_v6, %v11935_v63  ;;  %v12020_v57 = vadd.f32 %v9600_v16, %v557_v56 }
 0x149   :  { %v12028_v11 = vpop.f32.mrf.mxu1  ;;  %v12030_v2 = vpop.f32.mrf.mxu0 }
 0x14b   :  { %v9577_v63 = vpop.f32.mrf.mxu1  ;;  %v9603_v14 = vpop.f32.mrf.mxu0 }
 0x14c   :  { %v577_v4 = vadd.f32 %v9577_v63, %v11947_v13  ;;  %v823_v8 = vadd.f32 %v9603_v14, %v567_v22 }
 0x14d   :  { %v12036_v17 = vpop.f32.mrf.mxu1  ;;  %v12038_v18 = vpop.f32.mrf.mxu0 }
 0x14f   :  { %v9606_v26 = vpop.f32.mrf.mxu0  ;;  %v9611_v27 = vpop.f32.mrf.mxu1 }
 0x150   :  { %v825_v13 = vadd.f32 %v9606_v26, %v577_v4  ;;  %v1055_v29 = vadd.f32 %v9611_v27, %v11969_v19 }
 0x151   :  { %v12049_v34 = vpop.f32.mrf.mxu0  ;;  %v12051_v36 = vpop.f32.mrf.mxu1 }
 0x153   :  { %v9614_v44 = vpop.f32.mrf.mxu1  ;;  %v9640_v45 = vpop.f32.mrf.mxu0 }
 0x154   :  { %v1057_v46 = vadd.f32 %v9614_v44, %v11975_v28  ;;  %v12055_v33 = vadd.f32 %v9640_v45, %v1055_v29 }
 0x155   :  { %v12057_v39 = vpop.f32.mrf.mxu1  ;;  %v12059_v19 = vpop.f32.mrf.mxu0 }
 0x157   :  { %v9617_v41 = vpop.f32.mrf.mxu1  ;;  %v9643_v43 = vpop.f32.mrf.mxu0 }
 0x158   :  { %v1059_v51 = vadd.f32 %v9617_v41, %v11984_v38  ;;  %v12062_v52 = vadd.f32 %v9643_v43, %v1057_v46 }
 0x159   :  { %v12064_v56 = vpop.f32.mrf.mxu1  ;;  %v12066_v53 = vpop.f32.mrf.mxu0 }
 0x15b   :  { %v9620_v5 = vpop.f32.mrf.mxu1  ;;  %v9646_v6 = vpop.f32.mrf.mxu0 }
 0x15c   :  { %v1061_v28 = vadd.f32 %v9620_v5, %v11990_v48  ;;  %v12069_v16 = vadd.f32 %v9646_v6, %v1059_v51 }
 0x15d   :  { %v12071_v22 = vpop.f32.mrf.mxu1  ;;  %v12073_v24 = vpop.f32.mrf.mxu0 }
 0x15f   :  { %v9623_v25 = vpop.f32.mrf.mxu1  ;;  %v9649_v63 = vpop.f32.mrf.mxu0 }
 0x160   :  { %v1063_v38 = vadd.f32 %v9623_v25, %v12000_v47  ;;  %v12076_v14 = vadd.f32 %v9649_v63, %v1061_v28  ;;  %v12101_v25 = vld [vmem:[%s13454_s4 + $0xb8] sm:$0xff] }
 0x161   :  { %v12078_v4 = vpop.f32.mrf.mxu1  ;;  %v12080_v15 = vpop.f32.mrf.mxu0  ;;  %13473 = vst [vmem:[#allocation30_spill] sm:$0xff] %v12101_v25  ;;  %9956 = vmatprep.subr.mxu0 %v12101_v25 }
 0x163   :  { %v9626_v23 = vpop.f32.mrf.mxu1  ;;  %v9652_v26 = vpop.f32.mrf.mxu0 }
 0x164   :  { %v1065_v48 = vadd.f32 %v9626_v23, %v12007_v61  ;;  %v12083_v27 = vadd.f32 %v9652_v26, %v1063_v38 }
 0x165   :  { %v12085_v29 = vpop.f32.mrf.mxu1  ;;  %v12087_v44 = vpop.f32.mrf.mxu0 }
 0x166   :  { %13466 = vst [vmem:[#allocation23_spill] sm:$0xff] %v12083_v27  ;;  %13467 = vst [vmem:[#allocation24_spill] sm:$0xff] %v12085_v29 }
 0x167   :  { %13468 = vst [vmem:[#allocation25_spill] sm:$0xff] %v12087_v44  ;;  %v9629_v45 = vpop.f32.mrf.mxu1  ;;  %v9655_v46 = vpop.f32.mrf.mxu0 }
 0x168   :  { %v1067_v47 = vadd.f32 %v9629_v45, %v12020_v57  ;;  %v12090_v41 = vadd.f32 %v9655_v46, %v1065_v48 }
 0x169   :  { %v12092_v43 = vpop.f32.mrf.mxu1  ;;  %v12094_v51 = vpop.f32.mrf.mxu0 }
 0x16a   :  { %13469 = vst [vmem:[#allocation26_spill] sm:$0xff] %v12090_v41  ;;  %13470 = vst [vmem:[#allocation27_spill] sm:$0xff] %v12092_v43 }
 0x16b   :  { %13471 = vst [vmem:[#allocation28_spill] sm:$0xff] %v12094_v51  ;;  %v9632_v5 = vpop.f32.mrf.mxu1  ;;  %v9658_v6 = vpop.f32.mrf.mxu0 }
 0x16c   :  { %v1069_v28 = vadd.f32 %v9632_v5, %v823_v8  ;;  %v12096_v61 = vadd.f32 %v9658_v6, %v1067_v47 }
 0x16d   :  { %v12103_v63 = vpop.f32.mrf.mxu1  ;;  %v12105_v38 = vpop.f32.mrf.mxu0 }
 0x16e   :  { %13472 = vst [vmem:[#allocation29_spill] sm:$0xff] %v12096_v61  ;;  %13474 = vst [vmem:[#allocation31_spill] sm:$0xff] %v12103_v63 }
 0x16f   :  { %13475 = vst [vmem:[#allocation32_spill] sm:$0xff] %v12105_v38  ;;  %v9635_v57 = vpop.f32.mrf.mxu1  ;;  %v9661_v23 = vpop.f32.mrf.mxu0 }
 0x170   :  { %v1071_v26 = vadd.f32 %v9635_v57, %v825_v13  ;;  %v12108_v48 = vadd.f32 %v9661_v23, %v1069_v28 }
 0x171   :  { %v12110_v45 = vpop.f32.mrf.mxu1  ;;  %v12112_v8 = vpop.f32.mrf.mxu0 }
 0x172   :  { %13476 = vst [vmem:[#allocation33_spill] sm:$0xff] %v12108_v48  ;;  %13477 = vst [vmem:[#allocation34_spill] sm:$0xff] %v12110_v45 }
 0x173   :  { %13478 = vst [vmem:[#allocation35_spill] sm:$0xff] %v12112_v8  ;;  %v9664_v46 = vpop.f32.mrf.mxu0  ;;  %v9669_v47 = vpop.f32.mrf.mxu1 }
 0x174   :  { %v12114_v5 = vadd.f32 %v9664_v46, %v1071_v26 }
 0x175   :  { %v12116_v6 = vpop.f32.mrf.mxu0  ;;  %v1457_v58 = vpop.f32.mrf.mxu1 }
 0x176   :  { %13479 = vst [vmem:[#allocation36_spill] sm:$0xff] %v12114_v5  ;;  %13480 = vst [vmem:[#allocation37_spill] sm:$0xff] %v12116_v6 }
 0x177   :  { %v9672_v32 = vpop.f32.mrf.mxu1  ;;  %v9698_v61 = vpop.f32.mrf.mxu0 }
 0x179   :  { %v12118_v38 = vpop.f32.mrf.mxu1  ;;  %v1703_v25 = vpop.f32.mrf.mxu0 }
 0x17b   :  { %v12120_v63 = vpop.f32.mrf.mxu1  ;;  %v12122_v13 = vpop.f32.mrf.mxu0 }
 0x17d   :  { %v12124_v28 = vpop.f32.mrf.mxu1  ;;  %v12126_v57 = vpop.f32.mrf.mxu0 }
 0x17f   :  { %v12128_v23 = vpop.f32.mrf.mxu1  ;;  %v12130_v26 = vpop.f32.mrf.mxu0 }
 0x181   :  { %v12132_v46 = vpop.f32.mrf.mxu1  ;;  %v12134_v5 = vpop.f32.mrf.mxu0 }
 0x182   :  { %13481 = vst [vmem:[#allocation38_spill] sm:$0xff] %v12132_v46 }
 0x183   :  { %v12136_v6 = vpop.f32.mrf.mxu1  ;;  %v12138_v8 = vpop.f32.mrf.mxu0 }
 0x184   :  { %13482 = vst [vmem:[#allocation39_spill] sm:$0xff] %v12136_v6  ;;  %13483 = vst [vmem:[#allocation40_spill] sm:$0xff] %v12138_v8 }
 0x185   :  { %v12140_v48 = vpop.f32.mrf.mxu1  ;;  %v12142_v45 = vpop.f32.mrf.mxu0 }
 0x186   :  { %13484 = vst [vmem:[#allocation41_spill] sm:$0xff] %v12140_v48 }
 0x187   :  { %v12144_v51 = vpop.f32.mrf.mxu1  ;;  %v12146_v41 = vpop.f32.mrf.mxu0 }
 0x188   :  { %13485 = vst [vmem:[#allocation42_spill] sm:$0xff] %v12144_v51  ;;  %13486 = vst [vmem:[#allocation43_spill] sm:$0xff] %v12146_v41  ;;  %v492_v51 = vadd.f32 %v11966_v12, %v11872_v54  ;;  %v12166_v41 = vpop.permute.xlu1 %2375 }
 0x189   :  { %v12148_v43 = vpop.f32.mrf.mxu1  ;;  %v12150_v27 = vpop.f32.mrf.mxu0 }
 0x18a   :  { %13487 = vst [vmem:[#allocation44_spill] sm:$0xff] %v12148_v43  ;;  %13488 = vst [vmem:[#allocation45_spill] sm:$0xff] %v12150_v27 }
 0x18b   :  { %v12152_v44 = vpop.f32.mrf.mxu1  ;;  %v12154_v46 = vpop.f32.mrf.mxu0 }
 0x18c   :  { %13489 = vst [vmem:[#allocation46_spill] sm:$0xff] %v12152_v44  ;;  %13490 = vst [vmem:[#allocation47_spill] sm:$0xff] %v12154_v46  ;;  %v808_v44 = vadd.f32 %v11973_v21, %v492_v51  ;;  %v12173_v46 = vpop.permute.xlu0 %2365  ;;  %v1547_v51 = vadd.f32 %v9669_v47, %v12055_v33 }
 0x18d   :  { %v12156_v29 = vpop.f32.mrf.mxu1  ;;  %v12158_v6 = vpop.f32.mrf.mxu0 }
 0x18e   :  { %13491 = vst [vmem:[#allocation48_spill] sm:$0xff] %v12156_v29  ;;  %13492 = vst [vmem:[#allocation49_spill] sm:$0xff] %v12158_v6 }
 0x18f   :  { %v12160_v8 = vpop.f32.mrf.mxu1  ;;  %v12162_v48 = vpop.f32.mrf.mxu0 }
 0x190   :  { %13493 = vst [vmem:[#allocation50_spill] sm:$0xff] %v12160_v8  ;;  %13494 = vst [vmem:[#allocation51_spill] sm:$0xff] %v12162_v48  ;;  %v1054_v8 = vadd.f32 %v12051_v36, %v808_v44  ;;  %v502_v48 = vadd.f32 %v11971_v20, %v11928_v59  ;;  %v522_v36 = vadd.f32 %v11986_v40, %v11955_v7 }
 0x191   :  { %v12168_v43 = vpop.f32.mrf.mxu1  ;;  %v12170_v27 = vpop.f32.mrf.mxu0  ;;  %v532_v59 = vadd.f32 %v11995_v35, %v11964_v10  ;;  %v552_v35 = vadd.f32 %v12009_v62, %v11930_v60 }
 0x192   :  { %13495 = vst [vmem:[#allocation52_spill] sm:$0xff] %v12168_v43  ;;  %13496 = vst [vmem:[#allocation53_spill] sm:$0xff] %v12170_v27  ;;  %v512_v43 = vadd.f32 %v11980_v30, %v11940_v1  ;;  %v1300_v21 = vadd.f32 %v12059_v19, %v1054_v8  ;;  %v12190_v27 = vpop.permute.xlu1 %2380  ;;  %v1793_v30 = vadd.f32 %v9698_v61, %v1547_v51  ;;  %v2371_v19 = vpop.permute.xlu0 %2370 }
 0x193   :  { %v12175_v29 = vpop.f32.mrf.mxu1  ;;  %v12177_v6 = vpop.f32.mrf.mxu0  ;;  %v814_v33 = vadd.f32 %v11997_v37, %v522_v36  ;;  %v542_v8 = vadd.f32 %v12002_v49, %v11874_v55  ;;  %v562_v37 = vadd.f32 %v12028_v11, %v11942_v3 }
 0x194   :  { %13497 = vst [vmem:[#allocation54_spill] sm:$0xff] %v12175_v29  ;;  %v810_v29 = vadd.f32 %v11982_v31, %v502_v48  ;;  %v1546_v1 = vadd.f32 %v1457_v58, %v1300_v21  ;;  %v816_v31 = vadd.f32 %v12004_v50, %v532_v59  ;;  %v820_v48 = vadd.f32 %v12030_v2, %v552_v35  ;;  %v13499_v35 = vld [vmem:[#allocation24_spill] sm:$0xff] }
 0x195   :  { %v12182_v54 = vpop.f32.mrf.mxu1  ;;  %v12184_v12 = vpop.f32.mrf.mxu0  ;;  %v818_v61 = vadd.f32 %v12011_v0, %v542_v8  ;;  %v572_v0 = vadd.f32 %v12036_v17, %v11957_v9  ;;  %v12224_v3 = vadd.f32 %v12038_v18, %v562_v37  ;;  %v1551_v2 = vadd.f32 %v12120_v63, %v12069_v16 }
 0x196   :  { %13498 = vst [vmem:[#allocation55_spill] sm:$0xff] %v12184_v12  ;;  %v812_v12 = vadd.f32 %v11988_v42, %v512_v43  ;;  %v1056_v7 = vadd.f32 %v12057_v39, %v810_v29  ;;  %v1549_v42 = vadd.f32 %v9672_v32, %v12062_v52  ;;  %v1792_v58 = vadd.f32 %v1703_v25, %v1546_v1  ;;  %v12215_v29 = vld [vmem:[#allocation7] ss:$0 sm:$0xff]  ;;  %v12219_v62 = vpop.permute.xlu1 %2390  ;;  %v12230_v47 = vpop.permute.xlu0 %2385 }
 0x197   :  { %v12197_v20 = vpop.f32.mrf.mxu0  ;;  %v9727_v44 = vpop.f32.mrf.mxu1  ;;  %v12234_v9 = vadd.f32 %v12049_v34, %v572_v0  ;;  %v1060_v17 = vadd.f32 %v12071_v22, %v814_v33  ;;  %v1797_v36 = vadd.f32 %v12130_v26, %v1551_v2  ;;  %v1553_v34 = vadd.f32 %v12128_v23, %v12076_v14  ;;  %v13505_v2 = vld [vmem:[#allocation27_spill] sm:$0xff] }
 0x198   :  { %v2039_v43 = vadd.f32 %v9727_v44, %v1793_v30  ;;  %v1058_v55 = vadd.f32 %v12064_v56, %v812_v12  ;;  %v1302_v49 = vadd.f32 %v12066_v53, %v1056_v7  ;;  %v1795_v60 = vadd.f32 %v12122_v13, %v1549_v42 }
 0x199   :  { %v12205_v40 = vpop.f32.mrf.mxu0  ;;  %v1949_v10 = vpop.f32.mrf.mxu1  ;;  %v1062_v44 = vadd.f32 %v12078_v4, %v816_v31  ;;  %v1064_v42 = vadd.f32 %v13499_v35, %v818_v61  ;;  %v13500_v4 = vld [vmem:[#allocation40_spill] sm:$0xff]  ;;  %v13504_v61 = vld [vmem:[#allocation39_spill] sm:$0xff] }
 0x19a   :  { %v2038_v32 = vadd.f32 %v1949_v10, %v1792_v58  ;;  %v1304_v11 = vadd.f32 %v12073_v24, %v1058_v55  ;;  %v1548_v56 = vadd.f32 %v12118_v38, %v1302_v49  ;;  %v12245_v33 = vpop.permute.xlu1 %2400  ;;  %v1306_v10 = vadd.f32 %v12080_v15, %v1060_v17  ;;  %v13501_v49 = vld [vmem:[#allocation25_spill] sm:$0xff] }
 0x19b   :  { %v9730_v50 = vpop.f32.mrf.mxu1  ;;  %v9756_v39 = vpop.f32.mrf.mxu0  ;;  %v1799_v31 = vadd.f32 %v13500_v4, %v1553_v34  ;;  %v13509_v34 = vld [vmem:[#allocation42_spill] sm:$0xff]  ;;  %v13511_v4 = vld [vmem:[#allocation28_spill] sm:$0xff] }
 0x19c   :  { %v2285_v52 = vadd.f32 %v9756_v39, %v2039_v43  ;;  %v2041_v13 = vadd.f32 %v9730_v50, %v1795_v60  ;;  %v1550_v18 = vadd.f32 %v12124_v28, %v1304_v11  ;;  %v1794_v24 = vadd.f32 %v12126_v57, %v1548_v56  ;;  %v13502_v39 = vld [vmem:[#allocation38_spill] sm:$0xff]  ;;  %v13503_v60 = vld [vmem:[#allocation23_spill] sm:$0xff] }
 0x19d   :  { %v1959_v53 = vpop.f32.mrf.mxu1  ;;  %v2195_v25 = vpop.f32.mrf.mxu0  ;;  %v1308_v50 = vadd.f32 %v13501_v49, %v1062_v44  ;;  %v1552_v15 = vadd.f32 %v13502_v39, %v1306_v10  ;;  %v13508_v44 = vld [vmem:[#allocation26_spill] sm:$0xff]  ;;  %v13514_v39 = vld [vmem:[#allocation32_spill] sm:$0xff] }
 0x19e   :  { %v2310_v12 = vadd.f32 %v12215_v29, %v2285_v52  ;;  %v2284_v21 = vadd.f32 %v2195_v25, %v2038_v32  ;;  %v1796_v1 = vadd.f32 %v12134_v5, %v1550_v18  ;;  %v2040_v22 = vadd.f32 %v1959_v53, %v1794_v24  ;;  %v12251_v5 = vpop.permute.xlu0 %2395 }
 0x19f   :  { %v9733_v38 = vpop.f32.mrf.mxu1  ;;  %v9759_v51 = vpop.f32.mrf.mxu0  ;;  %v1555_v32 = vadd.f32 %v13504_v61, %v13503_v60  ;;  %v1798_v17 = vadd.f32 %v12142_v45, %v1552_v15  ;;  %v13516_v61 = vld [vmem:[#allocation29_spill] sm:$0xff] }
 0x1a0   :  { %v2328_v16 = vmax.f32 %v2310_v12, 0.0  ;;  %v2309_v63 = vadd.f32 %v12215_v29, %v2284_v21  ;;  %v2287_v59 = vadd.f32 %v9759_v51, %v2041_v13  ;;  %v2043_v7 = vadd.f32 %v9733_v38, %v1797_v36  ;;  %v13506_v12 = vld [vmem:[#allocation41_spill] sm:$0xff]  ;;  %v13507_v51 = vld [vmem:[#allocation43_spill] sm:$0xff] }
 0x1a1   :  { %v1969_v30 = vpop.f32.mrf.mxu1  ;;  %v2205_v28 = vpop.f32.mrf.mxu0  ;;  %v1066_v13 = vadd.f32 %v13505_v2, %v820_v48  ;;  %v1554_v21 = vadd.f32 %v13506_v12, %v1308_v50  ;;  %v1801_v36 = vadd.f32 %v13507_v51, %v1555_v32  ;;  %v1557_v48 = vadd.f32 %v13509_v34, %v13508_v44  ;;  %v13520_v51 = vld [vmem:[#allocation49_spill] sm:$0xff] }
 0x1a2   :  { %v2454_v57 = vmul.f32 %v2371_v19, %v2328_v16  ;;  %v2327_v8 = vmax.f32 %v2309_v63, 0.0  ;;  %v2312_v26 = vadd.f32 %v12215_v29, %v2287_v59  ;;  %v2286_v58 = vadd.f32 %v2205_v28, %v2040_v22  ;;  %v12267_v16 = vpop.permute.xlu1 %2410 }
 0x1a3   :  { %v9736_v14 = vpop.f32.mrf.mxu1  ;;  %v9762_v23 = vpop.f32.mrf.mxu0  ;;  %v2042_v37 = vadd.f32 %v1969_v30, %v1796_v1  ;;  %v13510_v1 = vld [vmem:[#allocation45_spill] sm:$0xff]  ;;  %v1312_v15 = vadd.f32 %v13514_v39, %v1066_v13 }
 0x1a4   :  { %2497 = vst.msk [vmem:[#allocation2 + $0x20] sm:$0xff] %vm2471_vm1, %v2454_v57  ;;  %v2453_v43 = vmul.f32 %v12173_v46, %v2327_v8  ;;  %v2330_v19 = vmax.f32 %v2312_v26, 0.0  ;;  %v2289_v55 = vadd.f32 %v9762_v23, %v2043_v7  ;;  %v2311_v52 = vadd.f32 %v12215_v29, %v2286_v58  ;;  %v12275_v8 = vpop.permute.xlu0 %2405  ;;  %v13512_v58 = vld [vmem:[#allocation31_spill] sm:$0xff] }
 0x1a5   :  { %v1979_v0 = vpop.f32.mrf.mxu1  ;;  %v2215_v11 = vpop.f32.mrf.mxu0  ;;  %v2045_v53 = vadd.f32 %v9736_v14, %v1799_v31  ;;  %v1800_v22 = vadd.f32 %v13510_v1, %v1554_v21  ;;  %v1310_v31 = vadd.f32 %v13511_v4, %v1064_v42  ;;  %v1068_v14 = vadd.f32 %v13512_v58, %v12224_v3  ;;  %v13513_v23 = vld [vmem:[#allocation47_spill] sm:$0xff]  ;;  %v13515_v42 = vld [vmem:[#allocation44_spill] sm:$0xff]  ;;  %v13517_v3 = vld [vmem:[#allocation46_spill] sm:$0xff] }
 0x1a6   :  { %2496 = vst.msk [vmem:[#allocation2 + $0x18] sm:$0xff] %vm2471_vm1, %v2453_v43  ;;  %v2456_v56 = vmul.f32 %v12190_v27, %v2330_v19  ;;  %v2314_v46 = vadd.f32 %v12215_v29, %v2289_v55  ;;  %v2288_v25 = vadd.f32 %v2215_v11, %v2042_v37  ;;  %v2329_v18 = vmax.f32 %v2311_v52, 0.0 }
 0x1a7   :  { %v9739_v24 = vpop.f32.mrf.mxu1  ;;  %v9765_v38 = vpop.f32.mrf.mxu0  ;;  %v2044_v30 = vadd.f32 %v1979_v0, %v1798_v17  ;;  %v1803_v43 = vadd.f32 %v13513_v23, %v1557_v48  ;;  %v1556_v60 = vadd.f32 %v13515_v42, %v1310_v31  ;;  %v1559_v32 = vadd.f32 %v13517_v3, %v13516_v61  ;;  %v13518_v17 = vld [vmem:[#allocation34_spill] sm:$0xff]  ;;  %v13527_v3 = vld [vmem:[#allocation52_spill] sm:$0xff] }
 0x1a8   :  { %2499 = vst.msk [vmem:[#allocation2 + $0x30] sm:$0xff] %vm2471_vm1, %v2456_v56  ;;  %v2332_v27 = vmax.f32 %v2314_v46, 0.0  ;;  %v2313_v63 = vadd.f32 %v12215_v29, %v2288_v25  ;;  %v2291_v59 = vadd.f32 %v9765_v38, %v2045_v53  ;;  %v2455_v45 = vmul.f32 %v12166_v41, %v2329_v18  ;;  %v12310_v34 = vpop.permute.xlu0 %2415 }
 0x1a9   :  { %v1989_v28 = vpop.f32.mrf.mxu1  ;;  %v2225_v57 = vpop.f32.mrf.mxu0  ;;  %v2047_v10 = vadd.f32 %v9739_v24, %v1801_v36  ;;  %v1070_v18 = vadd.f32 %v13518_v17, %v12234_v9  ;;  %v13519_v24 = vld [vmem:[#allocation48_spill] sm:$0xff]  ;;  %v1802_v36 = vadd.f32 %v13520_v51, %v1556_v60  ;;  %v13526_v60 = vld [vmem:[#allocation37_spill] sm:$0xff] }
 0x1aa   :  { %v2458_v7 = vmul.f32 %v12219_v62, %v2332_v27  ;;  %v2331_v26 = vmax.f32 %v2313_v63, 0.0  ;;  %v2316_v35 = vadd.f32 %v12215_v29, %v2291_v59  ;;  %2498 = vst.msk [vmem:[#allocation2 + $0x28] sm:$0xff] %vm2471_vm1, %v2455_v45  ;;  %v2290_v41 = vadd.f32 %v2225_v57, %v2044_v30  ;;  %v13521_v59 = vld [vmem:[#allocation51_spill] sm:$0xff]  ;;  %v13523_v45 = vld [vmem:[#allocation50_spill] sm:$0xff] }
 0x1ab   :  { %v9742_v19 = vpop.f32.mrf.mxu1  ;;  %v9768_v37 = vpop.f32.mrf.mxu0  ;;  %v2046_v49 = vadd.f32 %v1989_v28, %v1800_v22  ;;  %v1558_v38 = vadd.f32 %v13519_v24, %v1312_v15  ;;  %v1805_v44 = vadd.f32 %v13521_v59, %v1559_v32  ;;  %v13522_v22 = vld [vmem:[#allocation33_spill] sm:$0xff]  ;;  %v1316_v61 = vadd.f32 %v13526_v60, %v1070_v18 }
 0x1ac   :  { %2501 = vst.msk [vmem:[#allocation2 + $0x40] sm:$0xff] %vm2471_vm1, %v2458_v7  ;;  %v2457_v62 = vmul.f32 %v12230_v47, %v2331_v26  ;;  %v2334_v55 = vmax.f32 %v2316_v35, 0.0  ;;  %v2293_v50 = vadd.f32 %v9768_v37, %v2047_v10  ;;  %v2315_v52 = vadd.f32 %v12215_v29, %v2290_v41  ;;  %v12295_v47 = vpop.permute.xlu1 %2420  ;;  %v13524_v28 = vld [vmem:[#allocation53_spill] sm:$0xff]  ;;  %v13525_v37 = vld [vmem:[#allocation35_spill] sm:$0xff] }
 0x1ad   :  { %v1999_v0 = vpop.f32.mrf.mxu1  ;;  %v2235_v11 = vpop.f32.mrf.mxu0  ;;  %v12291_v56 = vld [vmem:[#allocation2 + $0x16] sm:$0xff]  ;;  %v12293_v46 = vld [vmem:[#allocation2 + $0x1e] sm:$0xff]  ;;  %v2049_v2 = vadd.f32 %v9742_v19, %v1803_v43  ;;  %v1561_v30 = vadd.f32 %v13523_v45, %v13522_v22  ;;  %v1804_v57 = vadd.f32 %v13524_v28, %v1558_v38 }
 0x1ae   :  { %v2516_v53 = vld [vmem:[#allocation2 + $0x14] sm:$0xff]  ;;  %2500 = vst.msk [vmem:[#allocation2 + $0x38] sm:$0xff] %vm2471_vm1, %v2457_v62  ;;  %v2460_v25 = vmul.f32 %v12245_v33, %v2334_v55  ;;  %v2318_v13 = vadd.f32 %v12215_v29, %v2293_v50  ;;  %v2292_v12 = vadd.f32 %v2235_v11, %v2046_v49  ;;  %9792 = vmatprep.mubr.msk.f32.mxu1 %vm2471_vm1, %v12291_v56  ;;  %v2517_v21 = vld [vmem:[#allocation2 + $0x1c] sm:$0xff]  ;;  %v2333_v27 = vmax.f32 %v2315_v52, 0.0 }
 0x1af   :  { %9827 = vmatprep.mubr.msk.f32.mxu0 %vm2471_vm1, %v2516_v53  ;;  %v9745_v63 = vpop.f32.mrf.mxu1  ;;  %v9771_v33 = vpop.f32.mrf.mxu0  ;;  %9793 = vmatmul.mubr.msk.f32.gmra.mxu1 %vm2471_vm1, %v12293_v46  ;;  %v2048_v26 = vadd.f32 %v1999_v0, %v1802_v36  ;;  %v1314_v62 = vadd.f32 %v13525_v37, %v1068_v14  ;;  %v1807_v55 = vadd.f32 %v12177_v6, %v1561_v30  ;;  %v13528_v52 = vld [vmem:[#allocation36_spill] sm:$0xff]  ;;  %v13529_v0 = vld [vmem:[#allocation54_spill] sm:$0xff] }
 0x1b0   :  { %2503 = vst.msk [vmem:[#allocation2 + $0x50] sm:$0xff] %vm2471_vm1, %v2460_v25  ;;  %v2336_v48 = vmax.f32 %v2318_v13, 0.0  ;;  %v2317_v9 = vadd.f32 %v12215_v29, %v2292_v12  ;;  %v2295_v1 = vadd.f32 %v9771_v33, %v2049_v2  ;;  %9828 = vmatmul.mubr.msk.f32.gmra.mxu0 %vm2471_vm1, %v2517_v21  ;;  %v2459_v7 = vmul.f32 %v12251_v5, %v2333_v27  ;;  %v2431_v39 = vpop.permute.xlu1 %2430  ;;  %v2426_v21 = vpop.permute.xlu0 %2425  ;;  %v13530_v27 = vld [vmem:[#allocation55_spill] sm:$0xff] }
 0x1b1   :  { %v2009_v10 = vpop.f32.mrf.mxu1  ;;  %v2245_v35 = vpop.f32.mrf.mxu0  ;;  %v2051_v58 = vadd.f32 %v9745_v63, %v1805_v44  ;;  %v12321_v43 = vld [vmem:[#allocation2 + $0x26] sm:$0xff]  ;;  %v12323_v19 = vld [vmem:[#allocation2 + $0x2e] sm:$0xff]  ;;  %v1560_v32 = vadd.f32 %v13527_v3, %v1314_v62  ;;  %v1563_v11 = vadd.f32 %v13529_v0, %v13528_v52  ;;  %v1562_v36 = vadd.f32 %v12182_v54, %v1316_v61 }
 0x1b2   :  { %v2462_v4 = vmul.f32 %v12267_v16, %v2336_v48  ;;  %v2335_v31 = vmax.f32 %v2317_v9, 0.0  ;;  %v2320_v23 = vadd.f32 %v12215_v29, %v2295_v1  ;;  %v2518_v41 = vld [vmem:[#allocation2 + $0x24] sm:$0xff]  ;;  %2502 = vst.msk [vmem:[#allocation2 + $0x48] sm:$0xff] %vm2471_vm1, %v2459_v7  ;;  %v2294_v5 = vadd.f32 %v2245_v35, %v2048_v26  ;;  %9795 = vmatprep.mubr.msk.f32.mxu1 %vm2471_vm1, %v12321_v43  ;;  %v12331_v50 = vld [vmem:[#allocation2 + $0x2c] sm:$0xff] }
 0x1b3   :  { %9830 = vmatprep.mubr.msk.f32.mxu0 %vm2471_vm1, %v2518_v41  ;;  %v9748_v16 = vpop.f32.mrf.mxu1  ;;  %v9774_v49 = vpop.f32.mrf.mxu0  ;;  %v2050_v42 = vadd.f32 %v2009_v10, %v1804_v57  ;;  %9796 = vmatmul.mubr.msk.f32.gmra.mxu1 %vm2471_vm1, %v12323_v19  ;;  %v1806_v63 = vadd.f32 %v13530_v27, %v1560_v32  ;;  %v1808_v54 = vadd.f32 %v12205_v40, %v1562_v36 }
 0x1b4   :  { %2505 = vst.msk [vmem:[#allocation2 + $0x60] sm:$0xff] %vm2471_vm1, %v2462_v4  ;;  %v2461_v15 = vmul.f32 %v12275_v8, %v2335_v31  ;;  %v2338_v14 = vmax.f32 %v2320_v23, 0.0  ;;  %v2297_v6 = vadd.f32 %v9774_v49, %v2051_v58  ;;  %9831 = vmatmul.mubr.msk.f32.gmra.mxu0 %vm2471_vm1, %v12331_v50  ;;  %v2319_v53 = vadd.f32 %v12215_v29, %v2294_v5  ;;  %v2441_v31 = vpop.permute.xlu1 %2440 }
 0x1b5   :  { %v2019_v25 = vpop.f32.mrf.mxu1  ;;  %v2255_v8 = vpop.f32.mrf.mxu0  ;;  %v12344_v2 = vld [vmem:[#allocation2 + $0x36] sm:$0xff]  ;;  %v12348_v12 = vld [vmem:[#allocation2 + $0x3e] sm:$0xff]  ;;  %v2053_v18 = vadd.f32 %v9748_v16, %v1807_v55 }
 0x1b6   :  { %v12346_v13 = vld [vmem:[#allocation2 + $0x34] sm:$0xff]  ;;  %2504 = vst.msk [vmem:[#allocation2 + $0x58] sm:$0xff] %vm2471_vm1, %v2461_v15  ;;  %v2464_v17 = vmul.f32 %v12295_v47, %v2338_v14  ;;  %v2322_v24 = vadd.f32 %v12215_v29, %v2297_v6  ;;  %v2296_v38 = vadd.f32 %v2255_v8, %v2050_v42  ;;  %9798 = vmatprep.mubr.msk.f32.mxu1 %vm2471_vm1, %v12344_v2  ;;  %v12355_v51 = vld [vmem:[#allocation2 + $0x3c] sm:$0xff]  ;;  %v2337_v33 = vmax.f32 %v2319_v53, 0.0  ;;  %v2436_v55 = vpop.permute.xlu0 %2435 }
 0x1b7   :  { %9833 = vmatprep.mubr.msk.f32.mxu0 %vm2471_vm1, %v12346_v13  ;;  %v9751_v59 = vpop.f32.mrf.mxu1  ;;  %v9777_v44 = vpop.f32.mrf.mxu0  ;;  %v1809_v47 = vadd.f32 %v12197_v20, %v1563_v11  ;;  %9799 = vmatmul.mubr.msk.f32.gmra.mxu1 %vm2471_vm1, %v12348_v12  ;;  %v2052_v45 = vadd.f32 %v2019_v25, %v1806_v63  ;;  %v2976_v63 = vld [vmem:[#allocation2 + $0x8] sm:$0xff] }
 0x1b8   :  { %2507 = vst.msk [vmem:[#allocation2 + $0x70] sm:$0xff] %vm2471_vm1, %v2464_v17  ;;  %v2340_v48 = vmax.f32 %v2322_v24, 0.0  ;;  %v2321_v9 = vadd.f32 %v12215_v29, %v2296_v38  ;;  %v2299_v1 = vadd.f32 %v9777_v44, %v2053_v18  ;;  %9834 = vmatmul.mubr.msk.f32.gmra.mxu0 %vm2471_vm1, %v12355_v51  ;;  %v2463_v22 = vmul.f32 %v12310_v34, %v2337_v33  ;;  %v2451_v52 = vpop.permute.xlu1 %2450 }
 0x1b9   :  { %v2029_v30 = vpop.f32.mrf.mxu1  ;;  %v2265_v28 = vpop.f32.mrf.mxu0  ;;  %v2055_v7 = vadd.f32 %v9751_v59, %v1809_v47  ;;  %v12371_v10 = vld [vmem:[#allocation2 + $0x46] sm:$0xff]  ;;  %v12375_v4 = vld [vmem:[#allocation2 + $0x4e] sm:$0xff] }
 0x1ba   :  { %v2466_v20 = vmul.f32 %v2431_v39, %v2340_v48  ;;  %v2339_v57 = vmax.f32 %v2321_v9, 0.0  ;;  %v2324_v26 = vadd.f32 %v12215_v29, %v2299_v1  ;;  %v12373_v35 = vld [vmem:[#allocation2 + $0x44] sm:$0xff]  ;;  %2506 = vst.msk [vmem:[#allocation2 + $0x68] sm:$0xff] %vm2471_vm1, %v2463_v22  ;;  %v2298_v40 = vadd.f32 %v2265_v28, %v2052_v45  ;;  %9801 = vmatprep.mubr.msk.f32.mxu1 %vm2471_vm1, %v12371_v10  ;;  %v12382_v58 = vld [vmem:[#allocation2 + $0x4c] sm:$0xff]  ;;  %v2446_v17 = vpop.permute.xlu0 %2445  ;;  %v12467_v9 = vld [vmem:[#allocation2 + $0x18] sm:$0xff] }
 0x1bb   :  { %9836 = vmatprep.mubr.msk.f32.mxu0 %vm2471_vm1, %v12373_v35  ;;  %v9780_v34 = vpop.f32.mrf.mxu0  ;;  %v2054_v37 = vadd.f32 %v2029_v30, %v1808_v54  ;;  %9802 = vmatmul.mubr.msk.f32.gmra.mxu1 %vm2471_vm1, %v12375_v4  ;;  %v2977_v48 = vld [vmem:[#allocation2 + $0x10] sm:$0xff]  ;;  %v12487_v45 = vld [vmem:[#allocation2 + $0x28] sm:$0xff] }
 0x1bc   :  { %2509 = vst.msk [vmem:[#allocation2 + $0x80] sm:$0xff] %vm2471_vm1, %v2466_v20  ;;  %v2465_v23 = vmul.f32 %v2426_v21, %v2339_v57  ;;  %v2342_v41 = vmax.f32 %v2324_v26, 0.0  ;;  %v2301_v62 = vadd.f32 %v9780_v34, %v2055_v7  ;;  %9837 = vmatmul.mubr.msk.f32.gmra.mxu0 %vm2471_vm1, %v12382_v58  ;;  %v2323_v5 = vadd.f32 %v12215_v29, %v2298_v40  ;;  %v3494_v1 = vld [vmem:[%s13454_s4 + $0x90] sm:$0xff]  ;;  %v3742_v30 = vld [vmem:[%s13454_s4 + $0xa8] sm:$0xff]  ;;  %v3492_v20 = vld [vmem:[%s13454_s4 + $0x80] sm:$0xff] }
 0x1bd   :  { %v2275_v16 = vpop.f32.mrf.mxu0  ;;  %v12390_v49 = vld [vmem:[#allocation2 + $0x56] sm:$0xff]  ;;  %v12394_v15 = vld [vmem:[#allocation2 + $0x5e] sm:$0xff]  ;;  %v13532_v22 = vld [vmem:[#allocation30_spill] sm:$0xff] }
 0x1be   :  { %v12392_v39 = vld [vmem:[#allocation2 + $0x54] sm:$0xff]  ;;  %2508 = vst.msk [vmem:[#allocation2 + $0x78] sm:$0xff] %vm2471_vm1, %v2465_v23  ;;  %v2468_v14 = vmul.f32 %v2441_v31, %v2342_v41  ;;  %v2326_v42 = vadd.f32 %v12215_v29, %v2301_v62  ;;  %v2300_v6 = vadd.f32 %v2275_v16, %v2054_v37  ;;  %9804 = vmatprep.mubr.msk.f32.mxu1 %vm2471_vm1, %v12390_v49  ;;  %v12402_v60 = vld [vmem:[#allocation2 + $0x5c] sm:$0xff]  ;;  %v2341_v61 = vmax.f32 %v2323_v5, 0.0  ;;  %v9791_v37 = vpop.f32.mrf.mxu1 }
 0x1bf   :  { %9839 = vmatprep.mubr.msk.f32.mxu0 %vm2471_vm1, %v12392_v39  ;;  %9805 = vmatmul.mubr.msk.f32.gmra.mxu1 %vm2471_vm1, %v12394_v15  ;;  %v3743_v54 = vld [vmem:[%s13454_s4 + $0xb0] sm:$0xff]  ;;  %v12517_v57 = vld [vmem:[#allocation2 + $0x40] sm:$0xff]  ;;  %v3993_v7 = vld [vmem:[%s13454_s4 + $0xd8] sm:$0xff]  ;;  %v9826_v62 = vpop.f32.mrf.mxu0 }
 0x1c0   :  { %2511 = vst.msk [vmem:[#allocation2 + $0x90] sm:$0xff] %vm2471_vm1, %v2468_v14  ;;  %v2344_v3 = vmax.f32 %v2326_v42, 0.0  ;;  %v2325_v32 = vadd.f32 %v12215_v29, %v2300_v6  ;;  %9840 = vmatmul.mubr.msk.f32.gmra.mxu0 %vm2471_vm1, %v12402_v60  ;;  %v2467_v0 = vmul.f32 %v2436_v55, %v2341_v61  ;;  %v12499_v28 = vld [vmem:[#allocation2 + $0x30] sm:$0xff]  ;;  %v4242_v26 = vld [vmem:[%s13454_s4 + $0xf8] sm:$0xff]  ;;  %v12547_v31 = vld [vmem:[#allocation2 + $0x60] sm:$0xff] }
 0x1c1   :  { %v12410_v25 = vld [vmem:[#allocation2 + $0x66] sm:$0xff]  ;;  %v12414_v21 = vld [vmem:[#allocation2 + $0x6e] sm:$0xff] }
 0x1c2   :  { %v2470_v11 = vmul.f32 %v2451_v52, %v2344_v3  ;;  %v2343_v53 = vmax.f32 %v2325_v32, 0.0  ;;  %v12412_v8 = vld [vmem:[#allocation2 + $0x64] sm:$0xff]  ;;  %2510 = vst.msk [vmem:[#allocation2 + $0x88] sm:$0xff] %vm2471_vm1, %v2467_v0  ;;  %9807 = vmatprep.mubr.msk.f32.mxu1 %vm2471_vm1, %v12410_v25  ;;  %v12421_v29 = vld [vmem:[#allocation2 + $0x6c] sm:$0xff]  ;;  %v12611_v32 = vld [vmem:[#allocation2 + $0x3a] sm:$0xff] }
 0x1c3   :  { %9842 = vmatprep.mubr.msk.f32.mxu0 %vm2471_vm1, %v12412_v8  ;;  %9808 = vmatmul.mubr.msk.f32.gmra.mxu1 %vm2471_vm1, %v12414_v21  ;;  %v12553_v40 = vld [vmem:[#allocation2 + $0x68] sm:$0xff]  ;;  %v12559_v34 = vld [vmem:[#allocation2 + $0x70] sm:$0xff]  ;;  %v12571_v41 = vld [vmem:[#allocation2 + $0x80] sm:$0xff] }
 0x1c4   :  { %2513 = vst.msk [vmem:[#allocation2 + $0xa0] sm:$0xff] %vm2471_vm1, %v2470_v11  ;;  %v2469_v18 = vmul.f32 %v2446_v17, %v2343_v53  ;;  %9843 = vmatmul.mubr.msk.f32.gmra.mxu0 %vm2471_vm1, %v12421_v29  ;;  %v3724_v14 = vld [vmem:[#allocation2 + $0x22] sm:$0xff]  ;;  %v12593_v42 = vld [vmem:[#allocation2 + $0x2a] sm:$0xff]  ;;  %v12605_v3 = vld [vmem:[#allocation2 + $0x32] sm:$0xff] }
 0x1c5   :  { %v12428_v24 = vld [vmem:[#allocation2 + $0x76] sm:$0xff]  ;;  %v12432_v36 = vld [vmem:[#allocation2 + $0x7e] sm:$0xff]  ;;  %v3991_v52 = vld [vmem:[%s13454_s4 + $0xc8] sm:$0xff] }
 0x1c6   :  { %v12430_v38 = vld [vmem:[#allocation2 + $0x74] sm:$0xff]  ;;  %2512 = vst.msk [vmem:[#allocation2 + $0x98] sm:$0xff] %vm2471_vm1, %v2469_v18  ;;  %9810 = vmatprep.mubr.msk.f32.mxu1 %vm2471_vm1, %v12428_v24  ;;  %v12439_v27 = vld [vmem:[#allocation2 + $0x7c] sm:$0xff]  ;;  %v4240_v0 = vld [vmem:[%s13454_s4 + $0xe8] sm:$0xff] }
 0x1c7   :  { %9845 = vmatprep.mubr.msk.f32.mxu0 %vm2471_vm1, %v12430_v38  ;;  %9811 = vmatmul.mubr.msk.f32.gmra.mxu1 %vm2471_vm1, %v12432_v36  ;;  %v12565_v23 = vld [vmem:[#allocation2 + $0x78] sm:$0xff]  ;;  %v12582_v16 = vld [vmem:[#allocation2 + $0x90] sm:$0xff]  ;;  %v12623_v11 = vld [vmem:[#allocation2 + $0x42] sm:$0xff] }
 0x1c8   :  { %9846 = vmatmul.mubr.msk.f32.gmra.mxu0 %vm2471_vm1, %v12439_v27  ;;  %v3992_v6 = vld [vmem:[%s13454_s4 + $0xd0] sm:$0xff]  ;;  %v3731_v18 = vld [vmem:[#allocation2 + $0x5a] sm:$0xff] }
 0x1c9   :  { %v12445_v33 = vld [vmem:[#allocation2 + $0x86] sm:$0xff]  ;;  %v12449_v44 = vld [vmem:[#allocation2 + $0x8e] sm:$0xff] }
 0x1ca   :  { %v12447_v59 = vld [vmem:[#allocation2 + $0x84] sm:$0xff]  ;;  %9813 = vmatprep.mubr.msk.f32.mxu1 %vm2471_vm1, %v12445_v33  ;;  %v12455_v47 = vld [vmem:[#allocation2 + $0x8c] sm:$0xff] }
 0x1cb   :  { %9848 = vmatprep.mubr.msk.f32.mxu0 %vm2471_vm1, %v12447_v59  ;;  %9814 = vmatmul.mubr.msk.f32.gmra.mxu1 %vm2471_vm1, %v12449_v44  ;;  %v12577_v55 = vld [vmem:[#allocation2 + $0x88] sm:$0xff]  ;;  %v4241_v61 = vld [vmem:[%s13454_s4 + $0xf0] sm:$0xff] }
 0x1cc   :  { %9849 = vmatmul.mubr.msk.f32.gmra.mxu0 %vm2471_vm1, %v12455_v47  ;;  %9859 = vmatprep.mubr.msk.f32.mxu1 %vm2471_vm1, %v2976_v63  ;;  %v3729_v53 = vld [vmem:[#allocation2 + $0x4a] sm:$0xff]  ;;  %v3730_v17 = vld [vmem:[#allocation2 + $0x52] sm:$0xff]  ;;  %v13533_v63 = vmov 0.0  }
 0x1cd   :  { %9894 = vmatprep.mubr.msk.f32.mxu0 %vm2471_vm1, %v12291_v56  ;;  %v13531_v56 = vld [vmem:[#allocation22_spill] sm:$0xff]  ;;  %v3241_v5 = vld [vmem:[#allocation2 + $0x96] sm:$0xff] }
 0x1ce   :  { %v4796_v62 = vld [vmem:[#allocation10 + $0x68] sm:$0xff] }
 0x1cf   :  { %9860 = vmatmul.mubr.msk.f32.vlgmr.msra.gmra.mxu1 %vm2471_vm1, %v2977_v48  ;;  %v3735_v48 = vld [vmem:[#allocation2 + $0x7a] sm:$0xff] }
 0x1d0   :  { %9895 = vmatmul.mubr.msk.f32.vlgmr.msra.gmra.mxu0 %vm2471_vm1, %v12293_v46  ;;  %9862 = vmatprep.mubr.msk.f32.mxu1 %vm2471_vm1, %v12467_v9  ;;  %v12481_v46 = vld [vmem:[#allocation2 + $0x20] sm:$0xff] }
 0x1d1   :  { %9897 = vmatprep.mubr.msk.f32.mxu0 %vm2471_vm1, %v12321_v43  ;;  %9922 = vmatpush3.msra.mxu1 %v13531_v56  ;;  %v3493_v43 = vld [vmem:[%s13454_s4 + $0x88] sm:$0xff]  ;;  %v3490_v56 = vld [vmem:[#allocation2 + $0x98] sm:$0xff] }
 0x1d2   :  { %9957 = vmatpush3.msra.mxu0 %v13532_v22  ;;  %9923 = vmatprep.subr.mxu1 %v3494_v1  ;;  %v3739_v22 = vld [vmem:[#allocation2 + $0x9a] sm:$0xff] }
 0x1d3   :  { %9958 = vmatprep.subr.mxu0 %v3743_v54  ;;  %9863 = vmatmul.mubr.msk.f32.gmra.mxu1 %vm2471_vm1, %v12481_v46 }
 0x1d4   :  { %9898 = vmatmul.mubr.msk.f32.gmra.mxu0 %vm2471_vm1, %v12323_v19  ;;  %9865 = vmatprep.mubr.msk.f32.mxu1 %vm2471_vm1, %v12487_v45  ;;  %v12505_v19 = vld [vmem:[#allocation2 + $0x38] sm:$0xff] }
 0x1d5   :  { %9900 = vmatprep.mubr.msk.f32.mxu0 %vm2471_vm1, %v12344_v2  ;;  %9924 = vmatpush3.msra.mxu1 %v3494_v1  ;;  %v3741_v2 = vld [vmem:[%s13454_s4 + $0xa0] sm:$0xff]  ;;  %v3737_v1 = vld [vmem:[#allocation2 + $0x8a] sm:$0xff] }
 0x1d6   :  { %9959 = vmatpush3.msra.mxu0 %v3743_v54  ;;  %9925 = vmatprep.subr.mxu1 %v3493_v43  ;;  %v3738_v54 = vld [vmem:[#allocation2 + $0x92] sm:$0xff] }
 0x1d7   :  { %9960 = vmatprep.subr.mxu0 %v3742_v30  ;;  %9866 = vmatmul.mubr.msk.f32.gmra.mxu1 %vm2471_vm1, %v12499_v28 }
 0x1d8   :  { %9901 = vmatmul.mubr.msk.f32.gmra.mxu0 %vm2471_vm1, %v12348_v12  ;;  %9868 = vmatprep.mubr.msk.f32.mxu1 %vm2471_vm1, %v12505_v19  ;;  %v12523_v12 = vld [vmem:[#allocation2 + $0x48] sm:$0xff] }
 0x1d9   :  { %9903 = vmatprep.mubr.msk.f32.mxu0 %vm2471_vm1, %v12371_v10  ;;  %9926 = vmatpush3.msra.mxu1 %v3493_v43  ;;  %v12535_v10 = vld [vmem:[#allocation2 + $0x50] sm:$0xff]  ;;  %v3740_v43 = vld [vmem:[#allocation2 + $0xa2] sm:$0xff] }
 0x1da   :  { %9961 = vmatpush3.msra.mxu0 %v3742_v30  ;;  %9927 = vmatprep.subr.mxu1 %v3492_v20  ;;  %v4490_v30 = vld [vmem:[%s13454_s4 + $0x110] sm:$0xff] }
 0x1db   :  { %9962 = vmatprep.subr.mxu0 %v3741_v2  ;;  %9869 = vmatmul.mubr.msk.f32.gmra.mxu1 %vm2471_vm1, %v12517_v57 }
 0x1dc   :  { %9904 = vmatmul.mubr.msk.f32.gmra.mxu0 %vm2471_vm1, %v12375_v4  ;;  %9871 = vmatprep.mubr.msk.f32.mxu1 %vm2471_vm1, %v12523_v12  ;;  %v12541_v4 = vld [vmem:[#allocation2 + $0x58] sm:$0xff] }
 0x1dd   :  { %9906 = vmatprep.mubr.msk.f32.mxu0 %vm2471_vm1, %v12390_v49  ;;  %9928 = vmatpush3.msra.mxu1 %v3492_v20  ;;  %v3242_v49 = vld [vmem:[#allocation2 + $0x9e] sm:$0xff]  ;;  %v4237_v20 = vld [vmem:[#allocation2 + $0xaa] sm:$0xff] }
 0x1de   :  { %9963 = vmatpush3.msra.mxu0 %v3741_v2  ;;  %9991 = vmatprep.subr.mxu1 %v3993_v7  ;;  %v3989_v2 = vld [vmem:[#allocation2 + $0xb0] sm:$0xff] }
 0x1df   :  { %10026 = vmatprep.subr.mxu0 %v4242_v26  ;;  %9872 = vmatmul.mubr.msk.f32.gmra.mxu1 %vm2471_vm1, %v12535_v10 }
 0x1e0   :  { %9907 = vmatmul.mubr.msk.f32.gmra.mxu0 %vm2471_vm1, %v12394_v15  ;;  %9874 = vmatprep.mubr.msk.f32.mxu1 %vm2471_vm1, %v12541_v4  ;;  %v3723_v15 = vld [vmem:[#allocation2 + $0x1a] sm:$0xff] }
 0x1e1   :  { %9909 = vmatprep.mubr.msk.f32.mxu0 %vm2471_vm1, %v12410_v25  ;;  %v3990_v25 = vld [vmem:[%s13454_s4 + $0xc0] sm:$0xff] }
 0x1e3   :  { %9875 = vmatmul.mubr.msk.f32.gmra.mxu1 %vm2471_vm1, %v12547_v31 }
 0x1e4   :  { %9910 = vmatmul.mubr.msk.f32.gmra.mxu0 %vm2471_vm1, %v12414_v21  ;;  %9877 = vmatprep.mubr.msk.f32.mxu1 %vm2471_vm1, %v12553_v40  ;;  %v4239_v21 = vld [vmem:[%s13454_s4 + $0xe0] sm:$0xff] }
 0x1e5   :  { %9912 = vmatprep.mubr.msk.f32.mxu0 %vm2471_vm1, %v12428_v24  ;;  %v4491_v24 = vld [vmem:[%s13454_s4 + $0x118] sm:$0xff] }
 0x1e7   :  { %9878 = vmatmul.mubr.msk.f32.gmra.mxu1 %vm2471_vm1, %v12559_v34 }
 0x1e8   :  { %9913 = vmatmul.mubr.msk.f32.gmra.mxu0 %vm2471_vm1, %v12432_v36  ;;  %9880 = vmatprep.mubr.msk.f32.mxu1 %vm2471_vm1, %v12565_v23  ;;  %v3732_v36 = vld [vmem:[#allocation2 + $0x62] sm:$0xff] }
 0x1e9   :  { %9915 = vmatprep.mubr.msk.f32.mxu0 %vm2471_vm1, %v12445_v33  ;;  %v3733_v33 = vld [vmem:[#allocation2 + $0x6a] sm:$0xff] }
 0x1eb   :  { %9881 = vmatmul.mubr.msk.f32.gmra.mxu1 %vm2471_vm1, %v12571_v41 }
 0x1ec   :  { %9916 = vmatmul.mubr.msk.f32.gmra.mxu0 %vm2471_vm1, %v12449_v44  ;;  %9883 = vmatprep.mubr.msk.f32.mxu1 %vm2471_vm1, %v12577_v55  ;;  %v3734_v44 = vld [vmem:[#allocation2 + $0x72] sm:$0xff] }
 0x1ed   :  { %9918 = vmatprep.mubr.msk.f32.mxu0 %vm2471_vm1, %v3241_v5 }
 0x1ef   :  { %9884 = vmatmul.mubr.msk.f32.gmra.mxu1 %vm2471_vm1, %v12582_v16 }
 0x1f0   :  { %9919 = vmatmul.mubr.msk.f32.gmra.mxu0 %vm2471_vm1, %v3242_v49  ;;  %9929 = vmatprep.mubr.msk.f32.mxu1 %vm2471_vm1, %v12467_v9  ;;  %v3736_v9 = vld [vmem:[#allocation2 + $0x82] sm:$0xff] }
 0x1f1   :  { %9964 = vmatprep.mubr.msk.f32.mxu0 %vm2471_vm1, %v3723_v15 }
 0x1f3   :  { %9930 = vmatmul.mubr.msk.f32.vlgmr.msra.gmra.mxu1 %vm2471_vm1, %v12481_v46  ;;  %v3491_v46 = vld [vmem:[#allocation2 + $0xa0] sm:$0xff] }
 0x1f4   :  { %9965 = vmatmul.mubr.msk.f32.vlgmr.msra.gmra.mxu0 %vm2471_vm1, %v3724_v14  ;;  %9932 = vmatprep.mubr.msk.f32.mxu1 %vm2471_vm1, %v12487_v45 }
 0x1f5   :  { %9967 = vmatprep.mubr.msk.f32.mxu0 %vm2471_vm1, %v12593_v42  ;;  %9992 = vmatpush3.msra.mxu1 %v3993_v7 }
 0x1f6   :  { %10027 = vmatpush3.msra.mxu0 %v4242_v26  ;;  %9993 = vmatprep.subr.mxu1 %v3992_v6 }
 0x1f7   :  { %10028 = vmatprep.subr.mxu0 %v4241_v61  ;;  %9933 = vmatmul.mubr.msk.f32.gmra.mxu1 %vm2471_vm1, %v12499_v28 }
 0x1f8   :  { %9968 = vmatmul.mubr.msk.f32.gmra.mxu0 %vm2471_vm1, %v12605_v3  ;;  %9935 = vmatprep.mubr.msk.f32.mxu1 %vm2471_vm1, %v12505_v19 }
 0x1f9   :  { %9970 = vmatprep.mubr.msk.f32.mxu0 %vm2471_vm1, %v12611_v32  ;;  %9994 = vmatpush3.msra.mxu1 %v3992_v6 }
 0x1fa   :  { %10029 = vmatpush3.msra.mxu0 %v4241_v61  ;;  %9995 = vmatprep.subr.mxu1 %v3991_v52 }
 0x1fb   :  { %10030 = vmatprep.subr.mxu0 %v4240_v0  ;;  %9936 = vmatmul.mubr.msk.f32.gmra.mxu1 %vm2471_vm1, %v12517_v57 }
 0x1fc   :  { %9971 = vmatmul.mubr.msk.f32.gmra.mxu0 %vm2471_vm1, %v12623_v11  ;;  %9938 = vmatprep.mubr.msk.f32.mxu1 %vm2471_vm1, %v12523_v12 }
 0x1fd   :  { %9973 = vmatprep.mubr.msk.f32.mxu0 %vm2471_vm1, %v3729_v53  ;;  %9996 = vmatpush3.msra.mxu1 %v3991_v52 }
 0x1fe   :  { %10031 = vmatpush3.msra.mxu0 %v4240_v0  ;;  %9997 = vmatprep.subr.mxu1 %v3990_v25 }
 0x1ff   :  { %10032 = vmatprep.subr.mxu0 %v4239_v21  ;;  %9939 = vmatmul.mubr.msk.f32.gmra.mxu1 %vm2471_vm1, %v12535_v10 }
 0x200   :  { %9974 = vmatmul.mubr.msk.f32.gmra.mxu0 %vm2471_vm1, %v3730_v17  ;;  %9941 = vmatprep.mubr.msk.f32.mxu1 %vm2471_vm1, %v12541_v4 }
 0x201   :  { %9976 = vmatprep.mubr.msk.f32.mxu0 %vm2471_vm1, %v3731_v18  ;;  %9998 = vmatpush3.msra.mxu1 %v3990_v25 }
 0x202   :  { %10033 = vmatpush3.msra.mxu0 %v4239_v21  ;;  %10061 = vmatprep.subr.mxu1 %v4491_v24 }
 0x203   :  { %10096 = vmatprep.subr.mxu0 %v13533_v63  ;;  %9942 = vmatmul.mubr.msk.f32.gmra.mxu1 %vm2471_vm1, %v12547_v31 }
 0x204   :  { %9977 = vmatmul.mubr.msk.f32.gmra.mxu0 %vm2471_vm1, %v3732_v36  ;;  %9944 = vmatprep.mubr.msk.f32.mxu1 %vm2471_vm1, %v12553_v40 }
 0x205   :  { %9979 = vmatprep.mubr.msk.f32.mxu0 %vm2471_vm1, %v3733_v33 }
 0x207   :  { %9945 = vmatmul.mubr.msk.f32.gmra.mxu1 %vm2471_vm1, %v12559_v34 }
 0x208   :  { %9980 = vmatmul.mubr.msk.f32.gmra.mxu0 %vm2471_vm1, %v3734_v44  ;;  %9947 = vmatprep.mubr.msk.f32.mxu1 %vm2471_vm1, %v12565_v23 }
 0x209   :  { %9982 = vmatprep.mubr.msk.f32.mxu0 %vm2471_vm1, %v3735_v48 }
 0x20b   :  { %9948 = vmatmul.mubr.msk.f32.gmra.mxu1 %vm2471_vm1, %v12571_v41 }
 0x20c   :  { %9983 = vmatmul.mubr.msk.f32.gmra.mxu0 %vm2471_vm1, %v3736_v9  ;;  %9950 = vmatprep.mubr.msk.f32.mxu1 %vm2471_vm1, %v12577_v55 }
 0x20d   :  { %9985 = vmatprep.mubr.msk.f32.mxu0 %vm2471_vm1, %v3737_v1 }
 0x20f   :  { %9951 = vmatmul.mubr.msk.f32.gmra.mxu1 %vm2471_vm1, %v12582_v16 }
 0x210   :  { %9986 = vmatmul.mubr.msk.f32.gmra.mxu0 %vm2471_vm1, %v3738_v54  ;;  %9953 = vmatprep.mubr.msk.f32.mxu1 %vm2471_vm1, %v3490_v56 }
 0x211   :  { %9988 = vmatprep.mubr.msk.f32.mxu0 %vm2471_vm1, %v3739_v22 }
 0x213   :  { %9954 = vmatmul.mubr.msk.f32.gmra.mxu1 %vm2471_vm1, %v3491_v46 }
 0x214   :  { %9989 = vmatmul.mubr.msk.f32.gmra.mxu0 %vm2471_vm1, %v3740_v43  ;;  %9999 = vmatprep.mubr.msk.f32.mxu1 %vm2471_vm1, %v12487_v45  ;;  %v4489_v45 = vld [vmem:[%s13454_s4 + $0x108] sm:$0xff] }
 0x215   :  { %10034 = vmatprep.mubr.msk.f32.mxu0 %vm2471_vm1, %v12593_v42 }
 0x217   :  { %10000 = vmatmul.mubr.msk.f32.vlgmr.msra.gmra.mxu1 %vm2471_vm1, %v12499_v28  ;;  %v4488_v28 = vld [vmem:[%s13454_s4 + $0x100] sm:$0xff]  ;;  %s11128_s4 = smov [#allocation16]  }
 0x218   :  { %10035 = vmatmul.mubr.msk.f32.vlgmr.msra.gmra.mxu0 %vm2471_vm1, %v12605_v3  ;;  %10002 = vmatprep.mubr.msk.f32.mxu1 %vm2471_vm1, %v12505_v19  ;;  %v3988_v19 = vld [vmem:[#allocation2 + $0xa8] sm:$0xff]  ;;  %s8374_s6 = sshll.u32 %s11128_s4, 4  ;;  %s8375_s6 = int_to_ptr.vmem [resolvable:$true] %s8374_s6 }
 0x219   :  { %10037 = vmatprep.mubr.msk.f32.mxu0 %vm2471_vm1, %v12611_v32  ;;  %10062 = vmatpush3.msra.mxu1 %v4491_v24  ;;  %s11086_s15 = scalar_lea.vmem %s8375_s6, 32  ;;  %p11091_p8 = scmp.lt.s32.totalorder %s8375_s6, %s8375_s6 }
 0x21a   :  { %10063 = vmatprep.subr.mxu1 %v4490_v30  ;;  %p11087_p7 = scmp.ne.s32.totalorder %s8375_s6, %s11086_s15  ;;  %p11092_p9 = scmp.lt.s32.totalorder %s11086_s15, %s11086_s15 }
 0x21b   :  { %10003 = vmatmul.mubr.msk.f32.gmra.mxu1 %vm2471_vm1, %v12517_v57  ;;  %v4238_v57 = vld [vmem:[#allocation2 + $0xb2] sm:$0xff] }
 0x21c   :  { %10038 = vmatmul.mubr.msk.f32.gmra.mxu0 %vm2471_vm1, %v12623_v11  ;;  %10005 = vmatprep.mubr.msk.f32.mxu1 %vm2471_vm1, %v12523_v12  ;;  %v4789_v12 = vld [vmem:[#allocation10 + $0x38] sm:$0xff]  ;;  %v4795_v11 = vld [vmem:[#allocation10 + $0x60] sm:$0xff]  ;;  %p11093_p10 = por %p11092_p9, %p11091_p8 }
 0x21d   :  { %10040 = vmatprep.mubr.msk.f32.mxu0 %vm2471_vm1, %v3729_v53  ;;  %10064 = vmatpush3.msra.mxu1 %v4490_v30 }
 0x21e   :  { %10065 = vmatprep.subr.mxu1 %v4489_v45  ;;  %p11094_p11 = pnand %p11093_p10, %p11087_p7 }
 0x21f   :  { %10006 = vmatmul.mubr.msk.f32.gmra.mxu1 %vm2471_vm1, %v12535_v10 }
 0x220   :  { %10041 = vmatmul.mubr.msk.f32.gmra.mxu0 %vm2471_vm1, %v3730_v17  ;;  %10008 = vmatprep.mubr.msk.f32.mxu1 %vm2471_vm1, %v12541_v4  ;;  %v4797_v4 = vld [vmem:[#allocation10 + $0x70] sm:$0xff]  ;;  %v4786_v17 = vld [vmem:[#allocation10 + $0x20] sm:$0xff] }
 0x221   :  { %10043 = vmatprep.mubr.msk.f32.mxu0 %vm2471_vm1, %v3731_v18  ;;  %10066 = vmatpush3.msra.mxu1 %v4489_v45 }
 0x222   :  { %10067 = vmatprep.subr.mxu1 %v4488_v28 }
 0x223   :  { %10009 = vmatmul.mubr.msk.f32.gmra.mxu1 %vm2471_vm1, %v12547_v31 }
 0x224   :  { %10044 = vmatmul.mubr.msk.f32.gmra.mxu0 %vm2471_vm1, %v3732_v36  ;;  %10011 = vmatprep.mubr.msk.f32.mxu1 %vm2471_vm1, %v12553_v40  ;;  %v4794_v36 = vld [vmem:[#allocation10 + $0x58] sm:$0xff] }
 0x225   :  { %10046 = vmatprep.mubr.msk.f32.mxu0 %vm2471_vm1, %v3733_v33  ;;  %10068 = vmatpush3.msra.mxu1 %v4488_v28  ;;  %v4792_v28 = vld [vmem:[#allocation10 + $0x48] sm:$0xff] }
 0x226   :  { %10115 = vmatprep.subr.mxu1 %v13533_v63 }
 0x227   :  { %10012 = vmatmul.mubr.msk.f32.gmra.mxu1 %vm2471_vm1, %v12559_v34  ;;  %v4788_v34 = vld [vmem:[#allocation10 + $0x30] sm:$0xff] }
 0x228   :  { %10047 = vmatmul.mubr.msk.f32.gmra.mxu0 %vm2471_vm1, %v3734_v44  ;;  %10014 = vmatprep.mubr.msk.f32.mxu1 %vm2471_vm1, %v12565_v23 }
 0x229   :  { %10049 = vmatprep.mubr.msk.f32.mxu0 %vm2471_vm1, %v3735_v48 }
 0x22b   :  { %10015 = vmatmul.mubr.msk.f32.gmra.mxu1 %vm2471_vm1, %v12571_v41 }
 0x22c   :  { %10050 = vmatmul.mubr.msk.f32.gmra.mxu0 %vm2471_vm1, %v3736_v9  ;;  %10017 = vmatprep.mubr.msk.f32.mxu1 %vm2471_vm1, %v12577_v55  ;;  %v4787_v55 = vld [vmem:[#allocation10 + $0x28] sm:$0xff]  ;;  %v4785_v9 = vld [vmem:[#allocation10 + $0x18] sm:$0xff] }
 0x22d   :  { %10052 = vmatprep.mubr.msk.f32.mxu0 %vm2471_vm1, %v3737_v1 }
 0x22f   :  { %10018 = vmatmul.mubr.msk.f32.gmra.mxu1 %vm2471_vm1, %v12582_v16 }
 0x230   :  { %10053 = vmatmul.mubr.msk.f32.gmra.mxu0 %vm2471_vm1, %v3738_v54  ;;  %10020 = vmatprep.mubr.msk.f32.mxu1 %vm2471_vm1, %v3490_v56  ;;  %v4793_v56 = vld [vmem:[#allocation10 + $0x50] sm:$0xff] }
 0x231   :  { %10055 = vmatprep.mubr.msk.f32.mxu0 %vm2471_vm1, %v3739_v22 }
 0x233   :  { %10021 = vmatmul.mubr.msk.f32.gmra.mxu1 %vm2471_vm1, %v3491_v46 }
 0x234   :  { %10056 = vmatmul.mubr.msk.f32.gmra.mxu0 %vm2471_vm1, %v3740_v43  ;;  %10023 = vmatprep.mubr.msk.f32.mxu1 %vm2471_vm1, %v3988_v19  ;;  %v4784_v43 = vld [vmem:[#allocation10 + $0x10] sm:$0xff]  ;;  %v4783_v19 = vld [vmem:[#allocation10 + $0x8] sm:$0xff] }
 0x235   :  { %10058 = vmatprep.mubr.msk.f32.mxu0 %vm2471_vm1, %v4237_v20 }
 0x237   :  { %10024 = vmatmul.mubr.msk.f32.gmra.mxu1 %vm2471_vm1, %v3989_v2 }
 0x238   :  { %10059 = vmatmul.mubr.msk.f32.gmra.mxu0 %vm2471_vm1, %v4238_v57  ;;  %10069 = vmatprep.mubr.msk.f32.mxu1 %vm2471_vm1, %v12331_v50  ;;  %v4483_v50 = vld [vmem:[#allocation2 + $0x94] sm:$0xff]  ;;  %v4791_v57 = vld [vmem:[#allocation10 + $0x40] sm:$0xff] }
 0x239   :  { %10112 = vmatprep.mubr.msk.f32.mxu0 %vm11127_vm2, %v13533_v63 }
 0x23b   :  { %10070 = vmatmul.mubr.msk.f32.vlgmr.msra.gmra.mxu1 %vm2471_vm1, %v12346_v13  ;;  %v4484_v13 = vld [vmem:[#allocation2 + $0x9c] sm:$0xff] }
 0x23c   :  { %10072 = vmatprep.mubr.msk.f32.mxu1 %vm2471_vm1, %v12355_v51  ;;  %v4486_v51 = vld [vmem:[#allocation2 + $0xac] sm:$0xff]  ;;  %10116 = vmatpush3.msra.mxu1 %v4789_v12 }
 0x23d   :  { %10117 = vmatprep.subr.mxu1 %v13533_v63 }
 0x23e   :  { %10118 = vmatpush3.msra.mxu1 %v4788_v34 }
 0x23f   :  { %10073 = vmatmul.mubr.msk.f32.gmra.mxu1 %vm2471_vm1, %v12373_v35  ;;  %v4485_v35 = vld [vmem:[#allocation2 + $0xa4] sm:$0xff]  ;;  %10119 = vmatprep.subr.mxu1 %v13533_v63 }
 0x240   :  { %10075 = vmatprep.mubr.msk.f32.mxu1 %vm2471_vm1, %v12382_v58  ;;  %v4487_v58 = vld [vmem:[#allocation2 + $0xb4] sm:$0xff]  ;;  %10120 = vmatpush3.msra.mxu1 %v4787_v55 }
 0x241   :  { %10121 = vmatprep.subr.mxu1 %v13533_v63 }
 0x242   :  { %10122 = vmatpush3.msra.mxu1 %v4786_v17 }
 0x243   :  { %10076 = vmatmul.mubr.msk.f32.gmra.mxu1 %vm2471_vm1, %v12392_v39  ;;  %v2678_v39 = vpop.f32.mrf.mxu1  ;;  %10123 = vmatprep.subr.mxu1 %v13533_v63 }
 0x244   :  { %10078 = vmatprep.mubr.msk.f32.mxu1 %vm2471_vm1, %v12402_v60  ;;  %v2887_v60 = vpop.f32.mrf.mxu0  ;;  %10124 = vmatpush3.msra.mxu1 %v4785_v9 }
 0x245   :  { %10125 = vmatprep.subr.mxu1 %v13533_v63 }
 0x246   :  { %10126 = vmatpush3.msra.mxu1 %v4784_v43 }
 0x247   :  { %10079 = vmatmul.mubr.msk.f32.gmra.mxu1 %vm2471_vm1, %v12412_v8  ;;  %10127 = vmatprep.subr.mxu1 %v13533_v63 }
 0x248   :  { %10081 = vmatprep.mubr.msk.f32.mxu1 %vm2471_vm1, %v12421_v29  ;;  %10128 = vmatpush3.msra.mxu1 %v4783_v19 }
 0x249   :  { %10129 = vmatprep.subr.mxu1 %v13533_v63 }
 0x24b   :  { %10082 = vmatmul.mubr.msk.f32.gmra.mxu1 %vm2471_vm1, %v12430_v38 }
 0x24c   :  { %10084 = vmatprep.mubr.msk.f32.mxu1 %vm2471_vm1, %v12439_v27 }
 0x24f   :  { %10085 = vmatmul.mubr.msk.f32.gmra.mxu1 %vm2471_vm1, %v12447_v59  ;;  %v4798_v59 = vld [vmem:[#allocation10 + $0x78] sm:$0xff] }
 0x250   :  { %10087 = vmatprep.mubr.msk.f32.mxu1 %vm2471_vm1, %v12455_v47  ;;  %10097 = vmatpush3.msra.mxu0 %v4798_v59 }
 0x251   :  { %10098 = vmatprep.subr.mxu0 %v13533_v63 }
 0x252   :  { %10099 = vmatpush3.msra.mxu0 %v4797_v4 }
 0x253   :  { %10088 = vmatmul.mubr.msk.f32.gmra.mxu1 %vm2471_vm1, %v4483_v50  ;;  %10100 = vmatprep.subr.mxu0 %v13533_v63  ;;  %v4782_v50 = vld [vmem:[#allocation10] sm:$0xff] }
 0x254   :  { %10090 = vmatprep.mubr.msk.f32.mxu1 %vm2471_vm1, %v4484_v13  ;;  %10101 = vmatpush3.msra.mxu0 %v4796_v62 }
 0x255   :  { %10102 = vmatprep.subr.mxu0 %v13533_v63  ;;  %10130 = vmatpush3.msra.mxu1 %v4782_v50 }
 0x256   :  { %10103 = vmatpush3.msra.mxu0 %v4795_v11  ;;  %10153 = vmatprep.subr.mxu1 %v13533_v63 }
 0x257   :  { %10091 = vmatmul.mubr.msk.f32.gmra.mxu1 %vm2471_vm1, %v4485_v35  ;;  %10104 = vmatprep.subr.mxu0 %v13533_v63 }
 0x258   :  { %10093 = vmatprep.mubr.msk.f32.mxu1 %vm2471_vm1, %v4486_v51  ;;  %10105 = vmatpush3.msra.mxu0 %v4794_v36 }
 0x259   :  { %10106 = vmatprep.subr.mxu0 %v13533_v63 }
 0x25a   :  { %10107 = vmatpush3.msra.mxu0 %v4793_v56 }
 0x25b   :  { %10094 = vmatmul.mubr.msk.f32.gmra.mxu1 %vm2471_vm1, %v4487_v58  ;;  %10108 = vmatprep.subr.mxu0 %v13533_v63 }
 0x25c   :  { %10109 = vmatpush3.msra.mxu0 %v4792_v28  ;;  %10131 = vmatprep.mubr.msk.f32.mxu1 %vm11127_vm2, %v13533_v63 }
 0x25d   :  { %10110 = vmatprep.subr.mxu0 %v13533_v63 }
 0x25e   :  { %10111 = vmatpush3.msra.mxu0 %v4791_v57 }
 0x25f   :  { %10134 = vmatprep.subr.mxu0 %v13533_v63 }
 0x26f   :  { %v9794_v8 = vpop.f32.mrf.mxu1 }
 0x270   :  { %v9829_v29 = vpop.f32.mrf.mxu0 }
 0x271   :  { %v12768_v38 = vadd.f32 %v9829_v29, %v9794_v8  ;;  %v12770_v27 = vpop.f32.mrf.mxu1 }
 0x272   :  { %v12772_v47 = vpop.f32.mrf.mxu0 }
 0x273   :  { %v9797_v7 = vpop.f32.mrf.mxu1  ;;  %v2898_v39 = vadd.f32 %v12772_v47, %v12770_v27 }
 0x274   :  { %v9832_v26 = vpop.f32.mrf.mxu0 }
 0x275   :  { %v12775_v10 = vadd.f32 %v9832_v26, %v9797_v7  ;;  %v12778_v31 = vpop.f32.mrf.mxu1 }
 0x276   :  { %v12780_v40 = vpop.f32.mrf.mxu0 }
 0x277   :  { %v9800_v23 = vpop.f32.mrf.mxu1  ;;  %v2908_v4 = vadd.f32 %v12780_v40, %v12778_v31 }
 0x278   :  { %v9835_v41 = vpop.f32.mrf.mxu0 }
 0x279   :  { %v12783_v37 = vadd.f32 %v9835_v41, %v9800_v23  ;;  %v12786_v5 = vpop.f32.mrf.mxu1 }
 0x27a   :  { %v12788_v16 = vpop.f32.mrf.mxu0 }
 0x27b   :  { %v9803_v49 = vpop.f32.mrf.mxu1 }
 0x27c   :  { %v9838_v15 = vpop.f32.mrf.mxu0 }
 0x27d   :  { %v12792_v14 = vadd.f32 %v9838_v15, %v9803_v49  ;;  %v12794_v42 = vpop.f32.mrf.mxu1  ;;  %v2918_v49 = vadd.f32 %v12788_v16, %v12786_v5 }
 0x27e   :  { %v12796_v6 = vpop.f32.mrf.mxu0 }
 0x27f   :  { %v9806_v61 = vpop.f32.mrf.mxu1 }
 0x280   :  { %v9841_v3 = vpop.f32.mrf.mxu0 }
 0x281   :  { %v12798_v32 = vadd.f32 %v9841_v3, %v9806_v61  ;;  %v12800_v52 = vpop.f32.mrf.mxu1 }
 0x282   :  { %v12802_v0 = vpop.f32.mrf.mxu0 }
 0x283   :  { %v9809_v53 = vpop.f32.mrf.mxu1 }
 0x284   :  { %v9844_v25 = vpop.f32.mrf.mxu0 }
 0x285   :  { %v12804_v21 = vadd.f32 %v9844_v25, %v9809_v53  ;;  %v12807_v18 = vpop.f32.mrf.mxu1 }
 0x286   :  { %v12809_v24 = vpop.f32.mrf.mxu0 }
 0x287   :  { %v9812_v33 = vpop.f32.mrf.mxu1 }
 0x288   :  { %v9847_v44 = vpop.f32.mrf.mxu0 }
 0x289   :  { %v12812_v48 = vadd.f32 %v9847_v44, %v9812_v33  ;;  %v12815_v1 = vpop.f32.mrf.mxu1 }
 0x28a   :  { %v12817_v54 = vpop.f32.mrf.mxu0 }
 0x28b   :  { %v9815_v22 = vpop.f32.mrf.mxu1 }
 0x28c   :  { %v9850_v46 = vpop.f32.mrf.mxu0 }
 0x28d   :  { %v2758_v30 = vpop.f32.mrf.mxu1 }
 0x28e   :  { %v2967_v45 = vpop.f32.mrf.mxu0 }
 0x28f   :  { %v9861_v20 = vpop.f32.mrf.mxu1 }
 0x290   :  { %v9896_v2 = vpop.f32.mrf.mxu0 }
 0x291   :  { %v3118_v13 = vpop.f32.mrf.mxu1 }
 0x292   :  { %v3367_v51 = vpop.f32.mrf.mxu0 }
 0x293   :  { %v9864_v35 = vpop.f32.mrf.mxu1 }
 0x294   :  { %v9899_v58 = vpop.f32.mrf.mxu0  ;;  %v3210_v60 = vadd.f32 %v9864_v35, %v12768_v38 }
 0x295   :  { %v3128_v8 = vpop.f32.mrf.mxu1 }
 0x296   :  { %v3377_v29 = vpop.f32.mrf.mxu0  ;;  %v12833_v59 = vadd.f32 %v9899_v58, %v3210_v60  ;;  %v3209_v12 = vadd.f32 %v3128_v8, %v2898_v39 }
 0x297   :  { %v9867_v7 = vpop.f32.mrf.mxu1 }
 0x298   :  { %v9902_v26 = vpop.f32.mrf.mxu0  ;;  %v12837_v34 = vadd.f32 %v3377_v29, %v3209_v12  ;;  %v3212_v23 = vadd.f32 %v9867_v7, %v12775_v10  ;;  %v2928_v10 = vadd.f32 %v12796_v6, %v12794_v42 }
 0x299   :  { %v3138_v41 = vpop.f32.mrf.mxu1 }
 0x29a   :  { %v3387_v62 = vpop.f32.mrf.mxu0  ;;  %v12840_v55 = vadd.f32 %v9902_v26, %v3212_v23  ;;  %v3211_v27 = vadd.f32 %v3138_v41, %v2908_v4 }
 0x29b   :  { %v9870_v38 = vpop.f32.mrf.mxu1 }
 0x29c   :  { %v9905_v47 = vpop.f32.mrf.mxu0  ;;  %v3460_v15 = vadd.f32 %v3387_v62, %v3211_v27  ;;  %v3214_v61 = vadd.f32 %v9870_v38, %v12783_v37  ;;  %v2938_v37 = vadd.f32 %v12802_v0, %v12800_v52 }
 0x29d   :  { %v3148_v3 = vpop.f32.mrf.mxu1 }
 0x29e   :  { %v3397_v11 = vpop.f32.mrf.mxu0  ;;  %v3463_v31 = vadd.f32 %v9905_v47, %v3214_v61  ;;  %v3213_v40 = vadd.f32 %v3148_v3, %v2918_v49 }
 0x29f   :  { %v9873_v53 = vpop.f32.mrf.mxu1 }
 0x2a0   :  { %v9908_v25 = vpop.f32.mrf.mxu0  ;;  %v3462_v17 = vadd.f32 %v3397_v11, %v3213_v40  ;;  %v3216_v36 = vadd.f32 %v9873_v53, %v12792_v14  ;;  %v2948_v14 = vadd.f32 %v12809_v24, %v12807_v18 }
 0x2a1   :  { %v3158_v33 = vpop.f32.mrf.mxu1 }
 0x2a2   :  { %v3407_v44 = vpop.f32.mrf.mxu0  ;;  %v3465_v9 = vadd.f32 %v9908_v25, %v3216_v36  ;;  %v3215_v56 = vadd.f32 %v3158_v33, %v2928_v10 }
 0x2a3   :  { %v9876_v5 = vpop.f32.mrf.mxu1 }
 0x2a4   :  { %v9911_v16 = vpop.f32.mrf.mxu0  ;;  %v3464_v22 = vadd.f32 %v3407_v44, %v3215_v56  ;;  %v3218_v46 = vadd.f32 %v9876_v5, %v12798_v32  ;;  %v2958_v32 = vadd.f32 %v12817_v54, %v12815_v1 }
 0x2a5   :  { %v3168_v43 = vpop.f32.mrf.mxu1 }
 0x2a6   :  { %v3417_v30 = vpop.f32.mrf.mxu0  ;;  %v3467_v45 = vadd.f32 %v9911_v16, %v3218_v46  ;;  %v3217_v28 = vadd.f32 %v3168_v43, %v2938_v37 }
 0x2a7   :  { %v9879_v42 = vpop.f32.mrf.mxu1 }
 0x2a8   :  { %v9914_v6 = vpop.f32.mrf.mxu0  ;;  %v3466_v19 = vadd.f32 %v3417_v30, %v3217_v28  ;;  %v3220_v20 = vadd.f32 %v9879_v42, %v12804_v21 }
 0x2a9   :  { %v3178_v2 = vpop.f32.mrf.mxu1 }
 0x2aa   :  { %v3427_v57 = vpop.f32.mrf.mxu0  ;;  %v3469_v50 = vadd.f32 %v9914_v6, %v3220_v20  ;;  %v3219_v13 = vadd.f32 %v3178_v2, %v2948_v14 }
 0x2ab   :  { %v9882_v52 = vpop.f32.mrf.mxu1 }
 0x2ac   :  { %v9917_v0 = vpop.f32.mrf.mxu0  ;;  %v3468_v51 = vadd.f32 %v3427_v57, %v3219_v13  ;;  %v3222_v35 = vadd.f32 %v9882_v52, %v12812_v48 }
 0x2ad   :  { %v3188_v58 = vpop.f32.mrf.mxu1 }
 0x2ae   :  { %v3437_v39 = vpop.f32.mrf.mxu0  ;;  %v3471_v60 = vadd.f32 %v9917_v0, %v3222_v35  ;;  %v3221_v8 = vadd.f32 %v3188_v58, %v2958_v32 }
 0x2af   :  { %v9885_v18 = vpop.f32.mrf.mxu1 }
 0x2b0   :  { %v9920_v24 = vpop.f32.mrf.mxu0  ;;  %v3470_v29 = vadd.f32 %v3437_v39, %v3221_v8 }
 0x2b1   :  { %v3198_v21 = vpop.f32.mrf.mxu1 }
 0x2b2   :  { %v3447_v12 = vpop.f32.mrf.mxu0 }
 0x2b3   :  { %v9931_v7 = vpop.f32.mrf.mxu1 }
 0x2b4   :  { %v9966_v26 = vpop.f32.mrf.mxu0 }
 0x2b5   :  { %v3616_v4 = vpop.f32.mrf.mxu1 }
 0x2b6   :  { %v3865_v23 = vpop.f32.mrf.mxu0 }
 0x2b7   :  { %v9934_v41 = vpop.f32.mrf.mxu1 }
 0x2b8   :  { %v12857_v62 = vpop.f32.mrf.mxu0  ;;  %v12860_v1 = vadd.f32 %v9934_v41, %v12833_v59 }
 0x2b9   :  { %v3626_v48 = vpop.f32.mrf.mxu1 }
 0x2ba   :  { %v12862_v54 = vpop.f32.mrf.mxu0  ;;  %v12865_v27 = vadd.f32 %v3626_v48, %v12837_v34 }
 0x2bb   :  { %v9937_v38 = vpop.f32.mrf.mxu1 }
 0x2bc   :  { %v12867_v47 = vpop.f32.mrf.mxu0  ;;  %v12870_v49 = vadd.f32 %v9937_v38, %v12840_v55 }
 0x2bd   :  { %v3636_v61 = vpop.f32.mrf.mxu1 }
 0x2be   :  { %v12872_v3 = vpop.f32.mrf.mxu0  ;;  %v12874_v11 = vadd.f32 %v3636_v61, %v3460_v15 }
 0x2bf   :  { %v9940_v40 = vpop.f32.mrf.mxu1 }
 0x2c0   :  { %v12876_v59 = vpop.f32.mrf.mxu0  ;;  %v12878_v53 = vadd.f32 %v9940_v40, %v3463_v31 }
 0x2c1   :  { %v3646_v25 = vpop.f32.mrf.mxu1 }
 0x2c2   :  { %v12880_v10 = vpop.f32.mrf.mxu0  ;;  %v12882_v34 = vadd.f32 %v3646_v25, %v3462_v17 }
 0x2c3   :  { %v9943_v36 = vpop.f32.mrf.mxu1 }
 0x2c4   :  { %v12884_v33 = vpop.f32.mrf.mxu0  ;;  %v12886_v55 = vadd.f32 %v9943_v36, %v3465_v9 }
 0x2c5   :  { %v3656_v44 = vpop.f32.mrf.mxu1 }
 0x2c6   :  { %v12888_v56 = vpop.f32.mrf.mxu0  ;;  %v12890_v15 = vadd.f32 %v3656_v44, %v3464_v22 }
 0x2c7   :  { %v9946_v5 = vpop.f32.mrf.mxu1 }
 0x2c8   :  { %v12892_v16 = vpop.f32.mrf.mxu0  ;;  %v12894_v31 = vadd.f32 %v9946_v5, %v3467_v45 }
 0x2c9   :  { %v3666_v37 = vpop.f32.mrf.mxu1 }
 0x2ca   :  { %v12896_v46 = vpop.f32.mrf.mxu0  ;;  %v12898_v17 = vadd.f32 %v3666_v37, %v3466_v19  ;;  %v3957_v37 = vadd.f32 %v12857_v62, %v12860_v1  ;;  %v3961_v62 = vadd.f32 %v12876_v59, %v12878_v53 }
 0x2cb   :  { %v9949_v43 = vpop.f32.mrf.mxu1 }
 0x2cc   :  { %v12900_v30 = vpop.f32.mrf.mxu0  ;;  %v12902_v9 = vadd.f32 %v9949_v43, %v3469_v50  ;;  %v3956_v43 = vadd.f32 %v12862_v54, %v12865_v27 }
 0x2cd   :  { %v3676_v28 = vpop.f32.mrf.mxu1 }
 0x2ce   :  { %v12904_v42 = vpop.f32.mrf.mxu0  ;;  %v12906_v22 = vadd.f32 %v3676_v28, %v3468_v51 }
 0x2cf   :  { %v9952_v6 = vpop.f32.mrf.mxu1 }
 0x2d0   :  { %v12908_v14 = vpop.f32.mrf.mxu0  ;;  %v12910_v45 = vadd.f32 %v9952_v6, %v3471_v60 }
 0x2d1   :  { %v3686_v20 = vpop.f32.mrf.mxu1 }
 0x2d2   :  { %v12912_v2 = vpop.f32.mrf.mxu0  ;;  %v12914_v19 = vadd.f32 %v3686_v20, %v3470_v29 }
 0x2d3   :  { %v9955_v57 = vpop.f32.mrf.mxu1 }
 0x2d4   :  { %v9990_v13 = vpop.f32.mrf.mxu0 }
 0x2d5   :  { %v3696_v52 = vpop.f32.mrf.mxu1 }
 0x2d6   :  { %v3945_v50 = vpop.f32.mrf.mxu0  ;;  %v12930_v52 = vld [vmem:[#allocation9] ss:$0 sm:$0xff] }
 0x2d7   :  { %v10001_v0 = vpop.f32.mrf.mxu1  ;;  %v3959_v50 = vadd.f32 %v12867_v47, %v12870_v49 }
 0x2d8   :  { %v10036_v32 = vpop.f32.mrf.mxu0  ;;  %v3958_v0 = vadd.f32 %v12872_v3, %v12874_v11 }
 0x2d9   :  { %v4114_v35 = vpop.f32.mrf.mxu1 }
 0x2da   :  { %v4363_v58 = vpop.f32.mrf.mxu0 }
 0x2db   :  { %v10004_v51 = vpop.f32.mrf.mxu1 }
 0x2dc   :  { %v10039_v8 = vpop.f32.mrf.mxu0  ;;  %v4206_v6 = vadd.f32 %v10004_v51, %v3957_v37 }
 0x2dd   :  { %v4124_v39 = vpop.f32.mrf.mxu1 }
 0x2de   :  { %v4373_v60 = vpop.f32.mrf.mxu0  ;;  %v4205_v20 = vadd.f32 %v4124_v39, %v3956_v43  ;;  %v4455_v35 = vadd.f32 %v10039_v8, %v4206_v6  ;;  %v3963_v8 = vadd.f32 %v12884_v33, %v12886_v55  ;;  %v3965_v55 = vadd.f32 %v12892_v16, %v12894_v31 }
 0x2df   :  { %v10007_v18 = vpop.f32.mrf.mxu1 }
 0x2e0   :  { %v10042_v7 = vpop.f32.mrf.mxu0  ;;  %v4208_v58 = vadd.f32 %v10007_v18, %v3959_v50  ;;  %v4454_v1 = vadd.f32 %v4373_v60, %v4205_v20 }
 0x2e1   :  { %v4134_v24 = vpop.f32.mrf.mxu1 }
 0x2e2   :  { %v4383_v4 = vpop.f32.mrf.mxu0  ;;  %v4207_v51 = vadd.f32 %v4134_v24, %v3958_v0  ;;  %v4457_v49 = vadd.f32 %v10042_v7, %v4208_v58 }
 0x2e3   :  { %v10010_v21 = vpop.f32.mrf.mxu1 }
 0x2e4   :  { %v10045_v48 = vpop.f32.mrf.mxu0  ;;  %v4210_v37 = vadd.f32 %v10010_v21, %v3961_v62  ;;  %v4456_v60 = vadd.f32 %v4383_v4, %v4207_v51 }
 0x2e5   :  { %v4144_v12 = vpop.f32.mrf.mxu1 }
 0x2e6   :  { %v4393_v40 = vpop.f32.mrf.mxu0 }
 0x2e7   :  { %v10013_v26 = vpop.f32.mrf.mxu1 }
 0x2e8   :  { %v10048_v44 = vpop.f32.mrf.mxu0  ;;  %v4212_v7 = vadd.f32 %v10013_v26, %v3963_v8  ;;  %v3964_v26 = vadd.f32 %v12896_v46, %v12898_v17 }
 0x2e9   :  { %v4154_v29 = vpop.f32.mrf.mxu1 }
 0x2ea   :  { %v4403_v57 = vpop.f32.mrf.mxu0 }
 0x2eb   :  { %v10016_v23 = vpop.f32.mrf.mxu1 }
 0x2ec   :  { %v10051_v54 = vpop.f32.mrf.mxu0 }
 0x2ed   :  { %v12916_v41 = vpop.f32.mrf.mxu1 }
 0x2ee   :  { %v4413_v59 = vpop.f32.mrf.mxu0 }
 0x2ef   :  { %v12918_v38 = vpop.f32.mrf.mxu1 }
 0x2f0   :  { %v10054_v4 = vpop.f32.mrf.mxu0 }
 0x2f1   :  { %v12920_v61 = vpop.f32.mrf.mxu1 }
 0x2f2   :  { %v4423_v62 = vpop.f32.mrf.mxu0 }
 0x2f3   :  { %v12922_v25 = vpop.f32.mrf.mxu1 }
 0x2f5   :  { %v12924_v36 = vpop.f32.mrf.mxu1 }
 0x2f7   :  { %v10025_v5 = vpop.f32.mrf.mxu1 }
 0x2f8   :  { %v3960_v5 = vadd.f32 %v12880_v10, %v12882_v34  ;;  %v3962_v10 = vadd.f32 %v12888_v56, %v12890_v15  ;;  %v4459_v34 = vadd.f32 %v10045_v48, %v4210_v37  ;;  %v4214_v48 = vadd.f32 %v10016_v23, %v3965_v55  ;;  %v5036_v37 = vld [vmem:[#allocation10 + $0xf8] sm:$0xff]  ;;  %v5033_v55 = vld [vmem:[#allocation10 + $0xe0] sm:$0xff] }
 0x2f9   :  { %v4194_v28 = vpop.f32.mrf.mxu1 }
 0x2fa   :  { %v4209_v18 = vadd.f32 %v4144_v12, %v3960_v5  ;;  %v4211_v50 = vadd.f32 %v4154_v29, %v3962_v10  ;;  %v3967_v29 = vadd.f32 %v12900_v30, %v12902_v9  ;;  %v4463_v51 = vadd.f32 %v10051_v54, %v4214_v48  ;;  %v4951_v10 = vld [vmem:[#allocation10 + $0xa8] sm:$0xff] }
 0x2fb   :  { %v10071_v13 = vpop.f32.mrf.mxu1 }
 0x2fc   :  { %v4458_v12 = vadd.f32 %v4393_v40, %v4209_v18  ;;  %v4213_v40 = vadd.f32 %v12916_v41, %v3964_v26  ;;  %v4216_v5 = vadd.f32 %v12918_v38, %v3967_v29 }
 0x2fd   :  { %v4612_v32 = vpop.f32.mrf.mxu1 }
 0x2ff   :  { %v10074_v27 = vpop.f32.mrf.mxu1 }
 0x300   :  { %v4704_v39 = vadd.f32 %v10074_v27, %v4455_v35  ;;  %v4461_v35 = vadd.f32 %v10048_v44, %v4212_v7  ;;  %v4460_v27 = vadd.f32 %v4403_v57, %v4211_v50  ;;  %v3966_v44 = vadd.f32 %v12904_v42, %v12906_v22  ;;  %v4953_v57 = vld [vmem:[#allocation10 + $0xb8] sm:$0xff] }
 0x301   :  { %v4622_v47 = vpop.f32.mrf.mxu1 }
 0x302   :  { %v4729_v3 = vadd.f32 %v12930_v52, %v4704_v39  ;;  %v4703_v11 = vadd.f32 %v4622_v47, %v4454_v1  ;;  %v3969_v47 = vadd.f32 %v12908_v14, %v12910_v45  ;;  %v4215_v22 = vadd.f32 %v12920_v61, %v3966_v44 }
 0x303   :  { %v10077_v53 = vpop.f32.mrf.mxu1  ;;  %v3968_v14 = vadd.f32 %v12912_v2, %v12914_v19 }
 0x304   :  { %v4747_v43 = vmax.f32 %v4729_v3, 0.0  ;;  %v4728_v24 = vadd.f32 %v12930_v52, %v4703_v11  ;;  %v4706_v28 = vadd.f32 %v10077_v53, %v4457_v49  ;;  %v4462_v49 = vadd.f32 %v4413_v59, %v4213_v40  ;;  %v10057_v3 = vpop.f32.mrf.mxu0  ;;  %v4952_v53 = vld [vmem:[#allocation10 + $0xb0] sm:$0xff] }
 0x305   :  { %v4632_v21 = vpop.f32.mrf.mxu1  ;;  %v4218_v45 = vadd.f32 %v12922_v25, %v3969_v47  ;;  %v4465_v59 = vadd.f32 %v10054_v4, %v4216_v5  ;;  %v4217_v2 = vadd.f32 %v12924_v36, %v3968_v14  ;;  %v5118_v47 = vld [vmem:[#allocation10 + $0x130] sm:$0xff]  ;;  %v5112_v14 = vld [vmem:[#allocation10 + $0x100] sm:$0xff] }
 0x306   :  { %4766 = vst.msk [vmem:[#allocation3 + $0x18] sm:$0xff] %vm4762_vm3, %v4747_v43  ;;  %v4746_v6 = vmax.f32 %v4728_v24, 0.0  ;;  %v4731_v20 = vadd.f32 %v12930_v52, %v4706_v28  ;;  %v4705_v33 = vadd.f32 %v4632_v21, %v4456_v60  ;;  %v5035_v60 = vld [vmem:[#allocation10 + $0xf0] sm:$0xff]  ;;  %v4433_v19 = vpop.f32.mrf.mxu0  ;;  %v4464_v21 = vadd.f32 %v4423_v62, %v4215_v22  ;;  %v5115_v22 = vld [vmem:[#allocation10 + $0x118] sm:$0xff] }
 0x307   :  { %v10080_v13 = vpop.f32.mrf.mxu1  ;;  %v4466_v26 = vadd.f32 %v4433_v19, %v4217_v2  ;;  %v5366_v2 = vld [vmem:[#allocation10 + $0x1e8] sm:$0xff]  ;;  %v5282_v19 = vld [vmem:[#allocation10 + $0x1a0] sm:$0xff] }
 0x308   :  { %4765 = vst.msk [vmem:[#allocation3 + $0x10] sm:$0xff] %vm4762_vm3, %v4746_v6  ;;  %v4749_v0 = vmax.f32 %v4731_v20, 0.0  ;;  %v4730_v56 = vadd.f32 %v12930_v52, %v4705_v33  ;;  %v4708_v15 = vadd.f32 %v10080_v13, %v4459_v34  ;;  %v5034_v34 = vld [vmem:[#allocation10 + $0xe8] sm:$0xff]  ;;  %v4950_v33 = vld [vmem:[#allocation10 + $0xa0] sm:$0xff]  ;;  %v10060_v4 = vpop.f32.mrf.mxu0 }
 0x309   :  { %v4642_v32 = vpop.f32.mrf.mxu1  ;;  %v5361_v4 = vld [vmem:[#allocation10 + $0x1c0] sm:$0xff] }
 0x30a   :  { %4768 = vst.msk [vmem:[#allocation3 + $0x28] sm:$0xff] %vm4762_vm3, %v4749_v0  ;;  %v4748_v58 = vmax.f32 %v4730_v56, 0.0  ;;  %v4733_v16 = vadd.f32 %v12930_v52, %v4708_v15  ;;  %v4707_v31 = vadd.f32 %v4642_v32, %v4458_v12  ;;  %v4467_v12 = vadd.f32 %v10057_v3, %v4218_v45  ;;  %v4949_v56 = vld [vmem:[#allocation10 + $0x98] sm:$0xff]  ;;  %v4443_v29 = vpop.f32.mrf.mxu0  ;;  %v5117_v3 = vld [vmem:[#allocation10 + $0x128] sm:$0xff]  ;;  %v5195_v45 = vld [vmem:[#allocation10 + $0x140] sm:$0xff] }
 0x30b   :  { %v10083_v1 = vpop.f32.mrf.mxu1  ;;  %v5032_v15 = vld [vmem:[#allocation10 + $0xd8] sm:$0xff]  ;;  %v5529_v29 = vld [vmem:[#allocation10 + $0x250] sm:$0xff] }
 0x30c   :  { %4767 = vst.msk [vmem:[#allocation3 + $0x20] sm:$0xff] %vm4762_vm3, %v4748_v58  ;;  %v4751_v46 = vmax.f32 %v4733_v16, 0.0  ;;  %v4732_v17 = vadd.f32 %v12930_v52, %v4707_v31  ;;  %v4710_v23 = vadd.f32 %v10083_v1, %v4461_v35  ;;  %v4948_v16 = vld [vmem:[#allocation10 + $0x90] sm:$0xff] }
 0x30d   :  { %v4652_v39 = vpop.f32.mrf.mxu1  ;;  %v5031_v31 = vld [vmem:[#allocation10 + $0xd0] sm:$0xff] }
 0x30e   :  { %4770 = vst.msk [vmem:[#allocation3 + $0x38] sm:$0xff] %vm4762_vm3, %v4751_v46  ;;  %v4750_v30 = vmax.f32 %v4732_v17, 0.0  ;;  %v4735_v9 = vadd.f32 %v12930_v52, %v4710_v23  ;;  %v4709_v41 = vadd.f32 %v4652_v39, %v4460_v27  ;;  %v4947_v46 = vld [vmem:[#allocation10 + $0x88] sm:$0xff]  ;;  %v4946_v39 = vld [vmem:[#allocation10 + $0x80] sm:$0xff] }
 0x30f   :  { %v10086_v11 = vpop.f32.mrf.mxu1  ;;  %v4790_v8 = vld [vmem:[#allocation3 + $0x16] sm:$0x3]  ;;  %v4781_v42 = vld [vmem:[#allocation3 + $0x14] sm:$0x3]  ;;  %v5030_v17 = vld [vmem:[#allocation10 + $0xc8] sm:$0xff] }
 0x310   :  { %4769 = vst.msk [vmem:[#allocation3 + $0x30] sm:$0xff] %vm4762_vm3, %v4750_v30  ;;  %v4753_v38 = vmax.f32 %v4735_v9, 0.0  ;;  %v4734_v54 = vadd.f32 %v12930_v52, %v4709_v41  ;;  %v4712_v18 = vadd.f32 %v10086_v11, %v4463_v51  ;;  %10113 = vmatmul.mubr.msk.f32.vlgmr.msra.gmra.mxu0 %vm4762_vm3, %v4790_v8  ;;  %10132 = vmatmul.mubr.msk.f32.vlgmr.msra.gmra.mxu1 %vm4762_vm3, %v4781_v42  ;;  %v5029_v30 = vld [vmem:[#allocation10 + $0xc0] sm:$0xff]  ;;  %v4945_v41 = vld [vmem:[#allocation3 + $0x18] sm:$0x3]  ;;  %v5200_v11 = vld [vmem:[#allocation10 + $0x168] sm:$0xff] }
 0x311   :  { %10135 = vmatpush3.msra.mxu0 %v4953_v57  ;;  %10154 = vmatpush3.msra.mxu1 %v5036_v37  ;;  %v4662_v61 = vpop.f32.mrf.mxu1  ;;  %v5028_v57 = vld [vmem:[#allocation3 + $0x1a] sm:$0x3]  ;;  %v5202_v37 = vld [vmem:[#allocation10 + $0x178] sm:$0xff]  ;;  %v5116_v8 = vld [vmem:[#allocation10 + $0x120] sm:$0xff] }
 0x312   :  { %4772 = vst.msk [vmem:[#allocation3 + $0x48] sm:$0xff] %vm4762_vm3, %v4753_v38  ;;  %v4752_v43 = vmax.f32 %v4734_v54, 0.0  ;;  %v4737_v24 = vadd.f32 %v12930_v52, %v4712_v18  ;;  %v4711_v28 = vadd.f32 %v4662_v61, %v4462_v49  ;;  %10136 = vmatprep.subr.mxu0 %v13533_v63  ;;  %10155 = vmatprep.subr.mxu1 %v13533_v63  ;;  %v5201_v49 = vld [vmem:[#allocation10 + $0x170] sm:$0xff]  ;;  %v5199_v42 = vld [vmem:[#allocation10 + $0x160] sm:$0xff]  ;;  %v5198_v38 = vld [vmem:[#allocation10 + $0x158] sm:$0xff] }
 0x313   :  { %10137 = vmatpush3.msra.mxu0 %v4952_v53  ;;  %10156 = vmatpush3.msra.mxu1 %v5035_v60  ;;  %v10089_v25 = vpop.f32.mrf.mxu1  ;;  %v5114_v54 = vld [vmem:[#allocation10 + $0x110] sm:$0xff]  ;;  %v5113_v53 = vld [vmem:[#allocation10 + $0x108] sm:$0xff]  ;;  %v5285_v61 = vld [vmem:[#allocation10 + $0x1b8] sm:$0xff] }
 0x314   :  { %4771 = vst.msk [vmem:[#allocation3 + $0x40] sm:$0xff] %vm4762_vm3, %v4752_v43  ;;  %v4755_v7 = vmax.f32 %v4737_v24, 0.0  ;;  %v4736_v6 = vadd.f32 %v12930_v52, %v4711_v28  ;;  %v4714_v20 = vadd.f32 %v10089_v25, %v4465_v59  ;;  %10138 = vmatprep.subr.mxu0 %v13533_v63  ;;  %10157 = vmatprep.subr.mxu1 %v13533_v63  ;;  %v5197_v18 = vld [vmem:[#allocation10 + $0x150] sm:$0xff]  ;;  %v5196_v60 = vld [vmem:[#allocation10 + $0x148] sm:$0xff]  ;;  %v5111_v59 = vld [vmem:[#allocation3 + $0x1c] sm:$0x3] }
 0x315   :  { %10139 = vmatpush3.msra.mxu0 %v4951_v10  ;;  %10158 = vmatpush3.msra.mxu1 %v5034_v34  ;;  %v4672_v36 = vpop.f32.mrf.mxu1  ;;  %v5194_v43 = vld [vmem:[#allocation3 + $0x1e] sm:$0x3]  ;;  %v5284_v28 = vld [vmem:[#allocation10 + $0x1b0] sm:$0xff]  ;;  %v5283_v34 = vld [vmem:[#allocation10 + $0x1a8] sm:$0xff] }
 0x316   :  { %4774 = vst.msk [vmem:[#allocation3 + $0x58] sm:$0xff] %vm4762_vm3, %v4755_v7  ;;  %v4754_v13 = vmax.f32 %v4736_v6, 0.0  ;;  %v4739_v50 = vadd.f32 %v12930_v52, %v4714_v20  ;;  %v4713_v0 = vadd.f32 %v4672_v36, %v4464_v21  ;;  %10140 = vmatprep.subr.mxu0 %v13533_v63  ;;  %10159 = vmatprep.subr.mxu1 %v13533_v63  ;;  %v5368_v24 = vld [vmem:[#allocation10 + $0x1f8] sm:$0xff]  ;;  %v5367_v10 = vld [vmem:[#allocation10 + $0x1f0] sm:$0xff]  ;;  %v5365_v25 = vld [vmem:[#allocation10 + $0x1e0] sm:$0xff] }
 0x317   :  { %10141 = vmatpush3.msra.mxu0 %v4950_v33  ;;  %10160 = vmatpush3.msra.mxu1 %v5033_v55  ;;  %v10092_v48 = vpop.f32.mrf.mxu1  ;;  %v5281_v21 = vld [vmem:[#allocation10 + $0x198] sm:$0xff]  ;;  %v5280_v6 = vld [vmem:[#allocation10 + $0x190] sm:$0xff]  ;;  %v5279_v33 = vld [vmem:[#allocation10 + $0x188] sm:$0xff] }
 0x318   :  { %4773 = vst.msk [vmem:[#allocation3 + $0x50] sm:$0xff] %vm4762_vm3, %v4754_v13  ;;  %v4757_v32 = vmax.f32 %v4739_v50, 0.0  ;;  %v4738_v35 = vadd.f32 %v12930_v52, %v4713_v0  ;;  %v4716_v58 = vadd.f32 %v10092_v48, %v4467_v12  ;;  %10142 = vmatprep.subr.mxu0 %v13533_v63  ;;  %10161 = vmatprep.subr.mxu1 %v13533_v63  ;;  %v5364_v7 = vld [vmem:[#allocation10 + $0x1d8] sm:$0xff]  ;;  %v5363_v20 = vld [vmem:[#allocation10 + $0x1d0] sm:$0xff]  ;;  %v5362_v55 = vld [vmem:[#allocation10 + $0x1c8] sm:$0xff] }
 0x319   :  { %10143 = vmatpush3.msra.mxu0 %v4949_v56  ;;  %10162 = vmatpush3.msra.mxu1 %v5032_v15  ;;  %v4682_v40 = vpop.f32.mrf.mxu1  ;;  %v5278_v12 = vld [vmem:[#allocation10 + $0x180] sm:$0xff]  ;;  %v5451_v36 = vld [vmem:[#allocation10 + $0x238] sm:$0xff]  ;;  %v5450_v56 = vld [vmem:[#allocation10 + $0x230] sm:$0xff] }
 0x31a   :  { %4776 = vst.msk [vmem:[#allocation3 + $0x68] sm:$0xff] %vm4762_vm3, %v4757_v32  ;;  %v4756_v62 = vmax.f32 %v4738_v35, 0.0  ;;  %v4741_v1 = vadd.f32 %v12930_v52, %v4716_v58  ;;  %v4715_v27 = vadd.f32 %v4682_v40, %v4466_v26  ;;  %10144 = vmatprep.subr.mxu0 %v13533_v63  ;;  %10163 = vmatprep.subr.mxu1 %v13533_v63  ;;  %v5277_v13 = vld [vmem:[#allocation3 + $0x20] sm:$0x3]  ;;  %v5360_v50 = vld [vmem:[#allocation3 + $0x26] sm:$0x3] }
 0x31b   :  { %10145 = vmatpush3.msra.mxu0 %v4948_v16  ;;  %10164 = vmatpush3.msra.mxu1 %v5031_v31  ;;  %v10095_v23 = vpop.f32.mrf.mxu1  ;;  %v5534_v0 = vld [vmem:[#allocation10 + $0x278] sm:$0xff]  ;;  %v5533_v15 = vld [vmem:[#allocation10 + $0x270] sm:$0xff]  ;;  %v5449_v26 = vld [vmem:[#allocation10 + $0x228] sm:$0xff] }
 0x31c   :  { %4775 = vst.msk [vmem:[#allocation3 + $0x60] sm:$0xff] %vm4762_vm3, %v4756_v62  ;;  %v4759_v44 = vmax.f32 %v4741_v1, 0.0  ;;  %v4740_v51 = vadd.f32 %v12930_v52, %v4715_v27  ;;  %10146 = vmatprep.subr.mxu0 %v13533_v63  ;;  %10165 = vmatprep.subr.mxu1 %v13533_v63  ;;  %v5119_v52 = vld [vmem:[#allocation10 + $0x138] sm:$0xff]  ;;  %v5532_v48 = vld [vmem:[#allocation10 + $0x268] sm:$0xff]  ;;  %v5448_v32 = vld [vmem:[#allocation10 + $0x220] sm:$0xff] }
 0x31d   :  { %10147 = vmatpush3.msra.mxu0 %v4947_v46  ;;  %10166 = vmatpush3.msra.mxu1 %v5030_v17  ;;  %v4692_v5 = vpop.f32.mrf.mxu1  ;;  %v5531_v35 = vld [vmem:[#allocation10 + $0x260] sm:$0xff]  ;;  %v5447_v58 = vld [vmem:[#allocation10 + $0x218] sm:$0xff]  ;;  %v5446_v31 = vld [vmem:[#allocation10 + $0x210] sm:$0xff] }
 0x31e   :  { %4778 = vst.msk [vmem:[#allocation3 + $0x78] sm:$0xff] %vm4762_vm3, %v4759_v44  ;;  %v4758_v9 = vmax.f32 %v4740_v51, 0.0  ;;  %10148 = vmatprep.subr.mxu0 %v13533_v63  ;;  %10167 = vmatprep.subr.mxu1 %v13533_v63  ;;  %v5530_v16 = vld [vmem:[#allocation10 + $0x258] sm:$0xff]  ;;  %v5445_v40 = vld [vmem:[#allocation10 + $0x208] sm:$0xff]  ;;  %v5444_v1 = vld [vmem:[#allocation10 + $0x200] sm:$0xff] }
 0x31f   :  { %10149 = vmatpush3.msra.mxu0 %v4946_v39  ;;  %10150 = vmatprep.mubr.msk.f32.mxu0 %vm11127_vm2, %v13533_v63  ;;  %v5528_v62 = vld [vmem:[#allocation10 + $0x248] sm:$0xff]  ;;  %v5527_v27 = vld [vmem:[#allocation10 + $0x240] sm:$0xff]  ;;  %v5617_v46 = vld [vmem:[#allocation10 + $0x2b8] sm:$0xff] }
 0x320   :  { %4777 = vst.msk [vmem:[#allocation3 + $0x70] sm:$0xff] %vm4762_vm3, %v4758_v9  ;;  %10168 = vmatpush3.msra.mxu1 %v5029_v30  ;;  %10169 = vmatprep.mubr.msk.f32.mxu1 %vm11127_vm2, %v13533_v63  ;;  %v5443_v17 = vld [vmem:[#allocation3 + $0x28] sm:$0x3]  ;;  %v5526_v23 = vld [vmem:[#allocation3 + $0x2a] sm:$0x3]  ;;  %v5700_v44 = vld [vmem:[#allocation10 + $0x2f8] sm:$0xff] }
 0x321   :  { %10151 = vmatmul.mubr.msk.f32.vlgmr.msra.gmra.mxu0 %vm4762_vm3, %v4945_v41  ;;  %10170 = vmatmul.mubr.msk.f32.vlgmr.msra.gmra.mxu1 %vm4762_vm3, %v5028_v57  ;;  %v5616_v51 = vld [vmem:[#allocation10 + $0x2b0] sm:$0xff]  ;;  %v5615_v5 = vld [vmem:[#allocation10 + $0x2a8] sm:$0xff]  ;;  %v5614_v9 = vld [vmem:[#allocation10 + $0x2a0] sm:$0xff] }
 0x322   :  { %10172 = vmatprep.subr.mxu0 %v13533_v63  ;;  %10191 = vmatprep.subr.mxu1 %v13533_v63  ;;  %v5699_v39 = vld [vmem:[#allocation10 + $0x2f0] sm:$0xff]  ;;  %v5698_v30 = vld [vmem:[#allocation10 + $0x2e8] sm:$0xff]  ;;  %v5613_v41 = vld [vmem:[#allocation10 + $0x298] sm:$0xff] }
 0x323   :  { %10173 = vmatpush3.msra.mxu0 %v5119_v52  ;;  %10192 = vmatpush3.msra.mxu1 %v5202_v37  ;;  %v5697_v52 = vld [vmem:[#allocation10 + $0x2e0] sm:$0xff]  ;;  %v5696_v57 = vld [vmem:[#allocation10 + $0x2d8] sm:$0xff]  ;;  %v5612_v37 = vld [vmem:[#allocation10 + $0x290] sm:$0xff] }
 0x324   :  { %10174 = vmatprep.subr.mxu0 %v13533_v63  ;;  %10193 = vmatprep.subr.mxu1 %v13533_v63 }
 0x325   :  { %10175 = vmatpush3.msra.mxu0 %v5118_v47  ;;  %10194 = vmatpush3.msra.mxu1 %v5201_v49  ;;  %v5695_v47 = vld [vmem:[#allocation10 + $0x2d0] sm:$0xff]  ;;  %v5611_v49 = vld [vmem:[#allocation10 + $0x288] sm:$0xff] }
 0x326   :  { %10176 = vmatprep.subr.mxu0 %v13533_v63  ;;  %10195 = vmatprep.subr.mxu1 %v13533_v63 }
 0x327   :  { %10177 = vmatpush3.msra.mxu0 %v5117_v3  ;;  %10196 = vmatpush3.msra.mxu1 %v5200_v11  ;;  %v5694_v3 = vld [vmem:[#allocation10 + $0x2c8] sm:$0xff]  ;;  %v5610_v11 = vld [vmem:[#allocation10 + $0x280] sm:$0xff] }
 0x328   :  { %10178 = vmatprep.subr.mxu0 %v13533_v63  ;;  %10197 = vmatprep.subr.mxu1 %v13533_v63 }
 0x329   :  { %10179 = vmatpush3.msra.mxu0 %v5116_v8  ;;  %10198 = vmatpush3.msra.mxu1 %v5199_v42  ;;  %v5693_v8 = vld [vmem:[#allocation10 + $0x2c0] sm:$0xff]  ;;  %v5783_v42 = vld [vmem:[#allocation10 + $0x338] sm:$0xff] }
 0x32a   :  { %10180 = vmatprep.subr.mxu0 %v13533_v63  ;;  %10199 = vmatprep.subr.mxu1 %v13533_v63 }
 0x32b   :  { %10181 = vmatpush3.msra.mxu0 %v5115_v22  ;;  %10200 = vmatpush3.msra.mxu1 %v5198_v38  ;;  %v5609_v22 = vld [vmem:[#allocation3 + $0x2c] sm:$0x3]  ;;  %v5692_v38 = vld [vmem:[#allocation3 + $0x2e] sm:$0x3] }
 0x32c   :  { %10182 = vmatprep.subr.mxu0 %v13533_v63  ;;  %10201 = vmatprep.subr.mxu1 %v13533_v63 }
 0x32d   :  { %10183 = vmatpush3.msra.mxu0 %v5114_v54  ;;  %10202 = vmatpush3.msra.mxu1 %v5197_v18  ;;  %v5866_v54 = vld [vmem:[#allocation10 + $0x378] sm:$0xff]  ;;  %v5782_v18 = vld [vmem:[#allocation10 + $0x330] sm:$0xff] }
 0x32e   :  { %10184 = vmatprep.subr.mxu0 %v13533_v63  ;;  %10203 = vmatprep.subr.mxu1 %v13533_v63 }
 0x32f   :  { %10185 = vmatpush3.msra.mxu0 %v5113_v53  ;;  %10204 = vmatpush3.msra.mxu1 %v5196_v60  ;;  %v5865_v53 = vld [vmem:[#allocation10 + $0x370] sm:$0xff]  ;;  %v5781_v60 = vld [vmem:[#allocation10 + $0x328] sm:$0xff] }
 0x330   :  { %10186 = vmatprep.subr.mxu0 %v13533_v63  ;;  %10205 = vmatprep.subr.mxu1 %v13533_v63 }
 0x331   :  { %10187 = vmatpush3.msra.mxu0 %v5112_v14  ;;  %10188 = vmatprep.mubr.msk.f32.mxu0 %vm11127_vm2, %v13533_v63  ;;  %v5864_v14 = vld [vmem:[#allocation10 + $0x368] sm:$0xff] }
 0x332   :  { %10206 = vmatpush3.msra.mxu1 %v5195_v45  ;;  %10207 = vmatprep.mubr.msk.f32.mxu1 %vm11127_vm2, %v13533_v63  ;;  %v5780_v45 = vld [vmem:[#allocation10 + $0x320] sm:$0xff] }
 0x333   :  { %10189 = vmatmul.mubr.msk.f32.vlgmr.msra.gmra.mxu0 %vm4762_vm3, %v5111_v59  ;;  %10208 = vmatmul.mubr.msk.f32.vlgmr.msra.gmra.mxu1 %vm4762_vm3, %v5194_v43  ;;  %v5779_v59 = vld [vmem:[#allocation10 + $0x318] sm:$0xff] }
 0x334   :  { %10210 = vmatprep.subr.mxu0 %v13533_v63  ;;  %10229 = vmatprep.subr.mxu1 %v13533_v63  ;;  %v5862_v43 = vld [vmem:[#allocation10 + $0x358] sm:$0xff] }
 0x335   :  { %10211 = vmatpush3.msra.mxu0 %v5285_v61  ;;  %10230 = vmatpush3.msra.mxu1 %v5368_v24  ;;  %v5863_v61 = vld [vmem:[#allocation10 + $0x360] sm:$0xff]  ;;  %v5778_v24 = vld [vmem:[#allocation10 + $0x310] sm:$0xff] }
 0x336   :  { %10212 = vmatprep.subr.mxu0 %v13533_v63  ;;  %10231 = vmatprep.subr.mxu1 %v13533_v63 }
 0x337   :  { %10213 = vmatpush3.msra.mxu0 %v5284_v28  ;;  %10232 = vmatpush3.msra.mxu1 %v5367_v10  ;;  %v5861_v28 = vld [vmem:[#allocation10 + $0x350] sm:$0xff]  ;;  %v5777_v10 = vld [vmem:[#allocation10 + $0x308] sm:$0xff] }
 0x338   :  { %10214 = vmatprep.subr.mxu0 %v13533_v63  ;;  %10233 = vmatprep.subr.mxu1 %v13533_v63 }
 0x339   :  { %10215 = vmatpush3.msra.mxu0 %v5283_v34  ;;  %10234 = vmatpush3.msra.mxu1 %v5366_v2  ;;  %v5860_v34 = vld [vmem:[#allocation10 + $0x348] sm:$0xff]  ;;  %v5776_v2 = vld [vmem:[#allocation10 + $0x300] sm:$0xff] }
 0x33a   :  { %10216 = vmatprep.subr.mxu0 %v13533_v63  ;;  %10235 = vmatprep.subr.mxu1 %v13533_v63 }
 0x33b   :  { %10217 = vmatpush3.msra.mxu0 %v5282_v19  ;;  %10236 = vmatpush3.msra.mxu1 %v5365_v25  ;;  %v5859_v19 = vld [vmem:[#allocation10 + $0x340] sm:$0xff]  ;;  %v5949_v25 = vld [vmem:[#allocation10 + $0x3b8] sm:$0xff] }
 0x33c   :  { %10218 = vmatprep.subr.mxu0 %v13533_v63  ;;  %10237 = vmatprep.subr.mxu1 %v13533_v63 }
 0x33d   :  { %10219 = vmatpush3.msra.mxu0 %v5281_v21  ;;  %10238 = vmatpush3.msra.mxu1 %v5364_v7  ;;  %v5775_v21 = vld [vmem:[#allocation3 + $0x30] sm:$0x3]  ;;  %v5858_v7 = vld [vmem:[#allocation3 + $0x32] sm:$0x3] }
 0x33e   :  { %10220 = vmatprep.subr.mxu0 %v13533_v63  ;;  %10239 = vmatprep.subr.mxu1 %v13533_v63 }
 0x33f   :  { %10221 = vmatpush3.msra.mxu0 %v5280_v6  ;;  %10240 = vmatpush3.msra.mxu1 %v5363_v20  ;;  %v6032_v6 = vld [vmem:[#allocation10 + $0x3f8] sm:$0xff]  ;;  %v5948_v20 = vld [vmem:[#allocation10 + $0x3b0] sm:$0xff] }
 0x340   :  { %10222 = vmatprep.subr.mxu0 %v13533_v63  ;;  %10241 = vmatprep.subr.mxu1 %v13533_v63 }
 0x341   :  { %10223 = vmatpush3.msra.mxu0 %v5279_v33  ;;  %10242 = vmatpush3.msra.mxu1 %v5362_v55  ;;  %v6031_v33 = vld [vmem:[#allocation10 + $0x3f0] sm:$0xff]  ;;  %v5947_v55 = vld [vmem:[#allocation10 + $0x3a8] sm:$0xff] }
 0x342   :  { %10224 = vmatprep.subr.mxu0 %v13533_v63  ;;  %10243 = vmatprep.subr.mxu1 %v13533_v63 }
 0x343   :  { %10225 = vmatpush3.msra.mxu0 %v5278_v12  ;;  %10226 = vmatprep.mubr.msk.f32.mxu0 %vm11127_vm2, %v13533_v63  ;;  %v6030_v12 = vld [vmem:[#allocation10 + $0x3e8] sm:$0xff] }
 0x344   :  { %10244 = vmatpush3.msra.mxu1 %v5361_v4  ;;  %10245 = vmatprep.mubr.msk.f32.mxu1 %vm11127_vm2, %v13533_v63  ;;  %v5946_v4 = vld [vmem:[#allocation10 + $0x3a0] sm:$0xff] }
 0x345   :  { %10227 = vmatmul.mubr.msk.f32.vlgmr.msra.gmra.mxu0 %vm4762_vm3, %v5277_v13  ;;  %10246 = vmatmul.mubr.msk.f32.vlgmr.msra.gmra.mxu1 %vm4762_vm3, %v5360_v50  ;;  %v5945_v13 = vld [vmem:[#allocation10 + $0x398] sm:$0xff] }
 0x346   :  { %10248 = vmatprep.subr.mxu0 %v13533_v63  ;;  %10267 = vmatprep.subr.mxu1 %v13533_v63  ;;  %v6028_v50 = vld [vmem:[#allocation10 + $0x3d8] sm:$0xff] }
 0x347   :  { %10249 = vmatpush3.msra.mxu0 %v5451_v36  ;;  %10268 = vmatpush3.msra.mxu1 %v5534_v0  ;;  %v6029_v36 = vld [vmem:[#allocation10 + $0x3e0] sm:$0xff]  ;;  %v5944_v0 = vld [vmem:[#allocation10 + $0x390] sm:$0xff] }
 0x348   :  { %10250 = vmatprep.subr.mxu0 %v13533_v63  ;;  %10269 = vmatprep.subr.mxu1 %v13533_v63 }
 0x349   :  { %10251 = vmatpush3.msra.mxu0 %v5450_v56  ;;  %10270 = vmatpush3.msra.mxu1 %v5533_v15  ;;  %v6027_v56 = vld [vmem:[#allocation10 + $0x3d0] sm:$0xff]  ;;  %v5943_v15 = vld [vmem:[#allocation10 + $0x388] sm:$0xff] }
 0x34a   :  { %10252 = vmatprep.subr.mxu0 %v13533_v63  ;;  %10271 = vmatprep.subr.mxu1 %v13533_v63 }
 0x34b   :  { %10253 = vmatpush3.msra.mxu0 %v5449_v26  ;;  %10272 = vmatpush3.msra.mxu1 %v5532_v48  ;;  %v6026_v26 = vld [vmem:[#allocation10 + $0x3c8] sm:$0xff]  ;;  %v5942_v48 = vld [vmem:[#allocation10 + $0x380] sm:$0xff] }
 0x34c   :  { %10254 = vmatprep.subr.mxu0 %v13533_v63  ;;  %10273 = vmatprep.subr.mxu1 %v13533_v63 }
 0x34d   :  { %10255 = vmatpush3.msra.mxu0 %v5448_v32  ;;  %10274 = vmatpush3.msra.mxu1 %v5531_v35  ;;  %v6025_v32 = vld [vmem:[#allocation10 + $0x3c0] sm:$0xff]  ;;  %v6115_v35 = vld [vmem:[#allocation10 + $0x438] sm:$0xff] }
 0x34e   :  { %10256 = vmatprep.subr.mxu0 %v13533_v63  ;;  %10275 = vmatprep.subr.mxu1 %v13533_v63 }
 0x34f   :  { %10257 = vmatpush3.msra.mxu0 %v5447_v58  ;;  %10276 = vmatpush3.msra.mxu1 %v5530_v16  ;;  %v5941_v58 = vld [vmem:[#allocation3 + $0x38] sm:$0x3]  ;;  %v6024_v16 = vld [vmem:[#allocation3 + $0x3a] sm:$0x3] }
 0x350   :  { %10258 = vmatprep.subr.mxu0 %v13533_v63  ;;  %10277 = vmatprep.subr.mxu1 %v13533_v63 }
 0x351   :  { %10259 = vmatpush3.msra.mxu0 %v5446_v31  ;;  %10278 = vmatpush3.msra.mxu1 %v5529_v29  ;;  %v6198_v31 = vld [vmem:[#allocation10 + $0x478] sm:$0xff]  ;;  %v6114_v29 = vld [vmem:[#allocation10 + $0x430] sm:$0xff] }
 0x352   :  { %10260 = vmatprep.subr.mxu0 %v13533_v63  ;;  %10279 = vmatprep.subr.mxu1 %v13533_v63 }
 0x353   :  { %10261 = vmatpush3.msra.mxu0 %v5445_v40  ;;  %10280 = vmatpush3.msra.mxu1 %v5528_v62  ;;  %v6197_v40 = vld [vmem:[#allocation10 + $0x470] sm:$0xff]  ;;  %v6113_v62 = vld [vmem:[#allocation10 + $0x428] sm:$0xff] }
 0x354   :  { %10262 = vmatprep.subr.mxu0 %v13533_v63  ;;  %10281 = vmatprep.subr.mxu1 %v13533_v63 }
 0x355   :  { %10263 = vmatpush3.msra.mxu0 %v5444_v1  ;;  %10264 = vmatprep.mubr.msk.f32.mxu0 %vm11127_vm2, %v13533_v63  ;;  %v6196_v1 = vld [vmem:[#allocation10 + $0x468] sm:$0xff] }
 0x356   :  { %10282 = vmatpush3.msra.mxu1 %v5527_v27  ;;  %10283 = vmatprep.mubr.msk.f32.mxu1 %vm11127_vm2, %v13533_v63  ;;  %v6112_v27 = vld [vmem:[#allocation10 + $0x420] sm:$0xff] }
 0x357   :  { %10265 = vmatmul.mubr.msk.f32.vlgmr.msra.gmra.mxu0 %vm4762_vm3, %v5443_v17  ;;  %10284 = vmatmul.mubr.msk.f32.vlgmr.msra.gmra.mxu1 %vm4762_vm3, %v5526_v23  ;;  %v6111_v17 = vld [vmem:[#allocation10 + $0x418] sm:$0xff] }
 0x358   :  { %10286 = vmatprep.subr.mxu0 %v13533_v63  ;;  %10305 = vmatprep.subr.mxu1 %v13533_v63  ;;  %v6194_v23 = vld [vmem:[#allocation10 + $0x458] sm:$0xff] }
 0x359   :  { %10287 = vmatpush3.msra.mxu0 %v5617_v46  ;;  %10306 = vmatpush3.msra.mxu1 %v5700_v44  ;;  %v6195_v46 = vld [vmem:[#allocation10 + $0x460] sm:$0xff]  ;;  %v6110_v44 = vld [vmem:[#allocation10 + $0x410] sm:$0xff] }
 0x35a   :  { %10288 = vmatprep.subr.mxu0 %v13533_v63  ;;  %10307 = vmatprep.subr.mxu1 %v13533_v63 }
 0x35b   :  { %10289 = vmatpush3.msra.mxu0 %v5616_v51  ;;  %10308 = vmatpush3.msra.mxu1 %v5699_v39  ;;  %v6193_v51 = vld [vmem:[#allocation10 + $0x450] sm:$0xff]  ;;  %v6109_v39 = vld [vmem:[#allocation10 + $0x408] sm:$0xff] }
 0x35c   :  { %10290 = vmatprep.subr.mxu0 %v13533_v63  ;;  %10309 = vmatprep.subr.mxu1 %v13533_v63 }
 0x35d   :  { %10291 = vmatpush3.msra.mxu0 %v5615_v5  ;;  %10310 = vmatpush3.msra.mxu1 %v5698_v30  ;;  %v6192_v5 = vld [vmem:[#allocation10 + $0x448] sm:$0xff]  ;;  %v6108_v30 = vld [vmem:[#allocation10 + $0x400] sm:$0xff] }
 0x35e   :  { %10292 = vmatprep.subr.mxu0 %v13533_v63  ;;  %10311 = vmatprep.subr.mxu1 %v13533_v63 }
 0x35f   :  { %10293 = vmatpush3.msra.mxu0 %v5614_v9  ;;  %10312 = vmatpush3.msra.mxu1 %v5697_v52  ;;  %v6191_v9 = vld [vmem:[#allocation10 + $0x440] sm:$0xff]  ;;  %v6107_v52 = vld [vmem:[#allocation3 + $0x3c] sm:$0x3] }
 0x360   :  { %10294 = vmatprep.subr.mxu0 %v13533_v63  ;;  %10313 = vmatprep.subr.mxu1 %v13533_v63 }
 0x361   :  { %10295 = vmatpush3.msra.mxu0 %v5613_v41  ;;  %10314 = vmatpush3.msra.mxu1 %v5696_v57  ;;  %v6190_v41 = vld [vmem:[#allocation3 + $0x3e] sm:$0x3] }
 0x362   :  { %10296 = vmatprep.subr.mxu0 %v13533_v63  ;;  %10315 = vmatprep.subr.mxu1 %v13533_v63  ;;  %v6281_v57 = vld [vmem:[#allocation10 + $0x4b8] sm:$0xff] }
 0x363   :  { %10297 = vmatpush3.msra.mxu0 %v5612_v37  ;;  %10316 = vmatpush3.msra.mxu1 %v5695_v47  ;;  %v6364_v37 = vld [vmem:[#allocation10 + $0x4f8] sm:$0xff]  ;;  %v6280_v47 = vld [vmem:[#allocation10 + $0x4b0] sm:$0xff] }
 0x364   :  { %10298 = vmatprep.subr.mxu0 %v13533_v63  ;;  %10317 = vmatprep.subr.mxu1 %v13533_v63 }
 0x365   :  { %10299 = vmatpush3.msra.mxu0 %v5611_v49  ;;  %10318 = vmatpush3.msra.mxu1 %v5694_v3  ;;  %v6363_v49 = vld [vmem:[#allocation10 + $0x4f0] sm:$0xff]  ;;  %v6279_v3 = vld [vmem:[#allocation10 + $0x4a8] sm:$0xff] }
 0x366   :  { %10300 = vmatprep.subr.mxu0 %v13533_v63  ;;  %10319 = vmatprep.subr.mxu1 %v13533_v63 }
 0x367   :  { %10301 = vmatpush3.msra.mxu0 %v5610_v11  ;;  %10302 = vmatprep.mubr.msk.f32.mxu0 %vm11127_vm2, %v13533_v63  ;;  %v6362_v11 = vld [vmem:[#allocation10 + $0x4e8] sm:$0xff] }
 0x368   :  { %10320 = vmatpush3.msra.mxu1 %v5693_v8  ;;  %10321 = vmatprep.mubr.msk.f32.mxu1 %vm11127_vm2, %v13533_v63  ;;  %v6278_v8 = vld [vmem:[#allocation10 + $0x4a0] sm:$0xff] }
 0x369   :  { %10303 = vmatmul.mubr.msk.f32.vlgmr.msra.gmra.mxu0 %vm4762_vm3, %v5609_v22  ;;  %10322 = vmatmul.mubr.msk.f32.vlgmr.msra.gmra.mxu1 %vm4762_vm3, %v5692_v38  ;;  %v6277_v22 = vld [vmem:[#allocation10 + $0x498] sm:$0xff] }
 0x36a   :  { %10324 = vmatprep.subr.mxu0 %v13533_v63  ;;  %10343 = vmatprep.subr.mxu1 %v13533_v63  ;;  %v6360_v38 = vld [vmem:[#allocation10 + $0x4d8] sm:$0xff] }
 0x36b   :  { %10325 = vmatpush3.msra.mxu0 %v5783_v42  ;;  %10344 = vmatpush3.msra.mxu1 %v5866_v54  ;;  %v6361_v42 = vld [vmem:[#allocation10 + $0x4e0] sm:$0xff]  ;;  %v6276_v54 = vld [vmem:[#allocation10 + $0x490] sm:$0xff] }
 0x36c   :  { %10326 = vmatprep.subr.mxu0 %v13533_v63  ;;  %10345 = vmatprep.subr.mxu1 %v13533_v63 }
 0x36d   :  { %10327 = vmatpush3.msra.mxu0 %v5782_v18  ;;  %10346 = vmatpush3.msra.mxu1 %v5865_v53  ;;  %v6359_v18 = vld [vmem:[#allocation10 + $0x4d0] sm:$0xff]  ;;  %v6275_v53 = vld [vmem:[#allocation10 + $0x488] sm:$0xff] }
 0x36e   :  { %10328 = vmatprep.subr.mxu0 %v13533_v63  ;;  %10347 = vmatprep.subr.mxu1 %v13533_v63 }
 0x36f   :  { %10329 = vmatpush3.msra.mxu0 %v5781_v60  ;;  %10348 = vmatpush3.msra.mxu1 %v5864_v14  ;;  %v6358_v60 = vld [vmem:[#allocation10 + $0x4c8] sm:$0xff]  ;;  %v6274_v14 = vld [vmem:[#allocation10 + $0x480] sm:$0xff] }
 0x370   :  { %10330 = vmatprep.subr.mxu0 %v13533_v63  ;;  %10349 = vmatprep.subr.mxu1 %v13533_v63 }
 0x371   :  { %10331 = vmatpush3.msra.mxu0 %v5780_v45  ;;  %10350 = vmatpush3.msra.mxu1 %v5863_v61  ;;  %v6357_v45 = vld [vmem:[#allocation10 + $0x4c0] sm:$0xff]  ;;  %v6273_v61 = vld [vmem:[#allocation3 + $0x40] sm:$0x3] }
 0x372   :  { %10332 = vmatprep.subr.mxu0 %v13533_v63  ;;  %10351 = vmatprep.subr.mxu1 %v13533_v63 }
 0x373   :  { %10333 = vmatpush3.msra.mxu0 %v5779_v59  ;;  %10352 = vmatpush3.msra.mxu1 %v5862_v43  ;;  %v6356_v59 = vld [vmem:[#allocation3 + $0x42] sm:$0x3] }
 0x374   :  { %10334 = vmatprep.subr.mxu0 %v13533_v63  ;;  %10353 = vmatprep.subr.mxu1 %v13533_v63  ;;  %v6447_v43 = vld [vmem:[#allocation10 + $0x538] sm:$0xff] }
 0x375   :  { %10335 = vmatpush3.msra.mxu0 %v5778_v24  ;;  %10354 = vmatpush3.msra.mxu1 %v5861_v28  ;;  %v6530_v24 = vld [vmem:[#allocation10 + $0x578] sm:$0xff]  ;;  %v6446_v28 = vld [vmem:[#allocation10 + $0x530] sm:$0xff] }
 0x376   :  { %10336 = vmatprep.subr.mxu0 %v13533_v63  ;;  %10355 = vmatprep.subr.mxu1 %v13533_v63 }
 0x377   :  { %10337 = vmatpush3.msra.mxu0 %v5777_v10  ;;  %10356 = vmatpush3.msra.mxu1 %v5860_v34  ;;  %v6529_v10 = vld [vmem:[#allocation10 + $0x570] sm:$0xff]  ;;  %v6445_v34 = vld [vmem:[#allocation10 + $0x528] sm:$0xff] }
 0x378   :  { %10338 = vmatprep.subr.mxu0 %v13533_v63  ;;  %10357 = vmatprep.subr.mxu1 %v13533_v63 }
 0x379   :  { %10339 = vmatpush3.msra.mxu0 %v5776_v2  ;;  %10340 = vmatprep.mubr.msk.f32.mxu0 %vm11127_vm2, %v13533_v63  ;;  %v6528_v2 = vld [vmem:[#allocation10 + $0x568] sm:$0xff] }
 0x37a   :  { %10358 = vmatpush3.msra.mxu1 %v5859_v19  ;;  %10359 = vmatprep.mubr.msk.f32.mxu1 %vm11127_vm2, %v13533_v63  ;;  %v6444_v19 = vld [vmem:[#allocation10 + $0x520] sm:$0xff] }
 0x37b   :  { %10341 = vmatmul.mubr.msk.f32.vlgmr.msra.gmra.mxu0 %vm4762_vm3, %v5775_v21  ;;  %10360 = vmatmul.mubr.msk.f32.vlgmr.msra.gmra.mxu1 %vm4762_vm3, %v5858_v7  ;;  %v6443_v21 = vld [vmem:[#allocation10 + $0x518] sm:$0xff] }
 0x37c   :  { %10362 = vmatprep.subr.mxu0 %v13533_v63  ;;  %10381 = vmatprep.subr.mxu1 %v13533_v63  ;;  %v6526_v7 = vld [vmem:[#allocation10 + $0x558] sm:$0xff] }
 0x37d   :  { %10363 = vmatpush3.msra.mxu0 %v5949_v25  ;;  %10382 = vmatpush3.msra.mxu1 %v6032_v6  ;;  %v6527_v25 = vld [vmem:[#allocation10 + $0x560] sm:$0xff]  ;;  %v6442_v6 = vld [vmem:[#allocation10 + $0x510] sm:$0xff] }
 0x37e   :  { %10364 = vmatprep.subr.mxu0 %v13533_v63  ;;  %10383 = vmatprep.subr.mxu1 %v13533_v63 }
 0x37f   :  { %10365 = vmatpush3.msra.mxu0 %v5948_v20  ;;  %10384 = vmatpush3.msra.mxu1 %v6031_v33  ;;  %v6525_v20 = vld [vmem:[#allocation10 + $0x550] sm:$0xff]  ;;  %v6441_v33 = vld [vmem:[#allocation10 + $0x508] sm:$0xff] }
 0x380   :  { %10366 = vmatprep.subr.mxu0 %v13533_v63  ;;  %10385 = vmatprep.subr.mxu1 %v13533_v63 }
 0x381   :  { %10367 = vmatpush3.msra.mxu0 %v5947_v55  ;;  %10386 = vmatpush3.msra.mxu1 %v6030_v12  ;;  %v6524_v55 = vld [vmem:[#allocation10 + $0x548] sm:$0xff]  ;;  %v6440_v12 = vld [vmem:[#allocation10 + $0x500] sm:$0xff] }
 0x382   :  { %10368 = vmatprep.subr.mxu0 %v13533_v63  ;;  %10387 = vmatprep.subr.mxu1 %v13533_v63 }
 0x383   :  { %10369 = vmatpush3.msra.mxu0 %v5946_v4  ;;  %10388 = vmatpush3.msra.mxu1 %v6029_v36  ;;  %v6523_v4 = vld [vmem:[#allocation10 + $0x540] sm:$0xff] }
 0x384   :  { %10370 = vmatprep.subr.mxu0 %v13533_v63  ;;  %10389 = vmatprep.subr.mxu1 %v13533_v63  ;;  %v6522_v36 = vld [vmem:[#allocation3 + $0x4a] sm:$0x3] }
 0x385   :  { %10371 = vmatpush3.msra.mxu0 %v5945_v13  ;;  %10390 = vmatpush3.msra.mxu1 %v6028_v50  ;;  %v6439_v13 = vld [vmem:[#allocation3 + $0x44] sm:$0x3]  ;;  %v6613_v50 = vld [vmem:[#allocation10 + $0x5b8] sm:$0xff] }
 0x386   :  { %10372 = vmatprep.subr.mxu0 %v13533_v63  ;;  %10391 = vmatprep.subr.mxu1 %v13533_v63 }
 0x387   :  { %10373 = vmatpush3.msra.mxu0 %v5944_v0  ;;  %10392 = vmatpush3.msra.mxu1 %v6027_v56  ;;  %v6696_v0 = vld [vmem:[#allocation10 + $0x5f8] sm:$0xff]  ;;  %v6612_v56 = vld [vmem:[#allocation10 + $0x5b0] sm:$0xff] }
 0x388   :  { %10374 = vmatprep.subr.mxu0 %v13533_v63  ;;  %10393 = vmatprep.subr.mxu1 %v13533_v63 }
 0x389   :  { %10375 = vmatpush3.msra.mxu0 %v5943_v15  ;;  %10394 = vmatpush3.msra.mxu1 %v6026_v26  ;;  %v6695_v15 = vld [vmem:[#allocation10 + $0x5f0] sm:$0xff]  ;;  %v6611_v26 = vld [vmem:[#allocation10 + $0x5a8] sm:$0xff] }
 0x38a   :  { %10376 = vmatprep.subr.mxu0 %v13533_v63  ;;  %10395 = vmatprep.subr.mxu1 %v13533_v63 }
 0x38b   :  { %10377 = vmatpush3.msra.mxu0 %v5942_v48  ;;  %10378 = vmatprep.mubr.msk.f32.mxu0 %vm11127_vm2, %v13533_v63  ;;  %v6694_v48 = vld [vmem:[#allocation10 + $0x5e8] sm:$0xff] }
 0x38c   :  { %10396 = vmatpush3.msra.mxu1 %v6025_v32  ;;  %10397 = vmatprep.mubr.msk.f32.mxu1 %vm11127_vm2, %v13533_v63  ;;  %v6610_v32 = vld [vmem:[#allocation10 + $0x5a0] sm:$0xff] }
 0x38d   :  { %10379 = vmatmul.mubr.msk.f32.vlgmr.msra.gmra.mxu0 %vm4762_vm3, %v5941_v58  ;;  %10398 = vmatmul.mubr.msk.f32.vlgmr.msra.gmra.mxu1 %vm4762_vm3, %v6024_v16  ;;  %v6609_v58 = vld [vmem:[#allocation10 + $0x598] sm:$0xff] }
 0x38e   :  { %10400 = vmatprep.subr.mxu0 %v13533_v63  ;;  %10419 = vmatprep.subr.mxu1 %v13533_v63  ;;  %v6692_v16 = vld [vmem:[#allocation10 + $0x5d8] sm:$0xff] }
 0x38f   :  { %10401 = vmatpush3.msra.mxu0 %v6115_v35  ;;  %10420 = vmatpush3.msra.mxu1 %v6198_v31  ;;  %v6693_v35 = vld [vmem:[#allocation10 + $0x5e0] sm:$0xff]  ;;  %v6608_v31 = vld [vmem:[#allocation10 + $0x590] sm:$0xff] }
 0x390   :  { %10402 = vmatprep.subr.mxu0 %v13533_v63  ;;  %10421 = vmatprep.subr.mxu1 %v13533_v63 }
 0x391   :  { %10403 = vmatpush3.msra.mxu0 %v6114_v29  ;;  %10422 = vmatpush3.msra.mxu1 %v6197_v40  ;;  %v6691_v29 = vld [vmem:[#allocation10 + $0x5d0] sm:$0xff]  ;;  %v6607_v40 = vld [vmem:[#allocation10 + $0x588] sm:$0xff] }
 0x392   :  { %10404 = vmatprep.subr.mxu0 %v13533_v63  ;;  %10423 = vmatprep.subr.mxu1 %v13533_v63 }
 0x393   :  { %10405 = vmatpush3.msra.mxu0 %v6113_v62  ;;  %10424 = vmatpush3.msra.mxu1 %v6196_v1  ;;  %v6690_v62 = vld [vmem:[#allocation10 + $0x5c8] sm:$0xff]  ;;  %v6606_v1 = vld [vmem:[#allocation10 + $0x580] sm:$0xff] }
 0x394   :  { %10406 = vmatprep.subr.mxu0 %v13533_v63  ;;  %10425 = vmatprep.subr.mxu1 %v13533_v63 }
 0x395   :  { %10407 = vmatpush3.msra.mxu0 %v6112_v27  ;;  %10426 = vmatpush3.msra.mxu1 %v6195_v46 }
 0x396   :  { %10408 = vmatprep.subr.mxu0 %v13533_v63  ;;  %10427 = vmatprep.subr.mxu1 %v13533_v63 }
 0x397   :  { %10409 = vmatpush3.msra.mxu0 %v6111_v17  ;;  %10428 = vmatpush3.msra.mxu1 %v6194_v23  ;;  %v6689_v17 = vld [vmem:[#allocation10 + $0x5c0] sm:$0xff] }
 0x398   :  { %10410 = vmatprep.subr.mxu0 %v13533_v63  ;;  %10429 = vmatprep.subr.mxu1 %v13533_v63 }
 0x399   :  { %10411 = vmatpush3.msra.mxu0 %v6110_v44  ;;  %10430 = vmatpush3.msra.mxu1 %v6193_v51 }
 0x39a   :  { %10412 = vmatprep.subr.mxu0 %v13533_v63  ;;  %10431 = vmatprep.subr.mxu1 %v13533_v63 }
 0x39b   :  { %10413 = vmatpush3.msra.mxu0 %v6109_v39  ;;  %10432 = vmatpush3.msra.mxu1 %v6192_v5  ;;  %v6605_v39 = vld [vmem:[#allocation3 + $0x4c] sm:$0x3]  ;;  %v6688_v5 = vld [vmem:[#allocation3 + $0x4e] sm:$0x3] }
 0x39c   :  { %10414 = vmatprep.subr.mxu0 %v13533_v63  ;;  %10433 = vmatprep.subr.mxu1 %v13533_v63 }
 0x39d   :  { %10415 = vmatpush3.msra.mxu0 %v6108_v30  ;;  %10416 = vmatprep.mubr.msk.f32.mxu0 %vm11127_vm2, %v13533_v63  ;;  %v6779_v30 = vld [vmem:[#allocation10 + $0x638] sm:$0xff] }
 0x39e   :  { %10434 = vmatpush3.msra.mxu1 %v6191_v9  ;;  %10435 = vmatprep.mubr.msk.f32.mxu1 %vm11127_vm2, %v13533_v63  ;;  %v6862_v9 = vld [vmem:[#allocation10 + $0x678] sm:$0xff] }
 0x39f   :  { %10417 = vmatmul.mubr.msk.f32.vlgmr.msra.gmra.mxu0 %vm4762_vm3, %v6107_v52  ;;  %10436 = vmatmul.mubr.msk.f32.vlgmr.msra.gmra.mxu1 %vm4762_vm3, %v6190_v41  ;;  %v6778_v52 = vld [vmem:[#allocation10 + $0x630] sm:$0xff] }
 0x3a0   :  { %10438 = vmatprep.subr.mxu0 %v13533_v63  ;;  %10457 = vmatprep.subr.mxu1 %v13533_v63  ;;  %v6861_v41 = vld [vmem:[#allocation10 + $0x670] sm:$0xff] }
 0x3a1   :  { %10439 = vmatpush3.msra.mxu0 %v6281_v57  ;;  %10458 = vmatpush3.msra.mxu1 %v6364_v37  ;;  %v6777_v57 = vld [vmem:[#allocation10 + $0x628] sm:$0xff] }
 0x3a2   :  { %10440 = vmatprep.subr.mxu0 %v13533_v63  ;;  %10459 = vmatprep.subr.mxu1 %v13533_v63  ;;  %v6860_v37 = vld [vmem:[#allocation10 + $0x668] sm:$0xff] }
 0x3a3   :  { %10441 = vmatpush3.msra.mxu0 %v6280_v47  ;;  %10460 = vmatpush3.msra.mxu1 %v6363_v49  ;;  %v6776_v47 = vld [vmem:[#allocation10 + $0x620] sm:$0xff] }
 0x3a4   :  { %10442 = vmatprep.subr.mxu0 %v13533_v63  ;;  %10461 = vmatprep.subr.mxu1 %v13533_v63  ;;  %v6859_v49 = vld [vmem:[#allocation10 + $0x660] sm:$0xff] }
 0x3a5   :  { %10443 = vmatpush3.msra.mxu0 %v6279_v3  ;;  %10462 = vmatpush3.msra.mxu1 %v6362_v11  ;;  %v6775_v3 = vld [vmem:[#allocation10 + $0x618] sm:$0xff] }
 0x3a6   :  { %10444 = vmatprep.subr.mxu0 %v13533_v63  ;;  %10463 = vmatprep.subr.mxu1 %v13533_v63  ;;  %v6858_v11 = vld [vmem:[#allocation10 + $0x658] sm:$0xff] }
 0x3a7   :  { %10445 = vmatpush3.msra.mxu0 %v6278_v8  ;;  %10464 = vmatpush3.msra.mxu1 %v6361_v42  ;;  %v6774_v8 = vld [vmem:[#allocation10 + $0x610] sm:$0xff] }
 0x3a8   :  { %10446 = vmatprep.subr.mxu0 %v13533_v63  ;;  %10465 = vmatprep.subr.mxu1 %v13533_v63  ;;  %v6857_v42 = vld [vmem:[#allocation10 + $0x650] sm:$0xff] }
 0x3a9   :  { %10447 = vmatpush3.msra.mxu0 %v6277_v22  ;;  %10466 = vmatpush3.msra.mxu1 %v6360_v38  ;;  %v6773_v22 = vld [vmem:[#allocation10 + $0x608] sm:$0xff] }
 0x3aa   :  { %10448 = vmatprep.subr.mxu0 %v13533_v63  ;;  %10467 = vmatprep.subr.mxu1 %v13533_v63  ;;  %v6856_v38 = vld [vmem:[#allocation10 + $0x648] sm:$0xff] }
 0x3ab   :  { %10449 = vmatpush3.msra.mxu0 %v6276_v54  ;;  %10468 = vmatpush3.msra.mxu1 %v6359_v18 }
 0x3ac   :  { %10450 = vmatprep.subr.mxu0 %v13533_v63  ;;  %10469 = vmatprep.subr.mxu1 %v13533_v63 }
 0x3ad   :  { %10451 = vmatpush3.msra.mxu0 %v6275_v53  ;;  %10470 = vmatpush3.msra.mxu1 %v6358_v60  ;;  %v6772_v53 = vld [vmem:[#allocation10 + $0x600] sm:$0xff] }
 0x3ae   :  { %10452 = vmatprep.subr.mxu0 %v13533_v63  ;;  %10471 = vmatprep.subr.mxu1 %v13533_v63 }
 0x3af   :  { %10453 = vmatpush3.msra.mxu0 %v6274_v14  ;;  %10454 = vmatprep.mubr.msk.f32.mxu0 %vm11127_vm2, %v13533_v63  ;;  %v6855_v14 = vld [vmem:[#allocation10 + $0x640] sm:$0xff] }
 0x3b0   :  { %10472 = vmatpush3.msra.mxu1 %v6357_v45  ;;  %10473 = vmatprep.mubr.msk.f32.mxu1 %vm11127_vm2, %v13533_v63 }
 0x3b1   :  { %10455 = vmatmul.mubr.msk.f32.vlgmr.msra.gmra.mxu0 %vm4762_vm3, %v6273_v61  ;;  %10474 = vmatmul.mubr.msk.f32.vlgmr.msra.gmra.mxu1 %vm4762_vm3, %v6356_v59 }
 0x3b2   :  { %10476 = vmatprep.subr.mxu0 %v13533_v63  ;;  %10495 = vmatprep.subr.mxu1 %v13533_v63 }
 0x3b3   :  { %10477 = vmatpush3.msra.mxu0 %v6447_v43  ;;  %10496 = vmatpush3.msra.mxu1 %v6530_v24  ;;  %v6771_v43 = vld [vmem:[#allocation3 + $0x50] sm:$0x3]  ;;  %v6854_v24 = vld [vmem:[#allocation3 + $0x52] sm:$0x3] }
 0x3b4   :  { %10478 = vmatprep.subr.mxu0 %v13533_v63  ;;  %10497 = vmatprep.subr.mxu1 %v13533_v63 }
 0x3b5   :  { %10479 = vmatpush3.msra.mxu0 %v6446_v28  ;;  %10498 = vmatpush3.msra.mxu1 %v6529_v10  ;;  %v6945_v28 = vld [vmem:[#allocation10 + $0x6b8] sm:$0xff] }
 0x3b6   :  { %10480 = vmatprep.subr.mxu0 %v13533_v63  ;;  %10499 = vmatprep.subr.mxu1 %v13533_v63  ;;  %v7028_v10 = vld [vmem:[#allocation10 + $0x6f8] sm:$0xff] }
 0x3b7   :  { %10481 = vmatpush3.msra.mxu0 %v6445_v34  ;;  %10500 = vmatpush3.msra.mxu1 %v6528_v2  ;;  %v6944_v34 = vld [vmem:[#allocation10 + $0x6b0] sm:$0xff] }
 0x3b8   :  { %10482 = vmatprep.subr.mxu0 %v13533_v63  ;;  %10501 = vmatprep.subr.mxu1 %v13533_v63  ;;  %v7027_v2 = vld [vmem:[#allocation10 + $0x6f0] sm:$0xff] }
 0x3b9   :  { %10483 = vmatpush3.msra.mxu0 %v6444_v19  ;;  %10502 = vmatpush3.msra.mxu1 %v6527_v25  ;;  %v6943_v19 = vld [vmem:[#allocation10 + $0x6a8] sm:$0xff] }
 0x3ba   :  { %10484 = vmatprep.subr.mxu0 %v13533_v63  ;;  %10503 = vmatprep.subr.mxu1 %v13533_v63  ;;  %v7026_v25 = vld [vmem:[#allocation10 + $0x6e8] sm:$0xff] }
 0x3bb   :  { %10485 = vmatpush3.msra.mxu0 %v6443_v21  ;;  %10504 = vmatpush3.msra.mxu1 %v6526_v7  ;;  %v6942_v21 = vld [vmem:[#allocation10 + $0x6a0] sm:$0xff] }
 0x3bc   :  { %10486 = vmatprep.subr.mxu0 %v13533_v63  ;;  %10505 = vmatprep.subr.mxu1 %v13533_v63  ;;  %v7025_v7 = vld [vmem:[#allocation10 + $0x6e0] sm:$0xff] }
 0x3bd   :  { %10487 = vmatpush3.msra.mxu0 %v6442_v6  ;;  %10506 = vmatpush3.msra.mxu1 %v6525_v20  ;;  %v6941_v6 = vld [vmem:[#allocation10 + $0x698] sm:$0xff] }
 0x3be   :  { %10488 = vmatprep.subr.mxu0 %v13533_v63  ;;  %10507 = vmatprep.subr.mxu1 %v13533_v63  ;;  %v7024_v20 = vld [vmem:[#allocation10 + $0x6d8] sm:$0xff] }
 0x3bf   :  { %10489 = vmatpush3.msra.mxu0 %v6441_v33  ;;  %10508 = vmatpush3.msra.mxu1 %v6524_v55  ;;  %v6940_v33 = vld [vmem:[#allocation10 + $0x690] sm:$0xff] }
 0x3c0   :  { %10490 = vmatprep.subr.mxu0 %v13533_v63  ;;  %10509 = vmatprep.subr.mxu1 %v13533_v63  ;;  %v7023_v55 = vld [vmem:[#allocation10 + $0x6d0] sm:$0xff] }
 0x3c1   :  { %10491 = vmatpush3.msra.mxu0 %v6440_v12  ;;  %10492 = vmatprep.mubr.msk.f32.mxu0 %vm11127_vm2, %v13533_v63  ;;  %v6939_v12 = vld [vmem:[#allocation10 + $0x688] sm:$0xff] }
 0x3c2   :  { %10510 = vmatpush3.msra.mxu1 %v6523_v4  ;;  %10511 = vmatprep.mubr.msk.f32.mxu1 %vm11127_vm2, %v13533_v63  ;;  %v7022_v4 = vld [vmem:[#allocation10 + $0x6c8] sm:$0xff] }
 0x3c3   :  { %10493 = vmatmul.mubr.msk.f32.vlgmr.msra.gmra.mxu0 %vm4762_vm3, %v6439_v13  ;;  %10512 = vmatmul.mubr.msk.f32.vlgmr.msra.gmra.mxu1 %vm4762_vm3, %v6522_v36 }
 0x3c4   :  { %10514 = vmatprep.subr.mxu0 %v13533_v63  ;;  %10533 = vmatprep.subr.mxu1 %v13533_v63 }
 0x3c5   :  { %10515 = vmatpush3.msra.mxu0 %v6613_v50  ;;  %10534 = vmatpush3.msra.mxu1 %v6696_v0  ;;  %v6938_v50 = vld [vmem:[#allocation10 + $0x680] sm:$0xff] }
 0x3c6   :  { %10516 = vmatprep.subr.mxu0 %v13533_v63  ;;  %10535 = vmatprep.subr.mxu1 %v13533_v63 }
 0x3c7   :  { %10517 = vmatpush3.msra.mxu0 %v6612_v56  ;;  %10536 = vmatpush3.msra.mxu1 %v6695_v15  ;;  %v7021_v56 = vld [vmem:[#allocation10 + $0x6c0] sm:$0xff] }
 0x3c8   :  { %10518 = vmatprep.subr.mxu0 %v13533_v63  ;;  %10537 = vmatprep.subr.mxu1 %v13533_v63 }
 0x3c9   :  { %10519 = vmatpush3.msra.mxu0 %v6611_v26  ;;  %10538 = vmatpush3.msra.mxu1 %v6694_v48 }
 0x3ca   :  { %10520 = vmatprep.subr.mxu0 %v13533_v63  ;;  %10539 = vmatprep.subr.mxu1 %v13533_v63 }
 0x3cb   :  { %10521 = vmatpush3.msra.mxu0 %v6610_v32  ;;  %10540 = vmatpush3.msra.mxu1 %v6693_v35  ;;  %v6937_v32 = vld [vmem:[#allocation3 + $0x54] sm:$0x3]  ;;  %v7020_v35 = vld [vmem:[#allocation3 + $0x56] sm:$0x3] }
 0x3cc   :  { %10522 = vmatprep.subr.mxu0 %v13533_v63  ;;  %10541 = vmatprep.subr.mxu1 %v13533_v63 }
 0x3cd   :  { %10523 = vmatpush3.msra.mxu0 %v6609_v58  ;;  %10542 = vmatpush3.msra.mxu1 %v6692_v16  ;;  %v7111_v58 = vld [vmem:[#allocation10 + $0x738] sm:$0xff] }
 0x3ce   :  { %10524 = vmatprep.subr.mxu0 %v13533_v63  ;;  %10543 = vmatprep.subr.mxu1 %v13533_v63  ;;  %v7194_v16 = vld [vmem:[#allocation10 + $0x778] sm:$0xff] }
 0x3cf   :  { %10525 = vmatpush3.msra.mxu0 %v6608_v31  ;;  %10544 = vmatpush3.msra.mxu1 %v6691_v29  ;;  %v7110_v31 = vld [vmem:[#allocation10 + $0x730] sm:$0xff] }
 0x3d0   :  { %10526 = vmatprep.subr.mxu0 %v13533_v63  ;;  %10545 = vmatprep.subr.mxu1 %v13533_v63  ;;  %v4868_v27 = vpop.f32.mrf.mxu0  ;;  %v4941_v46 = vpop.f32.mrf.mxu1  ;;  %v7193_v29 = vld [vmem:[#allocation10 + $0x770] sm:$0xff] }
 0x3d1   :  { %10527 = vmatpush3.msra.mxu0 %v6607_v40  ;;  %10546 = vmatpush3.msra.mxu1 %v6690_v62  ;;  %v4942_v23 = vadd.f32 %v4941_v46, %v4868_v27  ;;  %v7109_v40 = vld [vmem:[#allocation10 + $0x728] sm:$0xff]  ;;  %v7191_v27 = vld [vmem:[#allocation10 + $0x760] sm:$0xff]  ;;  %v7107_v46 = vld [vmem:[#allocation10 + $0x718] sm:$0xff] }
 0x3d2   :  { %10528 = vmatprep.subr.mxu0 %v13533_v63  ;;  %10547 = vmatprep.subr.mxu1 %v13533_v63  ;;  %v10114_v44 = vpop.f32.mrf.mxu0  ;;  %v10133_v51 = vpop.f32.mrf.mxu1  ;;  %v7192_v62 = vld [vmem:[#allocation10 + $0x768] sm:$0xff] }
 0x3d3   :  { %10529 = vmatpush3.msra.mxu0 %v6606_v1  ;;  %10530 = vmatprep.mubr.msk.f32.mxu0 %vm11127_vm2, %v13533_v63  ;;  %v7108_v1 = vld [vmem:[#allocation10 + $0x720] sm:$0xff]  ;;  %v7189_v44 = vld [vmem:[#allocation10 + $0x750] sm:$0xff]  ;;  %v7105_v51 = vld [vmem:[#allocation10 + $0x708] sm:$0xff] }
 0x3d4   :  { %10548 = vmatpush3.msra.mxu1 %v6689_v17  ;;  %10549 = vmatprep.mubr.msk.f32.mxu1 %vm11127_vm2, %v13533_v63  ;;  %v7190_v17 = vld [vmem:[#allocation10 + $0x758] sm:$0xff] }
 0x3d5   :  { %10531 = vmatmul.mubr.msk.f32.vlgmr.msra.gmra.mxu0 %vm4762_vm3, %v6605_v39  ;;  %10550 = vmatmul.mubr.msk.f32.vlgmr.msra.gmra.mxu1 %vm4762_vm3, %v6688_v5  ;;  %v7188_v39 = vld [vmem:[#allocation10 + $0x748] sm:$0xff] }
 0x3d6   :  { %10552 = vmatprep.subr.mxu0 %v13533_v63  ;;  %10571 = vmatprep.subr.mxu1 %v13533_v63 }
 0x3d7   :  { %10553 = vmatpush3.msra.mxu0 %v6779_v30  ;;  %10572 = vmatpush3.msra.mxu1 %v6862_v9  ;;  %v7104_v9 = vld [vmem:[#allocation10 + $0x700] sm:$0xff] }
 0x3d8   :  { %10554 = vmatprep.subr.mxu0 %v13533_v63  ;;  %10573 = vmatprep.subr.mxu1 %v13533_v63 }
 0x3d9   :  { %10555 = vmatpush3.msra.mxu0 %v6778_v52  ;;  %10574 = vmatpush3.msra.mxu1 %v6861_v41  ;;  %v7187_v41 = vld [vmem:[#allocation10 + $0x740] sm:$0xff] }
 0x3da   :  { %10556 = vmatprep.subr.mxu0 %v13533_v63  ;;  %10575 = vmatprep.subr.mxu1 %v13533_v63 }
 0x3db   :  { %10557 = vmatpush3.msra.mxu0 %v6777_v57  ;;  %10576 = vmatpush3.msra.mxu1 %v6860_v37 }
 0x3dc   :  { %10558 = vmatprep.subr.mxu0 %v13533_v63  ;;  %10577 = vmatprep.subr.mxu1 %v13533_v63 }
 0x3dd   :  { %10559 = vmatpush3.msra.mxu0 %v6776_v47  ;;  %10578 = vmatpush3.msra.mxu1 %v6859_v49  ;;  %v7103_v49 = vld [vmem:[#allocation3 + $0x5c] sm:$0x3] }
 0x3de   :  { %10560 = vmatprep.subr.mxu0 %v13533_v63  ;;  %10579 = vmatprep.subr.mxu1 %v13533_v63 }
 0x3df   :  { %10561 = vmatpush3.msra.mxu0 %v6775_v3  ;;  %10580 = vmatpush3.msra.mxu1 %v6858_v11  ;;  %v7186_v3 = vld [vmem:[#allocation3 + $0x5e] sm:$0x3] }
 0x3e0   :  { %10562 = vmatprep.subr.mxu0 %v13533_v63  ;;  %10581 = vmatprep.subr.mxu1 %v13533_v63  ;;  %v7277_v11 = vld [vmem:[#allocation10 + $0x7b8] sm:$0xff] }
 0x3e1   :  { %10563 = vmatpush3.msra.mxu0 %v6774_v8  ;;  %10582 = vmatpush3.msra.mxu1 %v6857_v42  ;;  %v5023_v54 = vpop.f32.mrf.mxu0  ;;  %v5106_v18 = vpop.f32.mrf.mxu1  ;;  %v7360_v8 = vld [vmem:[#allocation10 + $0x7f8] sm:$0xff]  ;;  %v7276_v42 = vld [vmem:[#allocation10 + $0x7b0] sm:$0xff] }
 0x3e2   :  { %10564 = vmatprep.subr.mxu0 %v13533_v63  ;;  %10583 = vmatprep.subr.mxu1 %v13533_v63  ;;  %v5027_v60 = vadd.f32 %v5023_v54, %v4942_v23  ;;  %v7106_v23 = vld [vmem:[#allocation10 + $0x710] sm:$0xff]  ;;  %v7358_v54 = vld [vmem:[#allocation10 + $0x7e8] sm:$0xff] }
 0x3e3   :  { %10565 = vmatpush3.msra.mxu0 %v6773_v22  ;;  %10584 = vmatpush3.msra.mxu1 %v6856_v38  ;;  %v10152_v45 = vpop.f32.mrf.mxu0  ;;  %v10171_v61 = vpop.f32.mrf.mxu1  ;;  %v7359_v22 = vld [vmem:[#allocation10 + $0x7f0] sm:$0xff]  ;;  %v7275_v38 = vld [vmem:[#allocation10 + $0x7a8] sm:$0xff] }
 0x3e4   :  { %10566 = vmatprep.subr.mxu0 %v13533_v63  ;;  %10585 = vmatprep.subr.mxu1 %v13533_v63  ;;  %v5110_v59 = vadd.f32 %v5106_v18, %v5027_v60  ;;  %v7274_v18 = vld [vmem:[#allocation10 + $0x7a0] sm:$0xff]  ;;  %v7273_v60 = vld [vmem:[#allocation10 + $0x798] sm:$0xff]  ;;  %v7272_v45 = vld [vmem:[#allocation10 + $0x790] sm:$0xff] }
 0x3e5   :  { %10567 = vmatpush3.msra.mxu0 %v6772_v53  ;;  %10568 = vmatprep.mubr.msk.f32.mxu0 %vm11127_vm2, %v13533_v63  ;;  %v7357_v53 = vld [vmem:[#allocation10 + $0x7e0] sm:$0xff]  ;;  %v7355_v61 = vld [vmem:[#allocation10 + $0x7d0] sm:$0xff] }
 0x3e6   :  { %10586 = vmatpush3.msra.mxu1 %v6855_v14  ;;  %10587 = vmatprep.mubr.msk.f32.mxu1 %vm11127_vm2, %v13533_v63  ;;  %v7356_v14 = vld [vmem:[#allocation10 + $0x7d8] sm:$0xff] }
 0x3e7   :  { %10569 = vmatmul.mubr.msk.f32.vlgmr.msra.gmra.mxu0 %vm4762_vm3, %v6771_v43  ;;  %10588 = vmatmul.mubr.msk.f32.vlgmr.msra.gmra.mxu1 %vm4762_vm3, %v6854_v24  ;;  %v7354_v43 = vld [vmem:[#allocation10 + $0x7c8] sm:$0xff] }
 0x3e8   :  { %10590 = vmatprep.subr.mxu0 %v13533_v63  ;;  %10609 = vmatprep.subr.mxu1 %v13533_v63 }
 0x3e9   :  { %10591 = vmatpush3.msra.mxu0 %v6945_v28  ;;  %10610 = vmatpush3.msra.mxu1 %v7028_v10  ;;  %v7270_v10 = vld [vmem:[#allocation10 + $0x780] sm:$0xff] }
 0x3ea   :  { %10592 = vmatprep.subr.mxu0 %v13533_v63  ;;  %10611 = vmatprep.subr.mxu1 %v13533_v63 }
 0x3eb   :  { %10593 = vmatpush3.msra.mxu0 %v6944_v34  ;;  %10612 = vmatpush3.msra.mxu1 %v7027_v2  ;;  %v7353_v2 = vld [vmem:[#allocation10 + $0x7c0] sm:$0xff] }
 0x3ec   :  { %10594 = vmatprep.subr.mxu0 %v13533_v63  ;;  %10613 = vmatprep.subr.mxu1 %v13533_v63 }
 0x3ed   :  { %10595 = vmatpush3.msra.mxu0 %v6943_v19  ;;  %10614 = vmatpush3.msra.mxu1 %v7026_v25 }
 0x3ee   :  { %10596 = vmatprep.subr.mxu0 %v13533_v63  ;;  %10615 = vmatprep.subr.mxu1 %v13533_v63 }
 0x3ef   :  { %10597 = vmatpush3.msra.mxu0 %v6942_v21  ;;  %10616 = vmatpush3.msra.mxu1 %v7025_v7  ;;  %v7269_v7 = vld [vmem:[#allocation3 + $0x60] sm:$0x3] }
 0x3f0   :  { %10598 = vmatprep.subr.mxu0 %v13533_v63  ;;  %10617 = vmatprep.subr.mxu1 %v13533_v63 }
 0x3f1   :  { %10599 = vmatpush3.msra.mxu0 %v6941_v6  ;;  %10618 = vmatpush3.msra.mxu1 %v7024_v20  ;;  %v7352_v6 = vld [vmem:[#allocation3 + $0x62] sm:$0x3] }
 0x3f2   :  { %10600 = vmatprep.subr.mxu0 %v13533_v63  ;;  %10619 = vmatprep.subr.mxu1 %v13533_v63  ;;  %v7443_v20 = vld [vmem:[#allocation10 + $0x838] sm:$0xff] }
 0x3f3   :  { %10601 = vmatpush3.msra.mxu0 %v6940_v33  ;;  %10620 = vmatpush3.msra.mxu1 %v7023_v55  ;;  %v5189_v36 = vpop.f32.mrf.mxu0  ;;  %v5272_v13 = vpop.f32.mrf.mxu1  ;;  %v7526_v33 = vld [vmem:[#allocation10 + $0x878] sm:$0xff]  ;;  %v7442_v55 = vld [vmem:[#allocation10 + $0x830] sm:$0xff] }
 0x3f4   :  { %10602 = vmatprep.subr.mxu0 %v13533_v63  ;;  %10621 = vmatprep.subr.mxu1 %v13533_v63  ;;  %v5193_v0 = vadd.f32 %v5189_v36, %v5110_v59  ;;  %v7271_v59 = vld [vmem:[#allocation10 + $0x788] sm:$0xff] }
 0x3f5   :  { %10603 = vmatpush3.msra.mxu0 %v6939_v12  ;;  %10622 = vmatpush3.msra.mxu1 %v7022_v4  ;;  %v10190_v15 = vpop.f32.mrf.mxu0  ;;  %v10209_v26 = vpop.f32.mrf.mxu1  ;;  %v7525_v12 = vld [vmem:[#allocation10 + $0x870] sm:$0xff]  ;;  %v7441_v4 = vld [vmem:[#allocation10 + $0x828] sm:$0xff] }
 0x3f6   :  { %10604 = vmatprep.subr.mxu0 %v13533_v63  ;;  %10623 = vmatprep.subr.mxu1 %v13533_v63  ;;  %v5276_v48 = vadd.f32 %v5272_v13, %v5193_v0  ;;  %v7524_v36 = vld [vmem:[#allocation10 + $0x868] sm:$0xff]  ;;  %v7440_v13 = vld [vmem:[#allocation10 + $0x820] sm:$0xff]  ;;  %v7439_v0 = vld [vmem:[#allocation10 + $0x818] sm:$0xff] }
 0x3f7   :  { %10605 = vmatpush3.msra.mxu0 %v6938_v50  ;;  %10606 = vmatprep.mubr.msk.f32.mxu0 %vm11127_vm2, %v13533_v63  ;;  %v7523_v50 = vld [vmem:[#allocation10 + $0x860] sm:$0xff]  ;;  %v7438_v15 = vld [vmem:[#allocation10 + $0x810] sm:$0xff] }
 0x3f8   :  { %10624 = vmatpush3.msra.mxu1 %v7021_v56  ;;  %10625 = vmatprep.mubr.msk.f32.mxu1 %vm11127_vm2, %v13533_v63  ;;  %v7522_v56 = vld [vmem:[#allocation10 + $0x858] sm:$0xff]  ;;  %v7521_v26 = vld [vmem:[#allocation10 + $0x850] sm:$0xff] }
 0x3f9   :  { %10607 = vmatmul.mubr.msk.f32.vlgmr.msra.gmra.mxu0 %vm4762_vm3, %v6937_v32  ;;  %10626 = vmatmul.mubr.msk.f32.vlgmr.msra.gmra.mxu1 %vm4762_vm3, %v7020_v35  ;;  %v7520_v32 = vld [vmem:[#allocation10 + $0x848] sm:$0xff] }
 0x3fa   :  { %10628 = vmatprep.subr.mxu0 %v13533_v63  ;;  %10647 = vmatprep.subr.mxu1 %v13533_v63 }
 0x3fb   :  { %10629 = vmatpush3.msra.mxu0 %v7111_v58  ;;  %10648 = vmatpush3.msra.mxu1 %v7194_v16  ;;  %v7436_v16 = vld [vmem:[#allocation10 + $0x800] sm:$0xff] }
 0x3fc   :  { %10630 = vmatprep.subr.mxu0 %v13533_v63  ;;  %10649 = vmatprep.subr.mxu1 %v13533_v63 }
 0x3fd   :  { %10631 = vmatpush3.msra.mxu0 %v7110_v31  ;;  %10650 = vmatpush3.msra.mxu1 %v7193_v29  ;;  %v7519_v29 = vld [vmem:[#allocation10 + $0x840] sm:$0xff] }
 0x3fe   :  { %10632 = vmatprep.subr.mxu0 %v13533_v63  ;;  %10651 = vmatprep.subr.mxu1 %v13533_v63 }
 0x3ff   :  { %10633 = vmatpush3.msra.mxu0 %v7109_v40  ;;  %10652 = vmatpush3.msra.mxu1 %v7192_v62 }
 0x400   :  { %10634 = vmatprep.subr.mxu0 %v13533_v63  ;;  %10653 = vmatprep.subr.mxu1 %v13533_v63 }
 0x401   :  { %10635 = vmatpush3.msra.mxu0 %v7108_v1  ;;  %10654 = vmatpush3.msra.mxu1 %v7191_v27  ;;  %v7435_v27 = vld [vmem:[#allocation3 + $0x64] sm:$0x3] }
 0x402   :  { %10636 = vmatprep.subr.mxu0 %v13533_v63  ;;  %10655 = vmatprep.subr.mxu1 %v13533_v63 }
 0x403   :  { %10637 = vmatpush3.msra.mxu0 %v7107_v46  ;;  %10656 = vmatpush3.msra.mxu1 %v7190_v17  ;;  %v7518_v46 = vld [vmem:[#allocation3 + $0x66] sm:$0x3]  ;;  %v7609_v17 = vld [vmem:[#allocation10 + $0x8b8] sm:$0xff] }
 0x404   :  { %10638 = vmatprep.subr.mxu0 %v13533_v63  ;;  %10657 = vmatprep.subr.mxu1 %v13533_v63 }
 0x405   :  { %10639 = vmatpush3.msra.mxu0 %v7106_v23  ;;  %10658 = vmatpush3.msra.mxu1 %v7189_v44  ;;  %v5355_v5 = vpop.f32.mrf.mxu0  ;;  %v5438_v30 = vpop.f32.mrf.mxu1  ;;  %v7692_v23 = vld [vmem:[#allocation10 + $0x8f8] sm:$0xff]  ;;  %v7608_v44 = vld [vmem:[#allocation10 + $0x8b0] sm:$0xff] }
 0x406   :  { %10640 = vmatprep.subr.mxu0 %v13533_v63  ;;  %10659 = vmatprep.subr.mxu1 %v13533_v63  ;;  %v5359_v52 = vadd.f32 %v5355_v5, %v5276_v48  ;;  %v7437_v48 = vld [vmem:[#allocation10 + $0x808] sm:$0xff] }
 0x407   :  { %10641 = vmatpush3.msra.mxu0 %v7105_v51  ;;  %10660 = vmatpush3.msra.mxu1 %v7188_v39  ;;  %v10228_v57 = vpop.f32.mrf.mxu0  ;;  %v10247_v37 = vpop.f32.mrf.mxu1  ;;  %v7691_v51 = vld [vmem:[#allocation10 + $0x8f0] sm:$0xff]  ;;  %v7607_v39 = vld [vmem:[#allocation10 + $0x8a8] sm:$0xff] }
 0x408   :  { %10642 = vmatprep.subr.mxu0 %v13533_v63  ;;  %10661 = vmatprep.subr.mxu1 %v13533_v63  ;;  %v5442_v47 = vadd.f32 %v5438_v30, %v5359_v52  ;;  %v7690_v5 = vld [vmem:[#allocation10 + $0x8e8] sm:$0xff]  ;;  %v7606_v30 = vld [vmem:[#allocation10 + $0x8a0] sm:$0xff]  ;;  %v7605_v52 = vld [vmem:[#allocation10 + $0x898] sm:$0xff] }
 0x409   :  { %10643 = vmatpush3.msra.mxu0 %v7104_v9  ;;  %10644 = vmatprep.mubr.msk.f32.mxu0 %vm11127_vm2, %v13533_v63  ;;  %v7689_v9 = vld [vmem:[#allocation10 + $0x8e0] sm:$0xff]  ;;  %v7604_v57 = vld [vmem:[#allocation10 + $0x890] sm:$0xff] }
 0x40a   :  { %10662 = vmatpush3.msra.mxu1 %v7187_v41  ;;  %10663 = vmatprep.mubr.msk.f32.mxu1 %vm11127_vm2, %v13533_v63  ;;  %v7688_v41 = vld [vmem:[#allocation10 + $0x8d8] sm:$0xff]  ;;  %v7687_v37 = vld [vmem:[#allocation10 + $0x8d0] sm:$0xff] }
 0x40b   :  { %10645 = vmatmul.mubr.msk.f32.vlgmr.msra.gmra.mxu0 %vm4762_vm3, %v7103_v49  ;;  %10664 = vmatmul.mubr.msk.f32.vlgmr.msra.gmra.mxu1 %vm4762_vm3, %v7186_v3  ;;  %v7686_v49 = vld [vmem:[#allocation10 + $0x8c8] sm:$0xff] }
 0x40c   :  { %10666 = vmatprep.subr.mxu0 %v13533_v63  ;;  %10685 = vmatprep.subr.mxu1 %v13533_v63 }
 0x40d   :  { %10667 = vmatpush3.msra.mxu0 %v7277_v11  ;;  %10686 = vmatpush3.msra.mxu1 %v7360_v8  ;;  %v7602_v8 = vld [vmem:[#allocation10 + $0x880] sm:$0xff] }
 0x40e   :  { %10668 = vmatprep.subr.mxu0 %v13533_v63  ;;  %10687 = vmatprep.subr.mxu1 %v13533_v63 }
 0x40f   :  { %10669 = vmatpush3.msra.mxu0 %v7276_v42  ;;  %10688 = vmatpush3.msra.mxu1 %v7359_v22  ;;  %v7685_v22 = vld [vmem:[#allocation10 + $0x8c0] sm:$0xff] }
 0x410   :  { %10670 = vmatprep.subr.mxu0 %v13533_v63  ;;  %10689 = vmatprep.subr.mxu1 %v13533_v63 }
 0x411   :  { %10671 = vmatpush3.msra.mxu0 %v7275_v38  ;;  %10690 = vmatpush3.msra.mxu1 %v7358_v54 }
 0x412   :  { %10672 = vmatprep.subr.mxu0 %v13533_v63  ;;  %10691 = vmatprep.subr.mxu1 %v13533_v63 }
 0x413   :  { %10673 = vmatpush3.msra.mxu0 %v7274_v18  ;;  %10692 = vmatpush3.msra.mxu1 %v7357_v53  ;;  %v7601_v53 = vld [vmem:[#allocation3 + $0x68] sm:$0x3] }
 0x414   :  { %10674 = vmatprep.subr.mxu0 %v13533_v63  ;;  %10693 = vmatprep.subr.mxu1 %v13533_v63 }
 0x415   :  { %10675 = vmatpush3.msra.mxu0 %v7273_v60  ;;  %10694 = vmatpush3.msra.mxu1 %v7356_v14  ;;  %v7684_v60 = vld [vmem:[#allocation3 + $0x6e] sm:$0x3]  ;;  %v7775_v14 = vld [vmem:[#allocation10 + $0x938] sm:$0xff] }
 0x416   :  { %10676 = vmatprep.subr.mxu0 %v13533_v63  ;;  %10695 = vmatprep.subr.mxu1 %v13533_v63 }
 0x417   :  { %10677 = vmatpush3.msra.mxu0 %v7272_v45  ;;  %10696 = vmatpush3.msra.mxu1 %v7355_v61  ;;  %v5521_v24 = vpop.f32.mrf.mxu0  ;;  %v5604_v28 = vpop.f32.mrf.mxu1  ;;  %v7858_v45 = vld [vmem:[#allocation10 + $0x978] sm:$0xff]  ;;  %v7774_v61 = vld [vmem:[#allocation10 + $0x930] sm:$0xff] }
 0x418   :  { %10678 = vmatprep.subr.mxu0 %v13533_v63  ;;  %10697 = vmatprep.subr.mxu1 %v13533_v63  ;;  %v5525_v34 = vadd.f32 %v5521_v24, %v5442_v47  ;;  %v7603_v47 = vld [vmem:[#allocation10 + $0x888] sm:$0xff] }
 0x419   :  { %10679 = vmatpush3.msra.mxu0 %v7271_v59  ;;  %10698 = vmatpush3.msra.mxu1 %v7354_v43  ;;  %v10266_v19 = vpop.f32.mrf.mxu0  ;;  %v10285_v25 = vpop.f32.mrf.mxu1  ;;  %v7857_v59 = vld [vmem:[#allocation10 + $0x970] sm:$0xff]  ;;  %v7773_v43 = vld [vmem:[#allocation10 + $0x928] sm:$0xff] }
 0x41a   :  { %10680 = vmatprep.subr.mxu0 %v13533_v63  ;;  %10699 = vmatprep.subr.mxu1 %v13533_v63  ;;  %v5608_v21 = vadd.f32 %v5604_v28, %v5525_v34  ;;  %v7856_v24 = vld [vmem:[#allocation10 + $0x968] sm:$0xff]  ;;  %v7772_v28 = vld [vmem:[#allocation10 + $0x920] sm:$0xff]  ;;  %v7771_v34 = vld [vmem:[#allocation10 + $0x918] sm:$0xff] }
 0x41b   :  { %10681 = vmatpush3.msra.mxu0 %v7270_v10  ;;  %10682 = vmatprep.mubr.msk.f32.mxu0 %vm11127_vm2, %v13533_v63  ;;  %v7855_v10 = vld [vmem:[#allocation10 + $0x960] sm:$0xff]  ;;  %v7770_v19 = vld [vmem:[#allocation10 + $0x910] sm:$0xff] }
 0x41c   :  { %10700 = vmatpush3.msra.mxu1 %v7353_v2  ;;  %10701 = vmatprep.mubr.msk.f32.mxu1 %vm11127_vm2, %v13533_v63  ;;  %v7854_v2 = vld [vmem:[#allocation10 + $0x958] sm:$0xff]  ;;  %v7853_v25 = vld [vmem:[#allocation10 + $0x950] sm:$0xff] }
 0x41d   :  { %10683 = vmatmul.mubr.msk.f32.vlgmr.msra.gmra.mxu0 %vm4762_vm3, %v7269_v7  ;;  %10702 = vmatmul.mubr.msk.f32.vlgmr.msra.gmra.mxu1 %vm4762_vm3, %v7352_v6  ;;  %v7852_v7 = vld [vmem:[#allocation10 + $0x948] sm:$0xff] }
 0x41e   :  { %10704 = vmatprep.subr.mxu0 %v13533_v63  ;;  %10723 = vmatprep.subr.mxu1 %v13533_v63 }
 0x41f   :  { %10705 = vmatpush3.msra.mxu0 %v7443_v20  ;;  %10724 = vmatpush3.msra.mxu1 %v7526_v33  ;;  %v7768_v33 = vld [vmem:[#allocation10 + $0x900] sm:$0xff] }
 0x420   :  { %10706 = vmatprep.subr.mxu0 %v13533_v63  ;;  %10725 = vmatprep.subr.mxu1 %v13533_v63 }
 0x421   :  { %10707 = vmatpush3.msra.mxu0 %v7442_v55  ;;  %10726 = vmatpush3.msra.mxu1 %v7525_v12  ;;  %v7851_v12 = vld [vmem:[#allocation10 + $0x940] sm:$0xff] }
 0x422   :  { %10708 = vmatprep.subr.mxu0 %v13533_v63  ;;  %10727 = vmatprep.subr.mxu1 %v13533_v63 }
 0x423   :  { %10709 = vmatpush3.msra.mxu0 %v7441_v4  ;;  %10728 = vmatpush3.msra.mxu1 %v7524_v36 }
 0x424   :  { %10710 = vmatprep.subr.mxu0 %v13533_v63  ;;  %10729 = vmatprep.subr.mxu1 %v13533_v63 }
 0x425   :  { %10711 = vmatpush3.msra.mxu0 %v7440_v13  ;;  %10730 = vmatpush3.msra.mxu1 %v7523_v50  ;;  %v7767_v50 = vld [vmem:[#allocation3 + $0x70] sm:$0x3] }
 0x426   :  { %10712 = vmatprep.subr.mxu0 %v13533_v63  ;;  %10731 = vmatprep.subr.mxu1 %v13533_v63 }
 0x427   :  { %10713 = vmatpush3.msra.mxu0 %v7439_v0  ;;  %10732 = vmatpush3.msra.mxu1 %v7522_v56  ;;  %v7850_v0 = vld [vmem:[#allocation3 + $0x72] sm:$0x3]  ;;  %v7941_v56 = vld [vmem:[#allocation10 + $0x9b8] sm:$0xff] }
 0x428   :  { %10714 = vmatprep.subr.mxu0 %v13533_v63  ;;  %10733 = vmatprep.subr.mxu1 %v13533_v63 }
 0x429   :  { %10715 = vmatpush3.msra.mxu0 %v7438_v15  ;;  %10734 = vmatpush3.msra.mxu1 %v7521_v26  ;;  %v5687_v35 = vpop.f32.mrf.mxu0  ;;  %v5770_v58 = vpop.f32.mrf.mxu1  ;;  %v8024_v15 = vld [vmem:[#allocation10 + $0x9f8] sm:$0xff]  ;;  %v7940_v26 = vld [vmem:[#allocation10 + $0x9b0] sm:$0xff] }
 0x42a   :  { %10716 = vmatprep.subr.mxu0 %v13533_v63  ;;  %10735 = vmatprep.subr.mxu1 %v13533_v63  ;;  %v5691_v31 = vadd.f32 %v5687_v35, %v5608_v21  ;;  %v7769_v21 = vld [vmem:[#allocation10 + $0x908] sm:$0xff] }
 0x42b   :  { %10717 = vmatpush3.msra.mxu0 %v7437_v48  ;;  %10736 = vmatpush3.msra.mxu1 %v7520_v32  ;;  %v10304_v40 = vpop.f32.mrf.mxu0  ;;  %v10323_v62 = vpop.f32.mrf.mxu1  ;;  %v8023_v48 = vld [vmem:[#allocation10 + $0x9f0] sm:$0xff]  ;;  %v7939_v32 = vld [vmem:[#allocation10 + $0x9a8] sm:$0xff] }
 0x42c   :  { %10718 = vmatprep.subr.mxu0 %v13533_v63  ;;  %10737 = vmatprep.subr.mxu1 %v13533_v63  ;;  %v5774_v1 = vadd.f32 %v5770_v58, %v5691_v31  ;;  %v8022_v35 = vld [vmem:[#allocation10 + $0x9e8] sm:$0xff]  ;;  %v7938_v58 = vld [vmem:[#allocation10 + $0x9a0] sm:$0xff]  ;;  %v7937_v31 = vld [vmem:[#allocation10 + $0x998] sm:$0xff] }
 0x42d   :  { %10719 = vmatpush3.msra.mxu0 %v7436_v16  ;;  %10720 = vmatprep.mubr.msk.f32.mxu0 %vm11127_vm2, %v13533_v63  ;;  %v8021_v16 = vld [vmem:[#allocation10 + $0x9e0] sm:$0xff]  ;;  %v7936_v40 = vld [vmem:[#allocation10 + $0x990] sm:$0xff] }
 0x42e   :  { %10738 = vmatpush3.msra.mxu1 %v7519_v29  ;;  %10739 = vmatprep.mubr.msk.f32.mxu1 %vm11127_vm2, %v13533_v63  ;;  %v8020_v29 = vld [vmem:[#allocation10 + $0x9d8] sm:$0xff]  ;;  %v8019_v62 = vld [vmem:[#allocation10 + $0x9d0] sm:$0xff] }
 0x42f   :  { %10721 = vmatmul.mubr.msk.f32.vlgmr.msra.gmra.mxu0 %vm4762_vm3, %v7435_v27  ;;  %10740 = vmatmul.mubr.msk.f32.vlgmr.msra.gmra.mxu1 %vm4762_vm3, %v7518_v46  ;;  %v8018_v27 = vld [vmem:[#allocation10 + $0x9c8] sm:$0xff] }
 0x430   :  { %10742 = vmatprep.subr.mxu0 %v13533_v63  ;;  %10761 = vmatprep.subr.mxu1 %v13533_v63 }
 0x431   :  { %10743 = vmatpush3.msra.mxu0 %v7609_v17  ;;  %10762 = vmatpush3.msra.mxu1 %v7692_v23  ;;  %v7934_v23 = vld [vmem:[#allocation10 + $0x980] sm:$0xff] }
 0x432   :  { %10744 = vmatprep.subr.mxu0 %v13533_v63  ;;  %10763 = vmatprep.subr.mxu1 %v13533_v63 }
 0x433   :  { %10745 = vmatpush3.msra.mxu0 %v7608_v44  ;;  %10764 = vmatpush3.msra.mxu1 %v7691_v51  ;;  %v8017_v51 = vld [vmem:[#allocation10 + $0x9c0] sm:$0xff] }
 0x434   :  { %10746 = vmatprep.subr.mxu0 %v13533_v63  ;;  %10765 = vmatprep.subr.mxu1 %v13533_v63 }
 0x435   :  { %10747 = vmatpush3.msra.mxu0 %v7607_v39  ;;  %10766 = vmatpush3.msra.mxu1 %v7690_v5 }
 0x436   :  { %10748 = vmatprep.subr.mxu0 %v13533_v63  ;;  %10767 = vmatprep.subr.mxu1 %v13533_v63 }
 0x437   :  { %10749 = vmatpush3.msra.mxu0 %v7606_v30  ;;  %10768 = vmatpush3.msra.mxu1 %v7689_v9  ;;  %v7933_v9 = vld [vmem:[#allocation3 + $0x74] sm:$0x3] }
 0x438   :  { %10750 = vmatprep.subr.mxu0 %v13533_v63  ;;  %10769 = vmatprep.subr.mxu1 %v13533_v63 }
 0x439   :  { %10751 = vmatpush3.msra.mxu0 %v7605_v52  ;;  %10770 = vmatpush3.msra.mxu1 %v7688_v41  ;;  %v8016_v52 = vld [vmem:[#allocation3 + $0x76] sm:$0x3]  ;;  %v8107_v41 = vld [vmem:[#allocation10 + $0xa38] sm:$0xff] }
 0x43a   :  { %10752 = vmatprep.subr.mxu0 %v13533_v63  ;;  %10771 = vmatprep.subr.mxu1 %v13533_v63 }
 0x43b   :  { %10753 = vmatpush3.msra.mxu0 %v7604_v57  ;;  %10772 = vmatpush3.msra.mxu1 %v7687_v37  ;;  %v5853_v3 = vpop.f32.mrf.mxu0  ;;  %v5936_v11 = vpop.f32.mrf.mxu1  ;;  %v8190_v57 = vld [vmem:[#allocation10 + $0xa78] sm:$0xff]  ;;  %v8106_v37 = vld [vmem:[#allocation10 + $0xa30] sm:$0xff] }
 0x43c   :  { %10754 = vmatprep.subr.mxu0 %v13533_v63  ;;  %10773 = vmatprep.subr.mxu1 %v13533_v63  ;;  %v5857_v42 = vadd.f32 %v5853_v3, %v5774_v1  ;;  %v7935_v1 = vld [vmem:[#allocation10 + $0x988] sm:$0xff] }
 0x43d   :  { %10755 = vmatpush3.msra.mxu0 %v7603_v47  ;;  %10774 = vmatpush3.msra.mxu1 %v7686_v49  ;;  %v10342_v38 = vpop.f32.mrf.mxu0  ;;  %v10361_v54 = vpop.f32.mrf.mxu1  ;;  %v8189_v47 = vld [vmem:[#allocation10 + $0xa70] sm:$0xff]  ;;  %v8105_v49 = vld [vmem:[#allocation10 + $0xa28] sm:$0xff] }
 0x43e   :  { %10756 = vmatprep.subr.mxu0 %v13533_v63  ;;  %10775 = vmatprep.subr.mxu1 %v13533_v63  ;;  %v5940_v18 = vadd.f32 %v5936_v11, %v5857_v42  ;;  %v8188_v3 = vld [vmem:[#allocation10 + $0xa68] sm:$0xff]  ;;  %v8104_v11 = vld [vmem:[#allocation10 + $0xa20] sm:$0xff]  ;;  %v8103_v42 = vld [vmem:[#allocation10 + $0xa18] sm:$0xff] }
 0x43f   :  { %10757 = vmatpush3.msra.mxu0 %v7602_v8  ;;  %10758 = vmatprep.mubr.msk.f32.mxu0 %vm11127_vm2, %v13533_v63  ;;  %v8187_v8 = vld [vmem:[#allocation10 + $0xa60] sm:$0xff]  ;;  %v8102_v38 = vld [vmem:[#allocation10 + $0xa10] sm:$0xff] }
 0x440   :  { %10776 = vmatpush3.msra.mxu1 %v7685_v22  ;;  %10777 = vmatprep.mubr.msk.f32.mxu1 %vm11127_vm2, %v13533_v63  ;;  %v8186_v22 = vld [vmem:[#allocation10 + $0xa58] sm:$0xff]  ;;  %v8185_v54 = vld [vmem:[#allocation10 + $0xa50] sm:$0xff] }
 0x441   :  { %10759 = vmatmul.mubr.msk.f32.vlgmr.msra.gmra.mxu0 %vm4762_vm3, %v7601_v53  ;;  %10778 = vmatmul.mubr.msk.f32.vlgmr.msra.gmra.mxu1 %vm4762_vm3, %v7684_v60  ;;  %v8184_v53 = vld [vmem:[#allocation10 + $0xa48] sm:$0xff] }
 0x442   :  { %10780 = vmatprep.subr.mxu0 %v13533_v63  ;;  %10799 = vmatprep.subr.mxu1 %v13533_v63 }
 0x443   :  { %10781 = vmatpush3.msra.mxu0 %v7775_v14  ;;  %10800 = vmatpush3.msra.mxu1 %v7858_v45  ;;  %v8100_v45 = vld [vmem:[#allocation10 + $0xa00] sm:$0xff] }
 0x444   :  { %10782 = vmatprep.subr.mxu0 %v13533_v63  ;;  %10801 = vmatprep.subr.mxu1 %v13533_v63 }
 0x445   :  { %10783 = vmatpush3.msra.mxu0 %v7774_v61  ;;  %10802 = vmatpush3.msra.mxu1 %v7857_v59  ;;  %v8183_v59 = vld [vmem:[#allocation10 + $0xa40] sm:$0xff] }
 0x446   :  { %10784 = vmatprep.subr.mxu0 %v13533_v63  ;;  %10803 = vmatprep.subr.mxu1 %v13533_v63 }
 0x447   :  { %10785 = vmatpush3.msra.mxu0 %v7773_v43  ;;  %10804 = vmatpush3.msra.mxu1 %v7856_v24 }
 0x448   :  { %10786 = vmatprep.subr.mxu0 %v13533_v63  ;;  %10805 = vmatprep.subr.mxu1 %v13533_v63 }
 0x449   :  { %10787 = vmatpush3.msra.mxu0 %v7772_v28  ;;  %10806 = vmatpush3.msra.mxu1 %v7855_v10  ;;  %v8099_v10 = vld [vmem:[#allocation3 + $0x78] sm:$0x3] }
 0x44a   :  { %10788 = vmatprep.subr.mxu0 %v13533_v63  ;;  %10807 = vmatprep.subr.mxu1 %v13533_v63 }
 0x44b   :  { %10789 = vmatpush3.msra.mxu0 %v7771_v34  ;;  %10808 = vmatpush3.msra.mxu1 %v7854_v2  ;;  %v8182_v34 = vld [vmem:[#allocation3 + $0x7a] sm:$0x3] }
 0x44c   :  { %10790 = vmatprep.subr.mxu0 %v13533_v63  ;;  %10809 = vmatprep.subr.mxu1 %v13533_v63 }
 0x44d   :  { %10791 = vmatpush3.msra.mxu0 %v7770_v19  ;;  %10810 = vmatpush3.msra.mxu1 %v7853_v25  ;;  %v6019_v6 = vpop.f32.mrf.mxu0  ;;  %v6102_v20 = vpop.f32.mrf.mxu1 }
 0x44e   :  { %10792 = vmatprep.subr.mxu0 %v13533_v63  ;;  %10811 = vmatprep.subr.mxu1 %v13533_v63  ;;  %v6023_v55 = vadd.f32 %v6019_v6, %v5940_v18  ;;  %v8101_v18 = vld [vmem:[#allocation10 + $0xa08] sm:$0xff] }
 0x44f   :  { %10793 = vmatpush3.msra.mxu0 %v7769_v21  ;;  %10812 = vmatpush3.msra.mxu1 %v7852_v7  ;;  %v10380_v4 = vpop.f32.mrf.mxu0  ;;  %v10399_v36 = vpop.f32.mrf.mxu1 }
 0x450   :  { %10794 = vmatprep.subr.mxu0 %v13533_v63  ;;  %10813 = vmatprep.subr.mxu1 %v13533_v63  ;;  %v6106_v13 = vadd.f32 %v6102_v20, %v6023_v55  ;;  %v8288_v4 = vld [vmem:[#allocation13 + $0x70] sm:$0xff] }
 0x451   :  { %10795 = vmatpush3.msra.mxu0 %v7768_v33  ;;  %10796 = vmatprep.mubr.msk.f32.mxu0 %vm11127_vm2, %v13533_v63 }
 0x452   :  { %10814 = vmatpush3.msra.mxu1 %v7851_v12  ;;  %10815 = vmatprep.mubr.msk.f32.mxu1 %vm11127_vm2, %v13533_v63  ;;  %v8289_v12 = vld [vmem:[#allocation13 + $0x78] sm:$0xff] }
 0x453   :  { %10797 = vmatmul.mubr.msk.f32.vlgmr.msra.gmra.mxu0 %vm4762_vm3, %v7767_v50  ;;  %10816 = vmatmul.mubr.msk.f32.vlgmr.msra.gmra.mxu1 %vm4762_vm3, %v7850_v0  ;;  %v8287_v0 = vld [vmem:[#allocation13 + $0x68] sm:$0xff] }
 0x454   :  { %10818 = vmatprep.subr.mxu0 %v13533_v63  ;;  %10837 = vmatprep.subr.mxu1 %v13533_v63 }
 0x455   :  { %10819 = vmatpush3.msra.mxu0 %v7941_v56  ;;  %10838 = vmatpush3.msra.mxu1 %v8024_v15  ;;  %v8286_v56 = vld [vmem:[#allocation13 + $0x60] sm:$0xff] }
 0x456   :  { %10820 = vmatprep.subr.mxu0 %v13533_v63  ;;  %10839 = vmatprep.subr.mxu1 %v13533_v63 }
 0x457   :  { %10821 = vmatpush3.msra.mxu0 %v7940_v26  ;;  %10840 = vmatpush3.msra.mxu1 %v8023_v48 }
 0x458   :  { %10822 = vmatprep.subr.mxu0 %v13533_v63  ;;  %10841 = vmatprep.subr.mxu1 %v13533_v63 }
 0x459   :  { %10823 = vmatpush3.msra.mxu0 %v7939_v32  ;;  %10842 = vmatpush3.msra.mxu1 %v8022_v35  ;;  %v8285_v32 = vld [vmem:[#allocation13 + $0x58] sm:$0xff]  ;;  %v8284_v35 = vld [vmem:[#allocation13 + $0x50] sm:$0xff] }
 0x45a   :  { %10824 = vmatprep.subr.mxu0 %v13533_v63  ;;  %10843 = vmatprep.subr.mxu1 %v13533_v63 }
 0x45b   :  { %10825 = vmatpush3.msra.mxu0 %v7938_v58  ;;  %10844 = vmatpush3.msra.mxu1 %v8021_v16 }
 0x45c   :  { %10826 = vmatprep.subr.mxu0 %v13533_v63  ;;  %10845 = vmatprep.subr.mxu1 %v13533_v63 }
 0x45d   :  { %10827 = vmatpush3.msra.mxu0 %v7937_v31  ;;  %10846 = vmatpush3.msra.mxu1 %v8020_v29  ;;  %v8283_v29 = vld [vmem:[#allocation13 + $0x48] sm:$0xff] }
 0x45e   :  { %10828 = vmatprep.subr.mxu0 %v13533_v63  ;;  %10847 = vmatprep.subr.mxu1 %v13533_v63 }
 0x45f   :  { %10829 = vmatpush3.msra.mxu0 %v7936_v40  ;;  %10848 = vmatpush3.msra.mxu1 %v8019_v62  ;;  %v6185_v46 = vpop.f32.mrf.mxu0  ;;  %v6268_v17 = vpop.f32.mrf.mxu1  ;;  %v8282_v40 = vld [vmem:[#allocation13 + $0x40] sm:$0xff]  ;;  %v8281_v62 = vld [vmem:[#allocation13 + $0x38] sm:$0xff] }
 0x460   :  { %10830 = vmatprep.subr.mxu0 %v13533_v63  ;;  %10849 = vmatprep.subr.mxu1 %v13533_v63  ;;  %v6189_v44 = vadd.f32 %v6185_v46, %v6106_v13  ;;  %v8278_v46 = vld [vmem:[#allocation13 + $0x20] sm:$0xff] }
 0x461   :  { %10831 = vmatpush3.msra.mxu0 %v7935_v1  ;;  %10850 = vmatpush3.msra.mxu1 %v8018_v27  ;;  %v10418_v39 = vpop.f32.mrf.mxu0  ;;  %v10437_v5 = vpop.f32.mrf.mxu1  ;;  %v8280_v1 = vld [vmem:[#allocation13 + $0x30] sm:$0xff]  ;;  %v8279_v27 = vld [vmem:[#allocation13 + $0x28] sm:$0xff] }
 0x462   :  { %10832 = vmatprep.subr.mxu0 %v13533_v63  ;;  %10851 = vmatprep.subr.mxu1 %v13533_v63  ;;  %v6272_v30 = vadd.f32 %v6268_v17, %v6189_v44  ;;  %v8277_v17 = vld [vmem:[#allocation13 + $0x18] sm:$0xff]  ;;  %v8276_v39 = vld [vmem:[#allocation13 + $0x10] sm:$0xff] }
 0x463   :  { %10833 = vmatpush3.msra.mxu0 %v7934_v23  ;;  %10834 = vmatprep.mubr.msk.f32.mxu0 %vm11127_vm2, %v13533_v63 }
 0x464   :  { %10852 = vmatpush3.msra.mxu1 %v8017_v51  ;;  %10853 = vmatprep.mubr.msk.f32.mxu1 %vm11127_vm2, %v13533_v63 }
 0x465   :  { %10835 = vmatmul.mubr.msk.f32.vlgmr.msra.gmra.mxu0 %vm4762_vm3, %v7933_v9  ;;  %10854 = vmatmul.mubr.msk.f32.vlgmr.msra.gmra.mxu1 %vm4762_vm3, %v8016_v52  ;;  %v8275_v52 = vld [vmem:[#allocation13 + $0x8] sm:$0xff] }
 0x466   :  { %10856 = vmatprep.subr.mxu0 %v13533_v63  ;;  %10875 = vmatprep.subr.mxu1 %v13533_v63 }
 0x467   :  { %10857 = vmatpush3.msra.mxu0 %v8107_v41  ;;  %10876 = vmatpush3.msra.mxu1 %v8190_v57  ;;  %v8274_v41 = vld [vmem:[#allocation13] sm:$0xff] }
 0x468   :  { %10858 = vmatprep.subr.mxu0 %v13533_v63  ;;  %10877 = vmatprep.subr.mxu1 %v13533_v63 }
 0x469   :  { %10859 = vmatpush3.msra.mxu0 %v8106_v37  ;;  %10878 = vmatpush3.msra.mxu1 %v8189_v47 }
 0x46a   :  { %10860 = vmatprep.subr.mxu0 %v13533_v63  ;;  %10879 = vmatprep.subr.mxu1 %v13533_v63 }
 0x46b   :  { %10861 = vmatpush3.msra.mxu0 %v8105_v49  ;;  %10880 = vmatpush3.msra.mxu1 %v8188_v3 }
 0x46c   :  { %10862 = vmatprep.subr.mxu0 %v13533_v63  ;;  %10881 = vmatprep.subr.mxu1 %v13533_v63 }
 0x46d   :  { %10863 = vmatpush3.msra.mxu0 %v8104_v11  ;;  %10882 = vmatpush3.msra.mxu1 %v8187_v8 }
 0x46e   :  { %10864 = vmatprep.subr.mxu0 %v13533_v63  ;;  %10883 = vmatprep.subr.mxu1 %v13533_v63 }
 0x46f   :  { %10865 = vmatpush3.msra.mxu0 %v8103_v42  ;;  %10884 = vmatpush3.msra.mxu1 %v8186_v22 }
 0x470   :  { %10866 = vmatprep.subr.mxu0 %v13533_v63  ;;  %10885 = vmatprep.subr.mxu1 %v13533_v63 }
 0x471   :  { %10867 = vmatpush3.msra.mxu0 %v8102_v38  ;;  %10886 = vmatpush3.msra.mxu1 %v8185_v54  ;;  %v6351_v60 = vpop.f32.mrf.mxu0  ;;  %v6434_v14 = vpop.f32.mrf.mxu1 }
 0x472   :  { %10868 = vmatprep.subr.mxu0 %v13533_v63  ;;  %10887 = vmatprep.subr.mxu1 %v13533_v63  ;;  %v6355_v61 = vadd.f32 %v6351_v60, %v6272_v30 }
 0x473   :  { %10869 = vmatpush3.msra.mxu0 %v8101_v18  ;;  %10888 = vmatpush3.msra.mxu1 %v8184_v53  ;;  %v10456_v43 = vpop.f32.mrf.mxu0  ;;  %v10475_v24 = vpop.f32.mrf.mxu1 }
 0x474   :  { %10870 = vmatprep.subr.mxu0 %v13533_v63  ;;  %10889 = vmatprep.subr.mxu1 %v13533_v63  ;;  %v6438_v28 = vadd.f32 %v6434_v14, %v6355_v61 }
 0x475   :  { %10871 = vmatpush3.msra.mxu0 %v8100_v45  ;;  %10872 = vmatprep.mubr.msk.f32.mxu0 %vm11127_vm2, %v13533_v63 }
 0x476   :  { %10890 = vmatpush3.msra.mxu1 %v8183_v59  ;;  %10891 = vmatprep.mubr.msk.f32.mxu1 %vm11127_vm2, %v13533_v63 }
 0x477   :  { %10873 = vmatmul.mubr.msk.f32.vlgmr.msra.gmra.mxu0 %vm4762_vm3, %v8099_v10  ;;  %10892 = vmatmul.mubr.msk.f32.vlgmr.msra.gmra.mxu1 %vm4762_vm3, %v8182_v34 }
 0x478   :  { %10894 = vmatprep.subr.mxu0 %v13533_v63  ;;  %10926 = vmatprep.mubr.msk.f32.mxu0 %vm11127_vm2, %v13533_v63 }
 0x479   :  { %10895 = vmatpush3.msra.mxu0 %v8289_v12 }
 0x47a   :  { %10896 = vmatprep.subr.mxu0 %v13533_v63 }
 0x47b   :  { %10897 = vmatpush3.msra.mxu0 %v8288_v4 }
 0x47c   :  { %10898 = vmatprep.subr.mxu0 %v13533_v63 }
 0x47d   :  { %10899 = vmatpush3.msra.mxu0 %v8287_v0 }
 0x47e   :  { %10900 = vmatprep.subr.mxu0 %v13533_v63 }
 0x47f   :  { %10901 = vmatpush3.msra.mxu0 %v8286_v56  ;;  %v8754_v56 = vld [vmem:[#allocation12] ss:$0 sm:$0xff] }
 0x480   :  { %10902 = vmatprep.subr.mxu0 %v13533_v63 }
 0x481   :  { %10903 = vmatpush3.msra.mxu0 %v8285_v32 }
 0x482   :  { %10904 = vmatprep.subr.mxu0 %v13533_v63 }
 0x483   :  { %v6517_v2 = vpop.f32.mrf.mxu0  ;;  %v6600_v19 = vpop.f32.mrf.mxu1  ;;  %10905 = vmatpush3.msra.mxu0 %v8284_v35 }
 0x484   :  { %v6521_v25 = vadd.f32 %v6517_v2, %v6438_v28  ;;  %10906 = vmatprep.subr.mxu0 %v13533_v63 }
 0x485   :  { %v10494_v21 = vpop.f32.mrf.mxu0  ;;  %v10513_v7 = vpop.f32.mrf.mxu1  ;;  %10907 = vmatpush3.msra.mxu0 %v8283_v29 }
 0x486   :  { %v6604_v6 = vadd.f32 %v6600_v19, %v6521_v25  ;;  %10908 = vmatprep.subr.mxu0 %v13533_v63 }
 0x487   :  { %10909 = vmatpush3.msra.mxu0 %v8282_v40 }
 0x488   :  { %10910 = vmatprep.subr.mxu0 %v13533_v63 }
 0x489   :  { %10911 = vmatpush3.msra.mxu0 %v8281_v62 }
 0x48a   :  { %10912 = vmatprep.subr.mxu0 %v13533_v63 }
 0x48b   :  { %10913 = vmatpush3.msra.mxu0 %v8280_v1 }
 0x48c   :  { %10914 = vmatprep.subr.mxu0 %v13533_v63 }
 0x48d   :  { %10915 = vmatpush3.msra.mxu0 %v8279_v27 }
 0x48e   :  { %10916 = vmatprep.subr.mxu0 %v13533_v63 }
 0x48f   :  { %10917 = vmatpush3.msra.mxu0 %v8278_v46 }
 0x490   :  { %10918 = vmatprep.subr.mxu0 %v13533_v63 }
 0x491   :  { %10919 = vmatpush3.msra.mxu0 %v8277_v17 }
 0x492   :  { %10920 = vmatprep.subr.mxu0 %v13533_v63 }
 0x493   :  { %10921 = vmatpush3.msra.mxu0 %v8276_v39 }
 0x494   :  { %10922 = vmatprep.subr.mxu0 %v13533_v63 }
 0x495   :  { %v6683_v20 = vpop.f32.mrf.mxu0  ;;  %v6766_v33 = vpop.f32.mrf.mxu1  ;;  %10923 = vmatpush3.msra.mxu0 %v8275_v52 }
 0x496   :  { %v6687_v55 = vadd.f32 %v6683_v20, %v6604_v6  ;;  %10924 = vmatprep.subr.mxu0 %v13533_v63 }
 0x497   :  { %v10532_v36 = vpop.f32.mrf.mxu0  ;;  %v10551_v13 = vpop.f32.mrf.mxu1  ;;  %10925 = vmatpush3.msra.mxu0 %v8274_v41 }
 0x498   :  { %v6770_v50 = vadd.f32 %v6766_v33, %v6687_v55 }
 0x4a7   :  { %v6849_v15 = vpop.f32.mrf.mxu0  ;;  %v6932_v26 = vpop.f32.mrf.mxu1 }
 0x4a8   :  { %v6853_v48 = vadd.f32 %v6849_v15, %v6770_v50 }
 0x4a9   :  { %v10570_v58 = vpop.f32.mrf.mxu0  ;;  %v10589_v16 = vpop.f32.mrf.mxu1 }
 0x4aa   :  { %v6936_v31 = vadd.f32 %v6932_v26, %v6853_v48  ;;  %v8755_v58 = vld [vmem:[#allocation15] ss:$0 sm:$0xff] }
 0x4b9   :  { %v7015_v23 = vpop.f32.mrf.mxu0  ;;  %v7098_v44 = vpop.f32.mrf.mxu1 }
 0x4ba   :  { %v7019_v51 = vadd.f32 %v7015_v23, %v6936_v31 }
 0x4bb   :  { %v10608_v5 = vpop.f32.mrf.mxu0  ;;  %v10627_v30 = vpop.f32.mrf.mxu1 }
 0x4bc   :  { %v7102_v9 = vadd.f32 %v7098_v44, %v7019_v51 }
 0x4cb   :  { %v7181_v57 = vpop.f32.mrf.mxu0  ;;  %v7264_v37 = vpop.f32.mrf.mxu1 }
 0x4cc   :  { %v7185_v47 = vadd.f32 %v7181_v57, %v7102_v9 }
 0x4cd   :  { %v10646_v49 = vpop.f32.mrf.mxu0  ;;  %v10665_v3 = vpop.f32.mrf.mxu1 }
 0x4ce   :  { %v7268_v11 = vadd.f32 %v7264_v37, %v7185_v47 }
 0x4dd   :  { %v7347_v8 = vpop.f32.mrf.mxu0  ;;  %v7430_v42 = vpop.f32.mrf.mxu1 }
 0x4de   :  { %v7351_v22 = vadd.f32 %v7347_v8, %v7268_v11 }
 0x4df   :  { %v10684_v38 = vpop.f32.mrf.mxu0  ;;  %v10703_v54 = vpop.f32.mrf.mxu1 }
 0x4e0   :  { %v7434_v18 = vadd.f32 %v7430_v42, %v7351_v22 }
 0x4ef   :  { %v7513_v53 = vpop.f32.mrf.mxu0  ;;  %v7596_v60 = vpop.f32.mrf.mxu1 }
 0x4f0   :  { %v7517_v2 = vadd.f32 %v7513_v53, %v7434_v18 }
 0x4f1   :  { %v10722_v14 = vpop.f32.mrf.mxu0  ;;  %v10741_v45 = vpop.f32.mrf.mxu1 }
 0x4f2   :  { %v7600_v19 = vadd.f32 %v7596_v60, %v7517_v2 }
 0x501   :  { %v7679_v61 = vpop.f32.mrf.mxu0  ;;  %v7762_v63 = vpop.f32.mrf.mxu1 }
 0x502   :  { %v7683_v7 = vadd.f32 %v7679_v61, %v7600_v19 }
 0x503   :  { %v10760_v59 = vpop.f32.mrf.mxu0  ;;  %v10779_v43 = vpop.f32.mrf.mxu1 }
 0x504   :  { %v7766_v33 = vadd.f32 %v7762_v63, %v7683_v7 }
 0x513   :  { %v7845_v24 = vpop.f32.mrf.mxu0  ;;  %v7928_v28 = vpop.f32.mrf.mxu1 }
 0x514   :  { %v7849_v55 = vadd.f32 %v7845_v24, %v7766_v33 }
 0x515   :  { %v10798_v10 = vpop.f32.mrf.mxu0  ;;  %v10817_v34 = vpop.f32.mrf.mxu1 }
 0x516   :  { %v7932_v12 = vadd.f32 %v7928_v28, %v7849_v55 }
 0x525   :  { %v8011_v25 = vpop.f32.mrf.mxu0  ;;  %v8094_v21 = vpop.f32.mrf.mxu1 }
 0x526   :  { %v8015_v4 = vadd.f32 %v8011_v25, %v7932_v12 }
 0x527   :  { %v10836_v6 = vpop.f32.mrf.mxu0  ;;  %v10855_v20 = vpop.f32.mrf.mxu1 }
 0x528   :  { %v8098_v36 = vadd.f32 %v8094_v21, %v8015_v4 }
 0x537   :  { %v8177_v13 = vpop.f32.mrf.mxu0  ;;  %v8260_v50 = vpop.f32.mrf.mxu1 }
 0x538   :  { %v8181_v0 = vadd.f32 %v8177_v13, %v8098_v36 }
 0x539   :  { %v10874_v15 = vpop.f32.mrf.mxu0  ;;  %v10893_v26 = vpop.f32.mrf.mxu1 }
 0x53a   :  { %v8264_v48 = vadd.f32 %v8260_v50, %v8181_v0 }
 0x53c   :  { %v8272_v32 = vadd.f32 %v8754_v56, %v8264_v48 }
 0x53e   :  { %v8273_v35 = vmax.f32 %v8272_v32, 0.0 }
 0x540   :  { %10927 = vmatmul.mubr.f32.vlgmr.msra.gmra.mxu0 %v8273_v35 }
 0x600   :  { %v8363_v16 = vpop.f32.mrf.mxu0 }
 0x601   :  { %v8364_v31 = vadd.f32 %v8755_v58, %v8363_v16 }
 0x602   :  { %v10928_v29 = vpop.f32.mrf.mxu0 }
 0x603   :  { %8367 = vst [vmem:[#allocation16] sm:$0x3] %v8364_v31 }
 0x604   :  { %11097 = shalt.err (!%p11094_p11)
}
 0x605   :  { %8377 = dma.vmem_to_hbm [thread:$0]  %s8375_s6, 32, %s13460_s10, [#allocation6]  }
 0x606   :  { %11114 = dma.done.wait [#allocation6], 32  }
 0x607   :  { %11115 = vsyncadd [#allocation6], 4294967264 }
 0x608   :  { %8381 = vsyncpa [#allocation5], 1 }
 0x609   :  { %8382 = vsyncpa [#allocation8], 1 }
 0x60a   :  { %8383 = vsyncpa [#allocation11], 1 }
 0x60b   :  { %8384 = vsyncpa [#allocation14], 1 }
 0x60c   :  { %8385 = vsyncpa [#allocation6], 1 }

</bundles_post_ra>
